<compile_context>
chip_gen: v7x
topology: tpu7x:2x2x1
jax: 0.10.0
libtpu: 0.0.40
codegen_flags: <defaults>
</compile_context>

<pallas_src>
import jax
import jax.numpy as jnp
from jax.experimental import pallas as pl
from jax.experimental.pallas import tpu as pltpu

NEG_SLOPE = 0.01  # PyTorch nn.LeakyReLU default


def _leaky_relu(v):
    return jnp.where(v >= 0, v, NEG_SLOPE * v)


def _double_conv_kernel(x_ref, w1_ref, b1_ref, w2_ref, b2_ref, o_ref,
                        xp_ref, midp_ref, slab1_ref, slab2_ref):
    # x_ref:    (1, H, W, Cin)        input tile (one batch element, NHWC)
    # w1_ref:   (9*Cin,  Cmid)        conv1 weights, taps flattened row-major (kh, kw, cin)
    # b1_ref:   (1, Cmid)
    # w2_ref:   (9*Cmid, Cout)        conv2 weights
    # b2_ref:   (1, Cout)
    # o_ref:    (1, H, W, Cout)
    # xp_ref:   (H+2, W+2, Cin)   VMEM  zero-padded input
    # midp_ref: (H+2, W+2, Cmid)  VMEM  zero-padded mid activation (stays on-chip)
    # slab1_ref:(H, W, 9*Cin)     VMEM  im2col slab for conv1
    # slab2_ref:(H, W, 9*Cmid)    VMEM  im2col slab for conv2
    H = o_ref.shape[1]
    W = o_ref.shape[2]
    Cin = x_ref.shape[3]
    Cmid = midp_ref.shape[2]

    # ---- stage 1: pad input in VMEM (replaces HBM-level jnp.pad) ----
    xp_ref[...] = jnp.zeros(xp_ref.shape, xp_ref.dtype)
    xp_ref[1:H + 1, 1:W + 1, :] = x_ref[0].astype(xp_ref.dtype)

    # im2col: place the 9 shifted taps side-by-side on the channel axis,
    # then do ONE matmul with K = 9*Cin instead of 9 matmuls with K = Cin.
    xpad = xp_ref[...]
    for kh in range(3):
        for kw in range(3):
            t = kh * 3 + kw
            slab1_ref[:, :, t * Cin:(t + 1) * Cin] = xpad[kh:kh + H, kw:kw + W, :]
    h1 = jnp.dot(slab1_ref[...], w1_ref[...], preferred_element_type=jnp.float32)
    h1 = _leaky_relu(h1 + b1_ref[...])          # bias broadcast over (H, W)

    # ---- stage 2: mid activation stays in VMEM (fused, no HBM round-trip) ----
    midp_ref[...] = jnp.zeros(midp_ref.shape, midp_ref.dtype)
    midp_ref[1:H + 1, 1:W + 1, :] = h1
    mpad = midp_ref[...]
    for kh in range(3):
        for kw in range(3):
            t = kh * 3 + kw
            slab2_ref[:, :, t * Cmid:(t + 1) * Cmid] = mpad[kh:kh + H, kw:kw + W, :]
    h2 = jnp.dot(slab2_ref[...], w2_ref[...], preferred_element_type=jnp.float32)
    h2 = _leaky_relu(h2 + b2_ref[...])
    o_ref[0] = h2.astype(o_ref.dtype)


def double_conv_nhwc(x_nhwc, params):
    """Fused DoubleConv on NHWC input. Weights: (3,3,Cin,C) HWIO, biases: (C,)."""
    w1, b1, w2, b2 = params
    B, H, W, Cin = x_nhwc.shape
    Cmid = w1.shape[-1]
    Cout = w2.shape[-1]
    # Flatten taps so the kernel sees a single (9*C, Cout) weight matrix
    # (row-major over (kh, kw, cin) -> matches the in-kernel slab ordering).
    w1r = w1.reshape(9 * Cin, Cmid)
    w2r = w2.reshape(9 * Cmid, Cout)

    return pl.pallas_call(
        _double_conv_kernel,
        out_shape=jax.ShapeDtypeStruct((B, H, W, Cout), jnp.float32),
        grid_spec=pltpu.PrefetchScalarGridSpec(
            num_scalar_prefetch=0,
            grid=(B,),
            in_specs=[
                pl.BlockSpec((1, H, W, Cin), lambda b: (b, 0, 0, 0)),
                # Weights/bias: constant block index -> fetched once, VMEM-resident.
                pl.BlockSpec((9 * Cin, Cmid), lambda b: (0, 0)),
                pl.BlockSpec((1, Cmid), lambda b: (0, 0)),
                pl.BlockSpec((9 * Cmid, Cout), lambda b: (0, 0)),
                pl.BlockSpec((1, Cout), lambda b: (0, 0)),
            ],
            out_specs=pl.BlockSpec((1, H, W, Cout), lambda b: (b, 0, 0, 0)),
            scratch_shapes=[
                pltpu.VMEM((H + 2, W + 2, Cin), jnp.float32),
                pltpu.VMEM((H + 2, W + 2, Cmid), jnp.float32),
                pltpu.VMEM((H, W, 9 * Cin), jnp.float32),
                pltpu.VMEM((H, W, 9 * Cmid), jnp.float32),
            ]),
        compiler_params=pltpu.CompilerParams(
            dimension_semantics=("parallel",)),
    )(x_nhwc, w1r, b1.reshape(1, Cmid), w2r, b2.reshape(1, Cout))
    # Note: at UNet-scale spatial sizes add an H row-tile grid axis (with halo)
    # and bf16 storage; whole-image blocks are sized for these small test shapes.


def double_conv(x_nchw, params):
    """Forward pass of DoubleConv on NCHW input (PyTorch convention)."""
    x = jnp.transpose(x_nchw, (0, 2, 3, 1))      # NCHW -> NHWC (keep model NHWC to drop this)
    y = double_conv_nhwc(x, params)
    return jnp.transpose(y, (0, 3, 1, 2))        # NHWC -> NCHW


def init_params(key, in_channels, out_channels, mid_channels=None):
    if not mid_channels:
        mid_channels = out_channels
    k1, k2, k3, k4 = jax.random.split(key, 4)
    s1 = 1.0 / jnp.sqrt(9.0 * in_channels)
    s2 = 1.0 / jnp.sqrt(9.0 * mid_channels)
    w1 = jax.random.uniform(k1, (3, 3, in_channels, mid_channels), jnp.float32, -s1, s1)
    b1 = jax.random.uniform(k2, (mid_channels,), jnp.float32, -s1, s1)
    w2 = jax.random.uniform(k3, (3, 3, mid_channels, out_channels), jnp.float32, -s2, s2)
    b2 = jax.random.uniform(k4, (out_channels,), jnp.float32, -s2, s2)
    return (w1, b1, w2, b2)


def _reference_double_conv(x_nchw, params):
    """Pure-JAX reference (lax.conv) for correctness check."""
    w1, b1, w2, b2 = params

    def conv(x, w, b):
        y = jax.lax.conv_general_dilated(
            x, w, window_strides=(1, 1), padding="SAME",
            dimension_numbers=("NCHW", "HWIO", "NCHW"))
        y = y + b[None, :, None, None]
        return jnp.where(y >= 0, y, NEG_SLOPE * y)

    return conv(conv(x_nchw, w1, b1), w2, b2)


if __name__ == "__main__":
    key = jax.random.PRNGKey(0)
    kx, kp = jax.random.split(key)

    B, Cin, H, W = 2, 4, 16, 16
    Cout = 8
    x = jax.random.normal(kx, (B, Cin, H, W), jnp.float32)
    params = init_params(kp, Cin, Cout)

    out = double_conv(x, params)
    out = jax.block_until_ready(out)

    ref = _reference_double_conv(x, params)
    assert out.shape == (B, Cout, H, W)
    assert jnp.allclose(out, ref, atol=1e-3, rtol=1e-3)

    print("KERNEL_OK")
</pallas_src>

<mosaic_0001>
module attributes {stable_mosaic.version = 11 : i64} {
  func.func @_double_conv_kernel(%arg0: i32, %arg1: memref<1x16x16x4xf32, #tpu.memory_space<vmem>>, %arg2: memref<36x8xf32, #tpu.memory_space<vmem>>, %arg3: memref<1x8xf32, #tpu.memory_space<vmem>>, %arg4: memref<72x8xf32, #tpu.memory_space<vmem>>, %arg5: memref<1x8xf32, #tpu.memory_space<vmem>>, %arg6: memref<1x16x16x8xf32, #tpu.memory_space<vmem>>, %arg7: memref<18x18x4xf32, #tpu.memory_space<vmem>>, %arg8: memref<18x18x8xf32, #tpu.memory_space<vmem>>, %arg9: memref<16x16x36xf32, #tpu.memory_space<vmem>>, %arg10: memref<16x16x72xf32, #tpu.memory_space<vmem>>) attributes {dimension_semantics = [#tpu.dimension_semantics<parallel>], iteration_bounds = array<i64: 2>, scalar_prefetch = 0 : i64, scratch_operands = 4 : i64, tpu.core_type = #tpu.core_type<tc>, window_params = [{transform_indices = @transform_0, window_bounds = array<i64: 1, 16, 16, 4>}, {pipeline_mode = #tpu.pipeline_mode<synchronous>, transform_indices = @transform_1, window_bounds = array<i64: 36, 8>}, {pipeline_mode = #tpu.pipeline_mode<synchronous>, transform_indices = @transform_2, window_bounds = array<i64: 1, 8>}, {pipeline_mode = #tpu.pipeline_mode<synchronous>, transform_indices = @transform_3, window_bounds = array<i64: 72, 8>}, {pipeline_mode = #tpu.pipeline_mode<synchronous>, transform_indices = @transform_4, window_bounds = array<i64: 1, 8>}, {transform_indices = @transform_5, window_bounds = array<i64: 1, 16, 16, 8>}]} {
    %cst = arith.constant 0.000000e+00 : f32
    %0 = vector.broadcast %cst : f32 to vector<18x18x4xf32>
    %c0 = arith.constant 0 : index
    %c0_0 = arith.constant 0 : index
    %c0_1 = arith.constant 0 : index
    %1 = vector.load %arg7[%c0, %c0_0, %c0_1] : memref<18x18x4xf32, #tpu.memory_space<vmem>>, vector<18x18x4xf32>
    tpu.vector_store %arg7[%c0, %c0_0, %c0_1], %0 {strides = array<i32>} : memref<18x18x4xf32, #tpu.memory_space<vmem>>, vector<18x18x4xf32>,
    %c0_2 = arith.constant 0 : index
    %c0_3 = arith.constant 0 : index
    %c0_4 = arith.constant 0 : index
    %c0_5 = arith.constant 0 : index
    %2 = vector.load %arg1[%c0_2, %c0_3, %c0_4, %c0_5] : memref<1x16x16x4xf32, #tpu.memory_space<vmem>>, vector<1x16x16x4xf32>
    %3 = vector.shape_cast %2 : vector<1x16x16x4xf32> to vector<16x16x4xf32>
    %c1 = arith.constant 1 : index
    %c1_6 = arith.constant 1 : index
    %c0_7 = arith.constant 0 : index
    %4 = vector.load %arg7[%c1, %c1_6, %c0_7] : memref<18x18x4xf32, #tpu.memory_space<vmem>>, vector<16x16x4xf32>
    tpu.vector_store %arg7[%c1, %c1_6, %c0_7], %3 {strides = array<i32>} : memref<18x18x4xf32, #tpu.memory_space<vmem>>, vector<16x16x4xf32>,
    %c0_8 = arith.constant 0 : index
    %c0_9 = arith.constant 0 : index
    %c0_10 = arith.constant 0 : index
    %5 = vector.load %arg7[%c0_8, %c0_9, %c0_10] : memref<18x18x4xf32, #tpu.memory_space<vmem>>, vector<18x18x4xf32>
    %6 = vector.extract_strided_slice %5 {offsets = [0, 0, 0], sizes = [16, 16, 4], strides = [1, 1, 1]} : vector<18x18x4xf32> to vector<16x16x4xf32>
    %c0_11 = arith.constant 0 : index
    %c0_12 = arith.constant 0 : index
    %c0_13 = arith.constant 0 : index
    %7 = vector.load %arg9[%c0_11, %c0_12, %c0_13] : memref<16x16x36xf32, #tpu.memory_space<vmem>>, vector<16x16x4xf32>
    tpu.vector_store %arg9[%c0_11, %c0_12, %c0_13], %6 {strides = array<i32>} : memref<16x16x36xf32, #tpu.memory_space<vmem>>, vector<16x16x4xf32>,
    %8 = vector.extract_strided_slice %5 {offsets = [0, 1, 0], sizes = [16, 16, 4], strides = [1, 1, 1]} : vector<18x18x4xf32> to vector<16x16x4xf32>
    %c0_14 = arith.constant 0 : index
    %c0_15 = arith.constant 0 : index
    %c4 = arith.constant 4 : index
    %9 = vector.load %arg9[%c0_14, %c0_15, %c4] : memref<16x16x36xf32, #tpu.memory_space<vmem>>, vector<16x16x4xf32>
    tpu.vector_store %arg9[%c0_14, %c0_15, %c4], %8 {strides = array<i32>} : memref<16x16x36xf32, #tpu.memory_space<vmem>>, vector<16x16x4xf32>,
    %10 = vector.extract_strided_slice %5 {offsets = [0, 2, 0], sizes = [16, 16, 4], strides = [1, 1, 1]} : vector<18x18x4xf32> to vector<16x16x4xf32>
    %c0_16 = arith.constant 0 : index
    %c0_17 = arith.constant 0 : index
    %c8 = arith.constant 8 : index
    %11 = vector.load %arg9[%c0_16, %c0_17, %c8] : memref<16x16x36xf32, #tpu.memory_space<vmem>>, vector<16x16x4xf32>
    tpu.vector_store %arg9[%c0_16, %c0_17, %c8], %10 {strides = array<i32>} : memref<16x16x36xf32, #tpu.memory_space<vmem>>, vector<16x16x4xf32>,
    %12 = vector.extract_strided_slice %5 {offsets = [1, 0, 0], sizes = [16, 16, 4], strides = [1, 1, 1]} : vector<18x18x4xf32> to vector<16x16x4xf32>
    %c0_18 = arith.constant 0 : index
    %c0_19 = arith.constant 0 : index
    %c12 = arith.constant 12 : index
    %13 = vector.load %arg9[%c0_18, %c0_19, %c12] : memref<16x16x36xf32, #tpu.memory_space<vmem>>, vector<16x16x4xf32>
    tpu.vector_store %arg9[%c0_18, %c0_19, %c12], %12 {strides = array<i32>} : memref<16x16x36xf32, #tpu.memory_space<vmem>>, vector<16x16x4xf32>,
    %14 = vector.extract_strided_slice %5 {offsets = [1, 1, 0], sizes = [16, 16, 4], strides = [1, 1, 1]} : vector<18x18x4xf32> to vector<16x16x4xf32>
    %c0_20 = arith.constant 0 : index
    %c0_21 = arith.constant 0 : index
    %c16 = arith.constant 16 : index
    %15 = vector.load %arg9[%c0_20, %c0_21, %c16] : memref<16x16x36xf32, #tpu.memory_space<vmem>>, vector<16x16x4xf32>
    tpu.vector_store %arg9[%c0_20, %c0_21, %c16], %14 {strides = array<i32>} : memref<16x16x36xf32, #tpu.memory_space<vmem>>, vector<16x16x4xf32>,
    %16 = vector.extract_strided_slice %5 {offsets = [1, 2, 0], sizes = [16, 16, 4], strides = [1, 1, 1]} : vector<18x18x4xf32> to vector<16x16x4xf32>
    %c0_22 = arith.constant 0 : index
    %c0_23 = arith.constant 0 : index
    %c20 = arith.constant 20 : index
    %17 = vector.load %arg9[%c0_22, %c0_23, %c20] : memref<16x16x36xf32, #tpu.memory_space<vmem>>, vector<16x16x4xf32>
    tpu.vector_store %arg9[%c0_22, %c0_23, %c20], %16 {strides = array<i32>} : memref<16x16x36xf32, #tpu.memory_space<vmem>>, vector<16x16x4xf32>,
    %18 = vector.extract_strided_slice %5 {offsets = [2, 0, 0], sizes = [16, 16, 4], strides = [1, 1, 1]} : vector<18x18x4xf32> to vector<16x16x4xf32>
    %c0_24 = arith.constant 0 : index
    %c0_25 = arith.constant 0 : index
    %c24 = arith.constant 24 : index
    %19 = vector.load %arg9[%c0_24, %c0_25, %c24] : memref<16x16x36xf32, #tpu.memory_space<vmem>>, vector<16x16x4xf32>
    tpu.vector_store %arg9[%c0_24, %c0_25, %c24], %18 {strides = array<i32>} : memref<16x16x36xf32, #tpu.memory_space<vmem>>, vector<16x16x4xf32>,
    %20 = vector.extract_strided_slice %5 {offsets = [2, 1, 0], sizes = [16, 16, 4], strides = [1, 1, 1]} : vector<18x18x4xf32> to vector<16x16x4xf32>
    %c0_26 = arith.constant 0 : index
    %c0_27 = arith.constant 0 : index
    %c28 = arith.constant 28 : index
    %21 = vector.load %arg9[%c0_26, %c0_27, %c28] : memref<16x16x36xf32, #tpu.memory_space<vmem>>, vector<16x16x4xf32>
    tpu.vector_store %arg9[%c0_26, %c0_27, %c28], %20 {strides = array<i32>} : memref<16x16x36xf32, #tpu.memory_space<vmem>>, vector<16x16x4xf32>,
    %22 = vector.extract_strided_slice %5 {offsets = [2, 2, 0], sizes = [16, 16, 4], strides = [1, 1, 1]} : vector<18x18x4xf32> to vector<16x16x4xf32>
    %c0_28 = arith.constant 0 : index
    %c0_29 = arith.constant 0 : index
    %c32 = arith.constant 32 : index
    %23 = vector.load %arg9[%c0_28, %c0_29, %c32] : memref<16x16x36xf32, #tpu.memory_space<vmem>>, vector<16x16x4xf32>
    tpu.vector_store %arg9[%c0_28, %c0_29, %c32], %22 {strides = array<i32>} : memref<16x16x36xf32, #tpu.memory_space<vmem>>, vector<16x16x4xf32>,
    %c0_30 = arith.constant 0 : index
    %c0_31 = arith.constant 0 : index
    %c0_32 = arith.constant 0 : index
    %24 = vector.load %arg9[%c0_30, %c0_31, %c0_32] : memref<16x16x36xf32, #tpu.memory_space<vmem>>, vector<16x16x36xf32>
    %c0_33 = arith.constant 0 : index
    %c0_34 = arith.constant 0 : index
    %25 = vector.load %arg2[%c0_33, %c0_34] : memref<36x8xf32, #tpu.memory_space<vmem>>, vector<36x8xf32>
    %cst_35 = arith.constant dense<0.000000e+00> : vector<16x16x8xf32>
    %26 = tpu.matmul %24, %25, %cst_35 {dimension_numbers = #tpu.dot_dimension_numbers<[2], [0], [0, 1], [1], [0, 0, 0, 1, 1, 1], [], []>} : vector<16x16x36xf32>, vector<36x8xf32>, vector<16x16x8xf32> -> vector<16x16x8xf32>
    %c0_36 = arith.constant 0 : index
    %c0_37 = arith.constant 0 : index
    %27 = vector.load %arg3[%c0_36, %c0_37] : memref<1x8xf32, #tpu.memory_space<vmem>>, vector<1x8xf32>
    %28 = vector.shape_cast %27 : vector<1x8xf32> to vector<1x1x8xf32>
    %29 = vector.broadcast %28 : vector<1x1x8xf32> to vector<16x16x8xf32>
    %30 = arith.addf %26, %29 : vector<16x16x8xf32>
    %cst_38 = arith.constant 0.000000e+00 : f32
    %31 = vector.broadcast %cst_38 : f32 to vector<16x16x8xf32>
    %32 = arith.cmpf oge, %30, %31 : vector<16x16x8xf32>
    %cst_39 = arith.constant 0.00999999977 : f32
    %33 = vector.broadcast %cst_39 : f32 to vector<16x16x8xf32>
    %34 = arith.mulf %33, %30 : vector<16x16x8xf32>
    %35 = arith.select %32, %30, %34 : vector<16x16x8xi1>, vector<16x16x8xf32>
    %cst_40 = arith.constant 0.000000e+00 : f32
    %36 = vector.broadcast %cst_40 : f32 to vector<18x18x8xf32>
    %c0_41 = arith.constant 0 : index
    %c0_42 = arith.constant 0 : index
    %c0_43 = arith.constant 0 : index
    %37 = vector.load %arg8[%c0_41, %c0_42, %c0_43] : memref<18x18x8xf32, #tpu.memory_space<vmem>>, vector<18x18x8xf32>
    tpu.vector_store %arg8[%c0_41, %c0_42, %c0_43], %36 {strides = array<i32>} : memref<18x18x8xf32, #tpu.memory_space<vmem>>, vector<18x18x8xf32>,
    %c1_44 = arith.constant 1 : index
    %c1_45 = arith.constant 1 : index
    %c0_46 = arith.constant 0 : index
    %38 = vector.load %arg8[%c1_44, %c1_45, %c0_46] : memref<18x18x8xf32, #tpu.memory_space<vmem>>, vector<16x16x8xf32>
    tpu.vector_store %arg8[%c1_44, %c1_45, %c0_46], %35 {strides = array<i32>} : memref<18x18x8xf32, #tpu.memory_space<vmem>>, vector<16x16x8xf32>,
    %c0_47 = arith.constant 0 : index
    %c0_48 = arith.constant 0 : index
    %c0_49 = arith.constant 0 : index
    %39 = vector.load %arg8[%c0_47, %c0_48, %c0_49] : memref<18x18x8xf32, #tpu.memory_space<vmem>>, vector<18x18x8xf32>
    %40 = vector.extract_strided_slice %39 {offsets = [0, 0, 0], sizes = [16, 16, 8], strides = [1, 1, 1]} : vector<18x18x8xf32> to vector<16x16x8xf32>
    %c0_50 = arith.constant 0 : index
    %c0_51 = arith.constant 0 : index
    %c0_52 = arith.constant 0 : index
    %41 = vector.load %arg10[%c0_50, %c0_51, %c0_52] : memref<16x16x72xf32, #tpu.memory_space<vmem>>, vector<16x16x8xf32>
    tpu.vector_store %arg10[%c0_50, %c0_51, %c0_52], %40 {strides = array<i32>} : memref<16x16x72xf32, #tpu.memory_space<vmem>>, vector<16x16x8xf32>,
    %42 = vector.extract_strided_slice %39 {offsets = [0, 1, 0], sizes = [16, 16, 8], strides = [1, 1, 1]} : vector<18x18x8xf32> to vector<16x16x8xf32>
    %c0_53 = arith.constant 0 : index
    %c0_54 = arith.constant 0 : index
    %c8_55 = arith.constant 8 : index
    %43 = vector.load %arg10[%c0_53, %c0_54, %c8_55] : memref<16x16x72xf32, #tpu.memory_space<vmem>>, vector<16x16x8xf32>
    tpu.vector_store %arg10[%c0_53, %c0_54, %c8_55], %42 {strides = array<i32>} : memref<16x16x72xf32, #tpu.memory_space<vmem>>, vector<16x16x8xf32>,
    %44 = vector.extract_strided_slice %39 {offsets = [0, 2, 0], sizes = [16, 16, 8], strides = [1, 1, 1]} : vector<18x18x8xf32> to vector<16x16x8xf32>
    %c0_56 = arith.constant 0 : index
    %c0_57 = arith.constant 0 : index
    %c16_58 = arith.constant 16 : index
    %45 = vector.load %arg10[%c0_56, %c0_57, %c16_58] : memref<16x16x72xf32, #tpu.memory_space<vmem>>, vector<16x16x8xf32>
    tpu.vector_store %arg10[%c0_56, %c0_57, %c16_58], %44 {strides = array<i32>} : memref<16x16x72xf32, #tpu.memory_space<vmem>>, vector<16x16x8xf32>,
    %46 = vector.extract_strided_slice %39 {offsets = [1, 0, 0], sizes = [16, 16, 8], strides = [1, 1, 1]} : vector<18x18x8xf32> to vector<16x16x8xf32>
    %c0_59 = arith.constant 0 : index
    %c0_60 = arith.constant 0 : index
    %c24_61 = arith.constant 24 : index
    %47 = vector.load %arg10[%c0_59, %c0_60, %c24_61] : memref<16x16x72xf32, #tpu.memory_space<vmem>>, vector<16x16x8xf32>
    tpu.vector_store %arg10[%c0_59, %c0_60, %c24_61], %46 {strides = array<i32>} : memref<16x16x72xf32, #tpu.memory_space<vmem>>, vector<16x16x8xf32>,
    %48 = vector.extract_strided_slice %39 {offsets = [1, 1, 0], sizes = [16, 16, 8], strides = [1, 1, 1]} : vector<18x18x8xf32> to vector<16x16x8xf32>
    %c0_62 = arith.constant 0 : index
    %c0_63 = arith.constant 0 : index
    %c32_64 = arith.constant 32 : index
    %49 = vector.load %arg10[%c0_62, %c0_63, %c32_64] : memref<16x16x72xf32, #tpu.memory_space<vmem>>, vector<16x16x8xf32>
    tpu.vector_store %arg10[%c0_62, %c0_63, %c32_64], %48 {strides = array<i32>} : memref<16x16x72xf32, #tpu.memory_space<vmem>>, vector<16x16x8xf32>,
    %50 = vector.extract_strided_slice %39 {offsets = [1, 2, 0], sizes = [16, 16, 8], strides = [1, 1, 1]} : vector<18x18x8xf32> to vector<16x16x8xf32>
    %c0_65 = arith.constant 0 : index
    %c0_66 = arith.constant 0 : index
    %c40 = arith.constant 40 : index
    %51 = vector.load %arg10[%c0_65, %c0_66, %c40] : memref<16x16x72xf32, #tpu.memory_space<vmem>>, vector<16x16x8xf32>
    tpu.vector_store %arg10[%c0_65, %c0_66, %c40], %50 {strides = array<i32>} : memref<16x16x72xf32, #tpu.memory_space<vmem>>, vector<16x16x8xf32>,
    %52 = vector.extract_strided_slice %39 {offsets = [2, 0, 0], sizes = [16, 16, 8], strides = [1, 1, 1]} : vector<18x18x8xf32> to vector<16x16x8xf32>
    %c0_67 = arith.constant 0 : index
    %c0_68 = arith.constant 0 : index
    %c48 = arith.constant 48 : index
    %53 = vector.load %arg10[%c0_67, %c0_68, %c48] : memref<16x16x72xf32, #tpu.memory_space<vmem>>, vector<16x16x8xf32>
    tpu.vector_store %arg10[%c0_67, %c0_68, %c48], %52 {strides = array<i32>} : memref<16x16x72xf32, #tpu.memory_space<vmem>>, vector<16x16x8xf32>,
    %54 = vector.extract_strided_slice %39 {offsets = [2, 1, 0], sizes = [16, 16, 8], strides = [1, 1, 1]} : vector<18x18x8xf32> to vector<16x16x8xf32>
    %c0_69 = arith.constant 0 : index
    %c0_70 = arith.constant 0 : index
    %c56 = arith.constant 56 : index
    %55 = vector.load %arg10[%c0_69, %c0_70, %c56] : memref<16x16x72xf32, #tpu.memory_space<vmem>>, vector<16x16x8xf32>
    tpu.vector_store %arg10[%c0_69, %c0_70, %c56], %54 {strides = array<i32>} : memref<16x16x72xf32, #tpu.memory_space<vmem>>, vector<16x16x8xf32>,
    %56 = vector.extract_strided_slice %39 {offsets = [2, 2, 0], sizes = [16, 16, 8], strides = [1, 1, 1]} : vector<18x18x8xf32> to vector<16x16x8xf32>
    %c0_71 = arith.constant 0 : index
    %c0_72 = arith.constant 0 : index
    %c64 = arith.constant 64 : index
    %57 = vector.load %arg10[%c0_71, %c0_72, %c64] : memref<16x16x72xf32, #tpu.memory_space<vmem>>, vector<16x16x8xf32>
    tpu.vector_store %arg10[%c0_71, %c0_72, %c64], %56 {strides = array<i32>} : memref<16x16x72xf32, #tpu.memory_space<vmem>>, vector<16x16x8xf32>,
    %c0_73 = arith.constant 0 : index
    %c0_74 = arith.constant 0 : index
    %c0_75 = arith.constant 0 : index
    %58 = vector.load %arg10[%c0_73, %c0_74, %c0_75] : memref<16x16x72xf32, #tpu.memory_space<vmem>>, vector<16x16x72xf32>
    %c0_76 = arith.constant 0 : index
    %c0_77 = arith.constant 0 : index
    %59 = vector.load %arg4[%c0_76, %c0_77] : memref<72x8xf32, #tpu.memory_space<vmem>>, vector<72x8xf32>
    %cst_78 = arith.constant dense<0.000000e+00> : vector<16x16x8xf32>
    %60 = tpu.matmul %58, %59, %cst_78 {dimension_numbers = #tpu.dot_dimension_numbers<[2], [0], [0, 1], [1], [0, 0, 0, 1, 1, 1], [], []>} : vector<16x16x72xf32>, vector<72x8xf32>, vector<16x16x8xf32> -> vector<16x16x8xf32>
    %c0_79 = arith.constant 0 : index
    %c0_80 = arith.constant 0 : index
    %61 = vector.load %arg5[%c0_79, %c0_80] : memref<1x8xf32, #tpu.memory_space<vmem>>, vector<1x8xf32>
    %62 = vector.shape_cast %61 : vector<1x8xf32> to vector<1x1x8xf32>
    %63 = vector.broadcast %62 : vector<1x1x8xf32> to vector<16x16x8xf32>
    %64 = arith.addf %60, %63 : vector<16x16x8xf32>
    %cst_81 = arith.constant 0.000000e+00 : f32
    %65 = vector.broadcast %cst_81 : f32 to vector<16x16x8xf32>
    %66 = arith.cmpf oge, %64, %65 : vector<16x16x8xf32>
    %cst_82 = arith.constant 0.00999999977 : f32
    %67 = vector.broadcast %cst_82 : f32 to vector<16x16x8xf32>
    %68 = arith.mulf %67, %64 : vector<16x16x8xf32>
    %69 = arith.select %66, %64, %68 : vector<16x16x8xi1>, vector<16x16x8xf32>
    %c0_83 = arith.constant 0 : index
    %c0_84 = arith.constant 0 : index
    %c0_85 = arith.constant 0 : index
    %c0_86 = arith.constant 0 : index
    %70 = vector.load %arg6[%c0_83, %c0_84, %c0_85, %c0_86] : memref<1x16x16x8xf32, #tpu.memory_space<vmem>>, vector<1x16x16x8xf32>
    %71 = vector.shape_cast %70 : vector<1x16x16x8xf32> to vector<16x16x8xf32>
    %72 = vector.shape_cast %69 : vector<16x16x8xf32> to vector<1x16x16x8xf32>
    tpu.vector_store %arg6[%c0_83, %c0_84, %c0_85, %c0_86], %72 {strides = array<i32>} : memref<1x16x16x8xf32, #tpu.memory_space<vmem>>, vector<1x16x16x8xf32>,
    return
  }
  func.func @transform_0(%arg0: i32) -> (i32, i32, i32, i32) {
    %c0_i32 = arith.constant 0 : i32
    %c0_i32_0 = arith.constant 0 : i32
    %c0_i32_1 = arith.constant 0 : i32
    %c0_i32_2 = arith.constant 0 : i32
    return %arg0, %c0_i32, %c0_i32_0, %c0_i32_1 : i32, i32, i32, i32
  }
  func.func @transform_1(%arg0: i32) -> (i32, i32) {
    %c0_i32 = arith.constant 0 : i32
    %c0_i32_0 = arith.constant 0 : i32
    %c0_i32_1 = arith.constant 0 : i32
    return %c0_i32, %c0_i32_0 : i32, i32
  }
  func.func @transform_2(%arg0: i32) -> (i32, i32) {
    %c0_i32 = arith.constant 0 : i32
    %c0_i32_0 = arith.constant 0 : i32
    %c0_i32_1 = arith.constant 0 : i32
    return %c0_i32, %c0_i32_0 : i32, i32
  }
  func.func @transform_3(%arg0: i32) -> (i32, i32) {
    %c0_i32 = arith.constant 0 : i32
    %c0_i32_0 = arith.constant 0 : i32
    %c0_i32_1 = arith.constant 0 : i32
    return %c0_i32, %c0_i32_0 : i32, i32
  }
  func.func @transform_4(%arg0: i32) -> (i32, i32) {
    %c0_i32 = arith.constant 0 : i32
    %c0_i32_0 = arith.constant 0 : i32
    %c0_i32_1 = arith.constant 0 : i32
    return %c0_i32, %c0_i32_0 : i32, i32
  }
  func.func @transform_5(%arg0: i32) -> (i32, i32, i32, i32) {
    %c0_i32 = arith.constant 0 : i32
    %c0_i32_0 = arith.constant 0 : i32
    %c0_i32_1 = arith.constant 0 : i32
    %c0_i32_2 = arith.constant 0 : i32
    return %arg0, %c0_i32, %c0_i32_0, %c0_i32_1 : i32, i32, i32, i32
  }
}

</mosaic_0001>

<bundles_post_ra>
// kernel: tpu_custom_call.1
= control target key start
LH: loop header
LB: loop body
LE: loop exit
PB: predicated region body
PF: predicated region fallthrough
CT: control target
= control target key end

     0   :  { %s5015_s18 = smov 0   ;;  %s8024_s0 = inlined_call_operand.vmem [shape: f32[2,16,16,4], index: 0, kind: input, shape index: {}]   ;;  %s8025_s1 = inlined_call_operand.vmem [shape: f32[36,8], index: 1, kind: input, shape index: {}]   ;;  %s8026_s2 = inlined_call_operand.vmem [shape: f32[1,8], index: 2, kind: input, shape index: {}]   ;;  %s8027_s3 = inlined_call_operand.vmem [shape: f32[72,8], index: 3, kind: input, shape index: {}]   ;;  %s8028_s4 = inlined_call_operand.vmem [shape: f32[1,8], index: 4, kind: input, shape index: {}]   ;;  %s8029_s5 = inlined_call_operand.vmem [shape: f32[2,16,16,8], index: 5, kind: output, shape index: {}]  }
   0x1 LB: > { %s4590_s19 = sadd.s32 4294967295, %s4970_s18   ;;  %p4594_p0 = scmp.ge.s32.totalorder %s4970_s18, 1  ;;  %s4970_s18 = sphi %s5015_s18, %s15_s18  }
   0x2   : > { %p187_p1 = scmp.lt.s32.totalorder %s4970_s18, 3 }
   0x4   : > { %p188_p2 = pnand %p4594_p0, %p187_p1 }
   0x5   : > { %vm225_vm0 = vcmask (!%p188_p2), 31744   ;;  %vm228_vm1 = vcmask (!%p188_p2), 25600   ;;  %p5025_p3 = scmp.lt.s32.totalorder (!%p188_p2), %s4590_s19, 1  ;;  %v4972_v0 = vmov (!%p188_p2), 0.0   ;;  %s4973_s25 = smov (!%p188_p2), 4   ;;  %vm624_vm2 = vcmask (!%p188_p2), 64545  }
   0x6   : > { %191 = sbr.rel (%p188_p2) target bundleno = 2033 (0x7f1), region = 40  ;;  %226 = vst.msk [vmem:[#allocation2] sm:$0xff] (!%p188_p2), %vm225_vm0, %v4972_v0  ;;  %227 = vst.msk [vmem:[#allocation2 + $0x8] sm:$0xff] (!%p188_p2), %vm225_vm0, %v4972_v0  ;;  %s4974_s26 = smov (!%p188_p2), 8   ;;  %vm628_vm3 = vcmask (!%p188_p2), 57376   ;;  %vm626_vm4 = vcmask (!%p188_p2), 64544  }
   0x7   : > { %230 = vst.msk [vmem:[#allocation2 + $0x18] sm:$0xff] (!%p188_p2), %vm225_vm0, %v4972_v0  ;;  %231 = vst.msk [vmem:[#allocation2 + $0x20] sm:$0xff] (!%p188_p2), %vm225_vm0, %v4972_v0  ;;  %s4975_s27 = smov (!%p188_p2), 12   ;;  %vm819_vm5 = vcmask (!%p188_p2), 97346   ;;  %vm821_vm6 = vcmask (!%p188_p2), 97344   ;;  %vm823_vm7 = vcmask (!%p188_p2), 91200  }
   0x8   : > { %233 = vst.msk [vmem:[#allocation2 + $0x30] sm:$0xff] (!%p188_p2), %vm225_vm0, %v4972_v0  ;;  %234 = vst.msk [vmem:[#allocation2 + $0x38] sm:$0xff] (!%p188_p2), %vm225_vm0, %v4972_v0  ;;  %s4976_s28 = smov (!%p188_p2), 16   ;;  %vm968_vm8 = vcmask (!%p188_p2), 130144   ;;  %s4977_s29 = smov (!%p188_p2), 20   ;;  %vm1146_vm9 = vcmask (!%p188_p2), 162945  }
   0x9   : > { %236 = vst.msk [vmem:[#allocation2 + $0x48] sm:$0xff] (!%p188_p2), %vm225_vm0, %v4972_v0  ;;  %237 = vst.msk [vmem:[#allocation2 + $0x50] sm:$0xff] (!%p188_p2), %vm225_vm0, %v4972_v0  ;;  %vm1148_vm10 = vcmask (!%p188_p2), 162944   ;;  %vm1150_vm11 = vcmask (!%p188_p2), 155776   ;;  %s4978_s30 = smov (!%p188_p2), 24   ;;  %vm1341_vm12 = vcmask (!%p188_p2), 195746  }
   0xa   : > { %239 = vst.msk [vmem:[#allocation2 + $0x60] sm:$0xff] (!%p188_p2), %vm225_vm0, %v4972_v0  ;;  %240 = vst.msk [vmem:[#allocation2 + $0x68] sm:$0xff] (!%p188_p2), %vm225_vm0, %v4972_v0  ;;  %vm1343_vm13 = vcmask (!%p188_p2), 195744   ;;  %vm1345_vm14 = vcmask (!%p188_p2), 189600   ;;  %s4979_s6 = smov (!%p188_p2), 28   ;;  %vm1490_vm15 = vcmask (!%p188_p2), 228544  }
   0xb   : > { %242 = vst.msk [vmem:[#allocation2 + $0x78] sm:$0xff] (!%p188_p2), %vm225_vm0, %v4972_v0  ;;  %243 = vst.msk [vmem:[#allocation2 + $0x80] sm:$0xff] (!%p188_p2), %vm225_vm0, %v4972_v0  ;;  %s4980_s17 = smov (!%p188_p2), 32   ;;  %s4981_s23 = smov (!%p188_p2), 40  }
   0xc   : > { %245 = vst.msk [vmem:[#allocation2 + $0x90] sm:$0xff] (!%p188_p2), %vm225_vm0, %v4972_v0  ;;  %246 = vst.msk [vmem:[#allocation2 + $0x98] sm:$0xff] (!%p188_p2), %vm225_vm0, %v4972_v0  ;;  %s4982_s7 = smov (!%p188_p2), 48   ;;  %s4983_s12 = smov (!%p188_p2), 56  }
   0xd   : > { %248 = vst.msk [vmem:[#allocation2 + $0xa8] sm:$0xff] %vm225_vm0, %v4972_v0  ;;  %249 = vst.msk [vmem:[#allocation2 + $0xb0] sm:$0xff] %vm225_vm0, %v4972_v0  ;;  %s8032_s19 = smov (!%p5025_p3, %s4590_s19), 1  ;;  %v5160_v7 = vld [vmem:[#allocation2] sm:$0xff]  ;;  %v5164_v9 = vld [vmem:[#allocation2 + $0x8] sm:$0xff] }
   0xe   : > { %251 = vst.msk [vmem:[#allocation2 + $0xc0] sm:$0xff] %vm225_vm0, %v4972_v0  ;;  %252 = vst.msk [vmem:[#allocation2 + $0xc8] sm:$0xff] %vm225_vm0, %v4972_v0  ;;  %s4668_s21 = sshll.u32 %s8032_s19, 8  ;;  %480 = vrot.lane.b32.xlu0 %v5160_v7, %s4973_s25 }
   0xf   : > { %254 = vst.msk [vmem:[#allocation2 + $0xd8] sm:$0xff] %vm225_vm0, %v4972_v0  ;;  %255 = vst.msk [vmem:[#allocation2 + $0xe0] sm:$0xff] %vm225_vm0, %v4972_v0  ;;  %s5149_s24 = scalar_lea.vmem %s8024_s0, %s4668_s21 }
  0x10   : > { %257 = vst.msk [vmem:[#allocation2 + $0xf0] sm:$0xff] %vm225_vm0, %v4972_v0  ;;  %258 = vst.msk [vmem:[#allocation2 + $0xf8] sm:$0xff] %vm225_vm0, %v4972_v0  ;;  %v281_v1 = vld [vmem:[%s5149_s24] sm:$0xff]  ;;  %v282_v2 = vld [vmem:[%s5149_s24 + $0x8] sm:$0xff] }
  0x11   : > { %260 = vst.msk [vmem:[#allocation2 + $0x108] sm:$0xff] %vm225_vm0, %v4972_v0  ;;  %261 = vst.msk [vmem:[#allocation2 + $0x110] sm:$0xff] %vm225_vm0, %v4972_v0  ;;  %v283_v3 = vld [vmem:[%s5149_s24 + $0x10] sm:$0xff]  ;;  %v284_v4 = vld [vmem:[%s5149_s24 + $0x18] sm:$0xff] }
  0x12   : > { %263 = vst.msk [vmem:[#allocation2 + $0x120] sm:$0xff] %vm225_vm0, %v4972_v0  ;;  %264 = vst.msk [vmem:[#allocation2 + $0x128] sm:$0xff] %vm225_vm0, %v4972_v0  ;;  %v285_v5 = vld [vmem:[%s5149_s24 + $0x20] sm:$0xff]  ;;  %v286_v6 = vld [vmem:[%s5149_s24 + $0x28] sm:$0xff]  ;;  %482 = vrot.lane.b32.xlu0 %v5164_v9, %s4973_s25 }
  0x13   : > { %266 = vst.msk [vmem:[#allocation2 + $0x138] sm:$0xff] %vm225_vm0, %v4972_v0  ;;  %267 = vst.msk [vmem:[#allocation2 + $0x140] sm:$0xff] %vm225_vm0, %v4972_v0  ;;  %v287_v10 = vld [vmem:[%s5149_s24 + $0x30] sm:$0xff]  ;;  %v288_v11 = vld [vmem:[%s5149_s24 + $0x38] sm:$0xff] }
  0x14   : > { %269 = vst.msk [vmem:[#allocation2 + $0x150] sm:$0xff] %vm225_vm0, %v4972_v0  ;;  %270 = vst.msk [vmem:[#allocation2 + $0x158] sm:$0xff] %vm225_vm0, %v4972_v0  ;;  %v289_v12 = vld [vmem:[%s5149_s24 + $0x40] sm:$0xff]  ;;  %v290_v13 = vld [vmem:[%s5149_s24 + $0x48] sm:$0xff] }
  0x15   : > { %272 = vst.msk [vmem:[#allocation2 + $0x168] sm:$0xff] %vm225_vm0, %v4972_v0  ;;  %273 = vst.msk [vmem:[#allocation2 + $0x170] sm:$0xff] %vm225_vm0, %v4972_v0  ;;  %v291_v14 = vld [vmem:[%s5149_s24 + $0x50] sm:$0xff]  ;;  %v292_v15 = vld [vmem:[%s5149_s24 + $0x58] sm:$0xff] }
  0x16   : > { %275 = vst.msk [vmem:[#allocation2 + $0x180] sm:$0xff] %vm225_vm0, %v4972_v0  ;;  %276 = vst.msk [vmem:[#allocation2 + $0x188] sm:$0xff] %vm225_vm0, %v4972_v0  ;;  %v293_v16 = vld [vmem:[%s5149_s24 + $0x60] sm:$0xff]  ;;  %v294_v17 = vld [vmem:[%s5149_s24 + $0x68] sm:$0xff] }
  0x17   : > { %278 = vst.msk [vmem:[#allocation2 + $0x198] sm:$0xff] %vm225_vm0, %v4972_v0  ;;  %279 = vst.msk [vmem:[#allocation2 + $0x1a0] sm:$0xff] %vm225_vm0, %v4972_v0  ;;  %v295_v18 = vld [vmem:[%s5149_s24 + $0x70] sm:$0xff]  ;;  %v296_v19 = vld [vmem:[%s5149_s24 + $0x78] sm:$0xff] }
  0x18   : > { %229 = vst.msk [vmem:[#allocation2 + $0x10] sm:$0x3] %vm228_vm1, %v4972_v0  ;;  %232 = vst.msk [vmem:[#allocation2 + $0x28] sm:$0x3] %vm228_vm1, %v4972_v0  ;;  %v297_v20 = vld [vmem:[%s5149_s24 + $0x80] sm:$0xff]  ;;  %v298_v21 = vld [vmem:[%s5149_s24 + $0x88] sm:$0xff] }
  0x19   : > { %235 = vst.msk [vmem:[#allocation2 + $0x40] sm:$0x3] %vm228_vm1, %v4972_v0  ;;  %238 = vst.msk [vmem:[#allocation2 + $0x58] sm:$0x3] %vm228_vm1, %v4972_v0  ;;  %v299_v22 = vld [vmem:[%s5149_s24 + $0x90] sm:$0xff]  ;;  %v300_v23 = vld [vmem:[%s5149_s24 + $0x98] sm:$0xff] }
  0x1a   : > { %241 = vst.msk [vmem:[#allocation2 + $0x70] sm:$0x3] %vm228_vm1, %v4972_v0  ;;  %244 = vst.msk [vmem:[#allocation2 + $0x88] sm:$0x3] %vm228_vm1, %v4972_v0  ;;  %v301_v46 = vld [vmem:[%s5149_s24 + $0xa0] sm:$0xff]  ;;  %v302_v47 = vld [vmem:[%s5149_s24 + $0xa8] sm:$0xff] }
  0x1b   : > { %247 = vst.msk [vmem:[#allocation2 + $0xa0] sm:$0x3] %vm228_vm1, %v4972_v0  ;;  %250 = vst.msk [vmem:[#allocation2 + $0xb8] sm:$0x3] %vm228_vm1, %v4972_v0  ;;  %v303_v48 = vld [vmem:[%s5149_s24 + $0xb0] sm:$0xff]  ;;  %v304_v49 = vld [vmem:[%s5149_s24 + $0xb8] sm:$0xff] }
  0x1c   : > { %253 = vst.msk [vmem:[#allocation2 + $0xd0] sm:$0x3] %vm228_vm1, %v4972_v0  ;;  %256 = vst.msk [vmem:[#allocation2 + $0xe8] sm:$0x3] %vm228_vm1, %v4972_v0  ;;  %v305_v50 = vld [vmem:[%s5149_s24 + $0xc0] sm:$0xff]  ;;  %v306_v51 = vld [vmem:[%s5149_s24 + $0xc8] sm:$0xff] }
  0x1d   : > { %259 = vst.msk [vmem:[#allocation2 + $0x100] sm:$0x3] %vm228_vm1, %v4972_v0  ;;  %262 = vst.msk [vmem:[#allocation2 + $0x118] sm:$0x3] %vm228_vm1, %v4972_v0  ;;  %v307_v52 = vld [vmem:[%s5149_s24 + $0xd0] sm:$0xff]  ;;  %v308_v53 = vld [vmem:[%s5149_s24 + $0xd8] sm:$0xff] }
  0x1e   : > { %265 = vst.msk [vmem:[#allocation2 + $0x130] sm:$0x3] %vm228_vm1, %v4972_v0  ;;  %268 = vst.msk [vmem:[#allocation2 + $0x148] sm:$0x3] %vm228_vm1, %v4972_v0  ;;  %v309_v54 = vld [vmem:[%s5149_s24 + $0xe0] sm:$0xff]  ;;  %v310_v55 = vld [vmem:[%s5149_s24 + $0xe8] sm:$0xff] }
  0x1f   : > { %271 = vst.msk [vmem:[#allocation2 + $0x160] sm:$0x3] %vm228_vm1, %v4972_v0  ;;  %274 = vst.msk [vmem:[#allocation2 + $0x178] sm:$0x3] %vm228_vm1, %v4972_v0  ;;  %v5162_v8 = vld [vmem:[#allocation2 + $0x10] sm:$0x3] }
  0x20   : > { %277 = vst.msk [vmem:[#allocation2 + $0x190] sm:$0x3] %vm228_vm1, %v4972_v0  ;;  %280 = vst.msk [vmem:[#allocation2 + $0x1a8] sm:$0x3] %vm228_vm1, %v4972_v0  ;;  %484 = vrot.lane.b32.xlu1 %v5162_v8, %s4973_s25  ;;  %vm1668_vm1 = vcmask 261345  }
  0x21   : > { %314 = vst.msk [vmem:[#allocation2 + $0x19] sm:$0xff] %vm225_vm0, %v281_v1  ;;  %315 = vst.msk [vmem:[#allocation2 + $0x21] sm:$0xff] %vm225_vm0, %v282_v2 }
  0x22   : > { %316 = vst.msk [vmem:[#allocation2 + $0x31] sm:$0xff] %vm225_vm0, %v283_v3  ;;  %317 = vst.msk [vmem:[#allocation2 + $0x39] sm:$0xff] %vm225_vm0, %v284_v4 }
  0x23   : > { %318 = vst.msk [vmem:[#allocation2 + $0x49] sm:$0xff] %vm225_vm0, %v285_v5  ;;  %319 = vst.msk [vmem:[#allocation2 + $0x51] sm:$0xff] %vm225_vm0, %v286_v6 }
  0x24   : > { %400 = vst.msk [vmem:[#allocation4] sm:$0xff] %vm225_vm0, %v5160_v7  ;;  %401 = vst.msk [vmem:[#allocation4 + $0x8] sm:$0xff] %vm225_vm0, %v5164_v9 }
  0x25   : > { %320 = vst.msk [vmem:[#allocation2 + $0x61] sm:$0xff] %vm225_vm0, %v287_v10  ;;  %321 = vst.msk [vmem:[#allocation2 + $0x69] sm:$0xff] %vm225_vm0, %v288_v11 }
  0x26   : > { %322 = vst.msk [vmem:[#allocation2 + $0x79] sm:$0xff] %vm225_vm0, %v289_v12  ;;  %323 = vst.msk [vmem:[#allocation2 + $0x81] sm:$0xff] %vm225_vm0, %v290_v13 }
  0x27   : > { %324 = vst.msk [vmem:[#allocation2 + $0x91] sm:$0xff] %vm225_vm0, %v291_v14  ;;  %325 = vst.msk [vmem:[#allocation2 + $0x99] sm:$0xff] %vm225_vm0, %v292_v15 }
  0x28   : > { %326 = vst.msk [vmem:[#allocation2 + $0xa9] sm:$0xff] %vm225_vm0, %v293_v16  ;;  %327 = vst.msk [vmem:[#allocation2 + $0xb1] sm:$0xff] %vm225_vm0, %v294_v17  ;;  %v5204_v24 = vld [vmem:[#allocation2 + $0x18] sm:$0xff]  ;;  %v5206_v25 = vld [vmem:[#allocation2 + $0x20] sm:$0xff] }
  0x29   : > { %328 = vst.msk [vmem:[#allocation2 + $0xc1] sm:$0xff] %vm225_vm0, %v295_v18  ;;  %329 = vst.msk [vmem:[#allocation2 + $0xc9] sm:$0xff] %vm225_vm0, %v296_v19  ;;  %486 = vrot.lane.b32.xlu1 %v5204_v24, %s4973_s25  ;;  %v5217_v26 = vld [vmem:[#allocation2 + $0x30] sm:$0xff]  ;;  %v5219_v27 = vld [vmem:[#allocation2 + $0x38] sm:$0xff]  ;;  %488 = vrot.lane.b32.xlu0 %v5206_v25, %s4973_s25 }
  0x2a   : > { %330 = vst.msk [vmem:[#allocation2 + $0xd9] sm:$0xff] %vm225_vm0, %v297_v20  ;;  %331 = vst.msk [vmem:[#allocation2 + $0xe1] sm:$0xff] %vm225_vm0, %v298_v21  ;;  %v5221_v28 = vld [vmem:[#allocation2 + $0x28] sm:$0x3]  ;;  %v5229_v30 = vld [vmem:[#allocation2 + $0x50] sm:$0xff] }
  0x2b   : > { %332 = vst.msk [vmem:[#allocation2 + $0xf1] sm:$0xff] %vm225_vm0, %v299_v22  ;;  %333 = vst.msk [vmem:[#allocation2 + $0xf9] sm:$0xff] %vm225_vm0, %v300_v23  ;;  %v5227_v29 = vld [vmem:[#allocation2 + $0x48] sm:$0xff]  ;;  %v5277_v41 = vld [vmem:[#allocation2 + $0x40] sm:$0x3] }
  0x2c   : > { %402 = vst.msk [vmem:[#allocation4 + $0x10] sm:$0xff] %vm225_vm0, %v5204_v24  ;;  %403 = vst.msk [vmem:[#allocation4 + $0x18] sm:$0xff] %vm225_vm0, %v5206_v25  ;;  %v5237_v31 = vld [vmem:[#allocation2 + $0x60] sm:$0xff]  ;;  %v5239_v32 = vld [vmem:[#allocation2 + $0x68] sm:$0xff] }
  0x2d   : > { %404 = vst.msk [vmem:[#allocation4 + $0x20] sm:$0xff] %vm225_vm0, %v5217_v26  ;;  %405 = vst.msk [vmem:[#allocation4 + $0x28] sm:$0xff] %vm225_vm0, %v5219_v27  ;;  %v5245_v33 = vld [vmem:[#allocation2 + $0x78] sm:$0xff]  ;;  %v5247_v34 = vld [vmem:[#allocation2 + $0x80] sm:$0xff]  ;;  %490 = vrot.lane.b32.xlu1 %v5221_v28, %s4973_s25  ;;  %492 = vrot.lane.b32.xlu0 %v5217_v26, %s4973_s25 }
  0x2e   : > { %406 = vst.msk [vmem:[#allocation4 + $0x30] sm:$0xff] %vm225_vm0, %v5227_v29  ;;  %407 = vst.msk [vmem:[#allocation4 + $0x38] sm:$0xff] %vm225_vm0, %v5229_v30  ;;  %v5255_v35 = vld [vmem:[#allocation2 + $0x90] sm:$0xff]  ;;  %v5257_v36 = vld [vmem:[#allocation2 + $0x98] sm:$0xff] }
  0x2f   : > { %408 = vst.msk [vmem:[#allocation4 + $0x40] sm:$0xff] %vm225_vm0, %v5237_v31  ;;  %409 = vst.msk [vmem:[#allocation4 + $0x48] sm:$0xff] %vm225_vm0, %v5239_v32  ;;  %v5263_v37 = vld [vmem:[#allocation2 + $0xa8] sm:$0xff]  ;;  %v5265_v38 = vld [vmem:[#allocation2 + $0xb0] sm:$0xff] }
  0x30   : > { %410 = vst.msk [vmem:[#allocation4 + $0x50] sm:$0xff] %vm225_vm0, %v5245_v33  ;;  %411 = vst.msk [vmem:[#allocation4 + $0x58] sm:$0xff] %vm225_vm0, %v5247_v34  ;;  %v5273_v39 = vld [vmem:[#allocation2 + $0xc0] sm:$0xff]  ;;  %v5275_v40 = vld [vmem:[#allocation2 + $0xc8] sm:$0xff] }
  0x31   : > { %412 = vst.msk [vmem:[#allocation4 + $0x60] sm:$0xff] %vm225_vm0, %v5255_v35  ;;  %413 = vst.msk [vmem:[#allocation4 + $0x68] sm:$0xff] %vm225_vm0, %v5257_v36  ;;  %v5283_v42 = vld [vmem:[#allocation2 + $0xd8] sm:$0xff]  ;;  %v5285_v43 = vld [vmem:[#allocation2 + $0xe0] sm:$0xff]  ;;  %494 = vrot.lane.b32.xlu1 %v5219_v27, %s4973_s25  ;;  %496 = vrot.lane.b32.xlu0 %v5277_v41, %s4973_s25 }
  0x32   : > { %414 = vst.msk [vmem:[#allocation4 + $0x70] sm:$0xff] %vm225_vm0, %v5263_v37  ;;  %415 = vst.msk [vmem:[#allocation4 + $0x78] sm:$0xff] %vm225_vm0, %v5265_v38  ;;  %v5293_v44 = vld [vmem:[#allocation2 + $0xf0] sm:$0xff]  ;;  %v5295_v45 = vld [vmem:[#allocation2 + $0xf8] sm:$0xff] }
  0x33   : > { %416 = vst.msk [vmem:[#allocation4 + $0x80] sm:$0xff] %vm225_vm0, %v5273_v39  ;;  %417 = vst.msk [vmem:[#allocation4 + $0x88] sm:$0xff] %vm225_vm0, %v5275_v40  ;;  %v5324_v56 = vld [vmem:[#allocation2 + $0x58] sm:$0x3]  ;;  %v5345_v61 = vld [vmem:[#allocation2 + $0x70] sm:$0x3] }
  0x34   : > { %418 = vst.msk [vmem:[#allocation4 + $0x90] sm:$0xff] %vm225_vm0, %v5283_v42  ;;  %419 = vst.msk [vmem:[#allocation4 + $0x98] sm:$0xff] %vm225_vm0, %v5285_v43  ;;  %v5381_v5 = vld [vmem:[#allocation2 + $0x88] sm:$0x3]  ;;  %v5389_v6 = vld [vmem:[#allocation2 + $0xa0] sm:$0x3] }
  0x35   : > { %420 = vst.msk [vmem:[#allocation4 + $0xa0] sm:$0xff] %vm225_vm0, %v5293_v44  ;;  %421 = vst.msk [vmem:[#allocation4 + $0xa8] sm:$0xff] %vm225_vm0, %v5295_v45  ;;  %498 = vrot.lane.b32.xlu1 %v5227_v29, %s4973_s25  ;;  %500 = vrot.lane.b32.xlu0 %v5229_v30, %s4973_s25  ;;  %v5397_v10 = vld [vmem:[#allocation2 + $0xb8] sm:$0x3]  ;;  %v5405_v11 = vld [vmem:[#allocation2 + $0xd0] sm:$0x3] }
  0x36   : > { %334 = vst.msk [vmem:[#allocation2 + $0x109] sm:$0xff] %vm225_vm0, %v301_v46  ;;  %335 = vst.msk [vmem:[#allocation2 + $0x111] sm:$0xff] %vm225_vm0, %v302_v47  ;;  %v5413_v12 = vld [vmem:[#allocation2 + $0xe8] sm:$0x3]  ;;  %v5421_v13 = vld [vmem:[#allocation2 + $0x100] sm:$0x3] }
  0x37   : > { %336 = vst.msk [vmem:[#allocation2 + $0x121] sm:$0xff] %vm225_vm0, %v303_v48  ;;  %337 = vst.msk [vmem:[#allocation2 + $0x129] sm:$0xff] %vm225_vm0, %v304_v49  ;;  %v312_v19 = vld [vmem:[%s5149_s24 + $0xf8] sm:$0xff] }
  0x38   : > { %338 = vst.msk [vmem:[#allocation2 + $0x139] sm:$0xff] %vm225_vm0, %v305_v50  ;;  %339 = vst.msk [vmem:[#allocation2 + $0x141] sm:$0xff] %vm225_vm0, %v306_v51 }
  0x39   : > { %340 = vst.msk [vmem:[#allocation2 + $0x151] sm:$0xff] %vm225_vm0, %v307_v52  ;;  %341 = vst.msk [vmem:[#allocation2 + $0x159] sm:$0xff] %vm225_vm0, %v308_v53  ;;  %502 = vrot.lane.b32.xlu1 %v5324_v56, %s4973_s25  ;;  %504 = vrot.lane.b32.xlu0 %v5237_v31, %s4973_s25 }
  0x3a   : > { %342 = vst.msk [vmem:[#allocation2 + $0x169] sm:$0xff] %vm225_vm0, %v309_v54  ;;  %343 = vst.msk [vmem:[#allocation2 + $0x171] sm:$0xff] %vm225_vm0, %v310_v55 }
  0x3b   : > { %345 = vst.msk [vmem:[#allocation2 + $0x189] sm:$0xff] %vm225_vm0, %v312_v19 }
  0x3d   : > { %v5331_v57 = vld [vmem:[#allocation2 + $0x108] sm:$0xff]  ;;  %v5333_v58 = vld [vmem:[#allocation2 + $0x110] sm:$0xff]  ;;  %506 = vrot.lane.b32.xlu1 %v5239_v32, %s4973_s25  ;;  %508 = vrot.lane.b32.xlu0 %v5345_v61, %s4973_s25  ;;  %v5429_v14 = vld [vmem:[#allocation2 + $0x118] sm:$0x3] }
  0x3e   : > { %422 = vst.msk [vmem:[#allocation4 + $0xb0] sm:$0xff] %vm225_vm0, %v5331_v57  ;;  %423 = vst.msk [vmem:[#allocation4 + $0xb8] sm:$0xff] %vm225_vm0, %v5333_v58  ;;  %v5341_v59 = vld [vmem:[#allocation2 + $0x120] sm:$0xff]  ;;  %v5343_v60 = vld [vmem:[#allocation2 + $0x128] sm:$0xff] }
  0x3f   : > { %424 = vst.msk [vmem:[#allocation4 + $0xc0] sm:$0xff] %vm225_vm0, %v5341_v59  ;;  %425 = vst.msk [vmem:[#allocation4 + $0xc8] sm:$0xff] %vm225_vm0, %v5343_v60  ;;  %v5351_v62 = vld [vmem:[#allocation2 + $0x138] sm:$0xff]  ;;  %v5353_v63 = vld [vmem:[#allocation2 + $0x140] sm:$0xff] }
  0x40   : > { %426 = vst.msk [vmem:[#allocation4 + $0xd0] sm:$0xff] %vm225_vm0, %v5351_v62  ;;  %427 = vst.msk [vmem:[#allocation4 + $0xd8] sm:$0xff] %vm225_vm0, %v5353_v63  ;;  %v5361_v1 = vld [vmem:[#allocation2 + $0x150] sm:$0xff]  ;;  %v5363_v2 = vld [vmem:[#allocation2 + $0x158] sm:$0xff] }
  0x41   : > { %428 = vst.msk [vmem:[#allocation4 + $0xe0] sm:$0xff] %vm225_vm0, %v5361_v1  ;;  %429 = vst.msk [vmem:[#allocation4 + $0xe8] sm:$0xff] %vm225_vm0, %v5363_v2  ;;  %v5369_v3 = vld [vmem:[#allocation2 + $0x168] sm:$0xff]  ;;  %v5371_v4 = vld [vmem:[#allocation2 + $0x170] sm:$0xff]  ;;  %510 = vrot.lane.b32.xlu1 %v5245_v33, %s4973_s25  ;;  %512 = vrot.lane.b32.xlu0 %v5247_v34, %s4973_s25 }
  0x42   : > { %430 = vst.msk [vmem:[#allocation4 + $0xf0] sm:$0xff] %vm225_vm0, %v5369_v3  ;;  %431 = vst.msk [vmem:[#allocation4 + $0xf8] sm:$0xff] %vm225_vm0, %v5371_v4  ;;  %v5437_v15 = vld [vmem:[#allocation2 + $0x130] sm:$0x3]  ;;  %v5445_v16 = vld [vmem:[#allocation2 + $0x148] sm:$0x3] }
  0x43   : > { %v5453_v17 = vld [vmem:[#allocation2 + $0x160] sm:$0x3]  ;;  %v5461_v18 = vld [vmem:[#allocation2 + $0x178] sm:$0x3] }
  0x45   : > { %514 = vrot.lane.b32.xlu1 %v5381_v5, %s4973_s25  ;;  %516 = vrot.lane.b32.xlu0 %v5255_v35, %s4973_s25 }
  0x49   : > { %518 = vrot.lane.b32.xlu1 %v5257_v36, %s4973_s25  ;;  %520 = vrot.lane.b32.xlu0 %v5389_v6, %s4973_s25 }
  0x4d   : > { %522 = vrot.lane.b32.xlu1 %v5263_v37, %s4973_s25  ;;  %524 = vrot.lane.b32.xlu0 %v5265_v38, %s4973_s25 }
  0x51   : > { %526 = vrot.lane.b32.xlu1 %v5397_v10, %s4973_s25  ;;  %528 = vrot.lane.b32.xlu0 %v5273_v39, %s4973_s25 }
  0x55   : > { %530 = vrot.lane.b32.xlu1 %v5275_v40, %s4973_s25  ;;  %532 = vrot.lane.b32.xlu0 %v5405_v11, %s4973_s25 }
  0x59   : > { %534 = vrot.lane.b32.xlu1 %v5283_v42, %s4973_s25  ;;  %536 = vrot.lane.b32.xlu0 %v5285_v43, %s4973_s25 }
  0x5d   : > { %538 = vrot.lane.b32.xlu1 %v5413_v12, %s4973_s25  ;;  %540 = vrot.lane.b32.xlu0 %v5293_v44, %s4973_s25 }
  0x61   : > { %542 = vrot.lane.b32.xlu1 %v5295_v45, %s4973_s25  ;;  %544 = vrot.lane.b32.xlu0 %v5421_v13, %s4973_s25 }
  0x65   : > { %546 = vrot.lane.b32.xlu1 %v5331_v57, %s4973_s25  ;;  %548 = vrot.lane.b32.xlu0 %v5333_v58, %s4973_s25 }
  0x69   : > { %550 = vrot.lane.b32.xlu1 %v5429_v14, %s4973_s25  ;;  %552 = vrot.lane.b32.xlu0 %v5341_v59, %s4973_s25 }
  0x6d   : > { %554 = vrot.lane.b32.xlu1 %v5343_v60, %s4973_s25  ;;  %556 = vrot.lane.b32.xlu0 %v5437_v15, %s4973_s25 }
  0x71   : > { %558 = vrot.lane.b32.xlu1 %v5351_v62, %s4973_s25  ;;  %560 = vrot.lane.b32.xlu0 %v5353_v63, %s4973_s25 }
  0x75   : > { %562 = vrot.lane.b32.xlu1 %v5445_v16, %s4973_s25  ;;  %564 = vrot.lane.b32.xlu0 %v5361_v1, %s4973_s25 }
  0x79   : > { %566 = vrot.lane.b32.xlu1 %v5363_v2, %s4973_s25  ;;  %568 = vrot.lane.b32.xlu0 %v5453_v17, %s4973_s25 }
  0x7d   : > { %570 = vrot.lane.b32.xlu1 %v5369_v3, %s4973_s25  ;;  %572 = vrot.lane.b32.xlu0 %v5371_v4, %s4973_s25 }
  0x81   : > { %574 = vrot.lane.b32.xlu1 %v5461_v18, %s4973_s25  ;;  %675 = vrot.lane.b32.xlu0 %v5160_v7, %s4974_s26  ;;  %v481_v7 = vpop.permute.xlu0 %480 }
  0x82   : > { %625 = vst.msk [vmem:[#allocation4 - $0x1] sm:$0xfe] %vm624_vm2, %v481_v7 }
  0x85   : > { %677 = vrot.lane.b32.xlu1 %v5164_v9, %s4974_s26  ;;  %679 = vrot.lane.b32.xlu0 %v5162_v8, %s4974_s26  ;;  %v311_v9 = vld [vmem:[%s5149_s24 + $0xf0] sm:$0xff]  ;;  %v483_v20 = vpop.permute.xlu0 %482 }
  0x86   : > { %344 = vst.msk [vmem:[#allocation2 + $0x181] sm:$0xff] %vm225_vm0, %v311_v9  ;;  %vm2055_vm0 = vcmask 1043456  }
  0x87   : > { %627 = vst.msk [vmem:[#allocation4 + $0x7] sm:$0xff] %vm626_vm4, %v483_v20 }
  0x89   : > { %681 = vrot.lane.b32.xlu1 %v5204_v24, %s4974_s26  ;;  %683 = vrot.lane.b32.xlu0 %v5206_v25, %s4974_s26 }
  0x8d   : > { %685 = vrot.lane.b32.xlu1 %v5221_v28, %s4974_s26  ;;  %687 = vrot.lane.b32.xlu0 %v5217_v26, %s4974_s26 }
  0x91   : > { %689 = vrot.lane.b32.xlu1 %v5219_v27, %s4974_s26  ;;  %691 = vrot.lane.b32.xlu0 %v5277_v41, %s4974_s26 }
  0x92   : > { %v485_v8 = vpop.permute.xlu1 %484 }
  0x93   : > { %629 = vst.msk [vmem:[#allocation4 + $0xf] sm:$0x1] %vm628_vm3, %v485_v8 }
  0x95   : > { %693 = vrot.lane.b32.xlu1 %v5227_v29, %s4974_s26  ;;  %695 = vrot.lane.b32.xlu0 %v5229_v30, %s4974_s26 }
  0x99   : > { %697 = vrot.lane.b32.xlu1 %v5324_v56, %s4974_s26  ;;  %699 = vrot.lane.b32.xlu0 %v5237_v31, %s4974_s26 }
  0x9b   : > { %v487_v21 = vpop.permute.xlu1 %486  ;;  %v489_v22 = vpop.permute.xlu0 %488 }
  0x9c   : > { %630 = vst.msk [vmem:[#allocation4 + $0xf] sm:$0xfe] %vm624_vm2, %v487_v21 }
  0x9d   : > { %701 = vrot.lane.b32.xlu1 %v5239_v32, %s4974_s26  ;;  %631 = vst.msk [vmem:[#allocation4 + $0x17] sm:$0xff] %vm626_vm4, %v489_v22  ;;  %703 = vrot.lane.b32.xlu0 %v5345_v61, %s4974_s26 }
  0x9f   : > { %v491_v23 = vpop.permute.xlu1 %490  ;;  %v493_v46 = vpop.permute.xlu0 %492 }
  0xa0   : > { %632 = vst.msk [vmem:[#allocation4 + $0x1f] sm:$0x1] %vm628_vm3, %v491_v23 }
  0xa1   : > { %705 = vrot.lane.b32.xlu1 %v5245_v33, %s4974_s26  ;;  %633 = vst.msk [vmem:[#allocation4 + $0x1f] sm:$0xfe] %vm624_vm2, %v493_v46  ;;  %707 = vrot.lane.b32.xlu0 %v5247_v34, %s4974_s26 }
  0xa3   : > { %v495_v47 = vpop.permute.xlu1 %494  ;;  %v497_v48 = vpop.permute.xlu0 %496 }
  0xa4   : > { %634 = vst.msk [vmem:[#allocation4 + $0x27] sm:$0xff] %vm626_vm4, %v495_v47 }
  0xa5   : > { %709 = vrot.lane.b32.xlu1 %v5381_v5, %s4974_s26  ;;  %635 = vst.msk [vmem:[#allocation4 + $0x2f] sm:$0x1] %vm628_vm3, %v497_v48  ;;  %711 = vrot.lane.b32.xlu0 %v5255_v35, %s4974_s26 }
  0xa7   : > { %v499_v49 = vpop.permute.xlu1 %498  ;;  %v501_v50 = vpop.permute.xlu0 %500 }
  0xa8   : > { %636 = vst.msk [vmem:[#allocation4 + $0x2f] sm:$0xfe] %vm624_vm2, %v499_v49 }
  0xa9   : > { %713 = vrot.lane.b32.xlu1 %v5257_v36, %s4974_s26  ;;  %637 = vst.msk [vmem:[#allocation4 + $0x37] sm:$0xff] %vm626_vm4, %v501_v50  ;;  %715 = vrot.lane.b32.xlu0 %v5389_v6, %s4974_s26 }
  0xab   : > { %v503_v51 = vpop.permute.xlu1 %502  ;;  %v505_v52 = vpop.permute.xlu0 %504 }
  0xac   : > { %638 = vst.msk [vmem:[#allocation4 + $0x3f] sm:$0x1] %vm628_vm3, %v503_v51 }
  0xad   : > { %717 = vrot.lane.b32.xlu1 %v5263_v37, %s4974_s26  ;;  %639 = vst.msk [vmem:[#allocation4 + $0x3f] sm:$0xfe] %vm624_vm2, %v505_v52  ;;  %719 = vrot.lane.b32.xlu0 %v5265_v38, %s4974_s26 }
  0xaf   : > { %v507_v53 = vpop.permute.xlu1 %506  ;;  %v509_v54 = vpop.permute.xlu0 %508 }
  0xb0   : > { %640 = vst.msk [vmem:[#allocation4 + $0x47] sm:$0xff] %vm626_vm4, %v507_v53 }
  0xb1   : > { %721 = vrot.lane.b32.xlu1 %v5397_v10, %s4974_s26  ;;  %641 = vst.msk [vmem:[#allocation4 + $0x4f] sm:$0x1] %vm628_vm3, %v509_v54  ;;  %723 = vrot.lane.b32.xlu0 %v5273_v39, %s4974_s26 }
  0xb3   : > { %v511_v55 = vpop.permute.xlu1 %510  ;;  %v513_v7 = vpop.permute.xlu0 %512 }
  0xb4   : > { %642 = vst.msk [vmem:[#allocation4 + $0x4f] sm:$0xfe] %vm624_vm2, %v511_v55 }
  0xb5   : > { %725 = vrot.lane.b32.xlu1 %v5275_v40, %s4974_s26  ;;  %643 = vst.msk [vmem:[#allocation4 + $0x57] sm:$0xff] %vm626_vm4, %v513_v7  ;;  %727 = vrot.lane.b32.xlu0 %v5405_v11, %s4974_s26 }
  0xb7   : > { %v515_v8 = vpop.permute.xlu1 %514  ;;  %v517_v9 = vpop.permute.xlu0 %516 }
  0xb8   : > { %644 = vst.msk [vmem:[#allocation4 + $0x5f] sm:$0x1] %vm628_vm3, %v515_v8 }
  0xb9   : > { %729 = vrot.lane.b32.xlu1 %v5283_v42, %s4974_s26  ;;  %645 = vst.msk [vmem:[#allocation4 + $0x5f] sm:$0xfe] %vm624_vm2, %v517_v9  ;;  %731 = vrot.lane.b32.xlu0 %v5285_v43, %s4974_s26 }
  0xbb   : > { %v519_v19 = vpop.permute.xlu1 %518  ;;  %v521_v20 = vpop.permute.xlu0 %520 }
  0xbc   : > { %646 = vst.msk [vmem:[#allocation4 + $0x67] sm:$0xff] %vm626_vm4, %v519_v19 }
  0xbd   : > { %733 = vrot.lane.b32.xlu1 %v5413_v12, %s4974_s26  ;;  %647 = vst.msk [vmem:[#allocation4 + $0x6f] sm:$0x1] %vm628_vm3, %v521_v20  ;;  %735 = vrot.lane.b32.xlu0 %v5293_v44, %s4974_s26 }
  0xbf   : > { %v523_v21 = vpop.permute.xlu1 %522  ;;  %v525_v22 = vpop.permute.xlu0 %524 }
  0xc0   : > { %648 = vst.msk [vmem:[#allocation4 + $0x6f] sm:$0xfe] %vm624_vm2, %v523_v21 }
  0xc1   : > { %737 = vrot.lane.b32.xlu1 %v5295_v45, %s4974_s26  ;;  %649 = vst.msk [vmem:[#allocation4 + $0x77] sm:$0xff] %vm626_vm4, %v525_v22  ;;  %739 = vrot.lane.b32.xlu0 %v5421_v13, %s4974_s26 }
  0xc3   : > { %v527_v23 = vpop.permute.xlu1 %526  ;;  %v529_v46 = vpop.permute.xlu0 %528 }
  0xc4   : > { %650 = vst.msk [vmem:[#allocation4 + $0x7f] sm:$0x1] %vm628_vm3, %v527_v23 }
  0xc5   : > { %741 = vrot.lane.b32.xlu1 %v5331_v57, %s4974_s26  ;;  %651 = vst.msk [vmem:[#allocation4 + $0x7f] sm:$0xfe] %vm624_vm2, %v529_v46  ;;  %743 = vrot.lane.b32.xlu0 %v5333_v58, %s4974_s26 }
  0xc7   : > { %v531_v47 = vpop.permute.xlu1 %530  ;;  %v533_v48 = vpop.permute.xlu0 %532 }
  0xc8   : > { %652 = vst.msk [vmem:[#allocation4 + $0x87] sm:$0xff] %vm626_vm4, %v531_v47 }
  0xc9   : > { %745 = vrot.lane.b32.xlu1 %v5429_v14, %s4974_s26  ;;  %653 = vst.msk [vmem:[#allocation4 + $0x8f] sm:$0x1] %vm628_vm3, %v533_v48  ;;  %747 = vrot.lane.b32.xlu0 %v5341_v59, %s4974_s26 }
  0xcb   : > { %v535_v49 = vpop.permute.xlu1 %534  ;;  %v537_v50 = vpop.permute.xlu0 %536 }
  0xcc   : > { %654 = vst.msk [vmem:[#allocation4 + $0x8f] sm:$0xfe] %vm624_vm2, %v535_v49 }
  0xcd   : > { %749 = vrot.lane.b32.xlu1 %v5343_v60, %s4974_s26  ;;  %655 = vst.msk [vmem:[#allocation4 + $0x97] sm:$0xff] %vm626_vm4, %v537_v50  ;;  %751 = vrot.lane.b32.xlu0 %v5437_v15, %s4974_s26 }
  0xcf   : > { %v539_v51 = vpop.permute.xlu1 %538  ;;  %v541_v52 = vpop.permute.xlu0 %540 }
  0xd0   : > { %656 = vst.msk [vmem:[#allocation4 + $0x9f] sm:$0x1] %vm628_vm3, %v539_v51 }
  0xd1   : > { %753 = vrot.lane.b32.xlu1 %v5351_v62, %s4974_s26  ;;  %657 = vst.msk [vmem:[#allocation4 + $0x9f] sm:$0xfe] %vm624_vm2, %v541_v52  ;;  %755 = vrot.lane.b32.xlu0 %v5353_v63, %s4974_s26 }
  0xd3   : > { %v543_v53 = vpop.permute.xlu1 %542  ;;  %v545_v54 = vpop.permute.xlu0 %544 }
  0xd4   : > { %658 = vst.msk [vmem:[#allocation4 + $0xa7] sm:$0xff] %vm626_vm4, %v543_v53 }
  0xd5   : > { %757 = vrot.lane.b32.xlu1 %v5445_v16, %s4974_s26  ;;  %659 = vst.msk [vmem:[#allocation4 + $0xaf] sm:$0x1] %vm628_vm3, %v545_v54  ;;  %759 = vrot.lane.b32.xlu0 %v5361_v1, %s4974_s26 }
  0xd7   : > { %v547_v55 = vpop.permute.xlu1 %546  ;;  %v549_v7 = vpop.permute.xlu0 %548 }
  0xd8   : > { %660 = vst.msk [vmem:[#allocation4 + $0xaf] sm:$0xfe] %vm624_vm2, %v547_v55 }
  0xd9   : > { %761 = vrot.lane.b32.xlu1 %v5363_v2, %s4974_s26  ;;  %661 = vst.msk [vmem:[#allocation4 + $0xb7] sm:$0xff] %vm626_vm4, %v549_v7  ;;  %763 = vrot.lane.b32.xlu0 %v5453_v17, %s4974_s26 }
  0xdb   : > { %v551_v8 = vpop.permute.xlu1 %550  ;;  %v553_v9 = vpop.permute.xlu0 %552 }
  0xdc   : > { %662 = vst.msk [vmem:[#allocation4 + $0xbf] sm:$0x1] %vm628_vm3, %v551_v8 }
  0xdd   : > { %765 = vrot.lane.b32.xlu1 %v5369_v3, %s4974_s26  ;;  %663 = vst.msk [vmem:[#allocation4 + $0xbf] sm:$0xfe] %vm624_vm2, %v553_v9  ;;  %767 = vrot.lane.b32.xlu0 %v5371_v4, %s4974_s26 }
  0xdf   : > { %v555_v19 = vpop.permute.xlu1 %554  ;;  %v557_v20 = vpop.permute.xlu0 %556 }
  0xe0   : > { %664 = vst.msk [vmem:[#allocation4 + $0xc7] sm:$0xff] %vm626_vm4, %v555_v19 }
  0xe1   : > { %769 = vrot.lane.b32.xlu1 %v5461_v18, %s4974_s26  ;;  %665 = vst.msk [vmem:[#allocation4 + $0xcf] sm:$0x1] %vm628_vm3, %v557_v20  ;;  %872 = vrot.lane.b32.xlu0 %v5204_v24, %s4975_s27 }
  0xe3   : > { %v559_v21 = vpop.permute.xlu1 %558  ;;  %v561_v22 = vpop.permute.xlu0 %560 }
  0xe4   : > { %666 = vst.msk [vmem:[#allocation4 + $0xcf] sm:$0xfe] %vm624_vm2, %v559_v21 }
  0xe5   : > { %874 = vrot.lane.b32.xlu1 %v5206_v25, %s4975_s27  ;;  %667 = vst.msk [vmem:[#allocation4 + $0xd7] sm:$0xff] %vm626_vm4, %v561_v22  ;;  %876 = vrot.lane.b32.xlu0 %v5217_v26, %s4975_s27 }
  0xe7   : > { %v563_v23 = vpop.permute.xlu1 %562  ;;  %v565_v46 = vpop.permute.xlu0 %564 }
  0xe8   : > { %668 = vst.msk [vmem:[#allocation4 + $0xdf] sm:$0x1] %vm628_vm3, %v563_v23 }
  0xe9   : > { %878 = vrot.lane.b32.xlu1 %v5219_v27, %s4975_s27  ;;  %669 = vst.msk [vmem:[#allocation4 + $0xdf] sm:$0xfe] %vm624_vm2, %v565_v46  ;;  %880 = vrot.lane.b32.xlu0 %v5227_v29, %s4975_s27 }
  0xeb   : > { %v567_v47 = vpop.permute.xlu1 %566  ;;  %v569_v48 = vpop.permute.xlu0 %568 }
  0xec   : > { %670 = vst.msk [vmem:[#allocation4 + $0xe7] sm:$0xff] %vm626_vm4, %v567_v47 }
  0xed   : > { %882 = vrot.lane.b32.xlu1 %v5229_v30, %s4975_s27  ;;  %671 = vst.msk [vmem:[#allocation4 + $0xef] sm:$0x1] %vm628_vm3, %v569_v48  ;;  %884 = vrot.lane.b32.xlu0 %v5237_v31, %s4975_s27 }
  0xef   : > { %v571_v49 = vpop.permute.xlu1 %570  ;;  %v573_v50 = vpop.permute.xlu0 %572 }
  0xf0   : > { %672 = vst.msk [vmem:[#allocation4 + $0xef] sm:$0xfe] %vm624_vm2, %v571_v49  ;;  %vm1670_vm2 = vcmask 261344  }
  0xf1   : > { %886 = vrot.lane.b32.xlu1 %v5239_v32, %s4975_s27  ;;  %673 = vst.msk [vmem:[#allocation4 + $0xf7] sm:$0xff] %vm626_vm4, %v573_v50  ;;  %888 = vrot.lane.b32.xlu0 %v5245_v33, %s4975_s27  ;;  %vm1863_vm4 = vcmask 294146  }
  0xf3   : > { %v575_v51 = vpop.permute.xlu1 %574  ;;  %v676_v52 = vpop.permute.xlu0 %675 }
  0xf4   : > { %674 = vst.msk [vmem:[#allocation4 + $0xff] sm:$0x1] %vm628_vm3, %v575_v51  ;;  %vm1672_vm3 = vcmask 254176  }
  0xf5   : > { %890 = vrot.lane.b32.xlu1 %v5247_v34, %s4975_s27  ;;  %820 = vst.msk [vmem:[#allocation4 - $0x2] sm:$0xfc] %vm819_vm5, %v676_v52  ;;  %892 = vrot.lane.b32.xlu0 %v5255_v35, %s4975_s27 }
  0xf7   : > { %v678_v53 = vpop.permute.xlu1 %677  ;;  %v680_v54 = vpop.permute.xlu0 %679 }
  0xf8   : > { %822 = vst.msk [vmem:[#allocation4 + $0x6] sm:$0xff] %vm821_vm6, %v678_v53 }
  0xf9   : > { %894 = vrot.lane.b32.xlu1 %v5257_v36, %s4975_s27  ;;  %824 = vst.msk [vmem:[#allocation4 + $0xe] sm:$0x3] %vm823_vm7, %v680_v54  ;;  %896 = vrot.lane.b32.xlu0 %v5263_v37, %s4975_s27  ;;  %v5693_v54 = vld [vmem:[#allocation2 + $0x180] sm:$0xff] }
  0xfb   : > { %v682_v55 = vpop.permute.xlu1 %681  ;;  %v684_v7 = vpop.permute.xlu0 %683 }
  0xfc   : > { %825 = vst.msk [vmem:[#allocation4 + $0xe] sm:$0xfc] %vm819_vm5, %v682_v55 }
  0xfd   : > { %898 = vrot.lane.b32.xlu1 %v5265_v38, %s4975_s27  ;;  %826 = vst.msk [vmem:[#allocation4 + $0x16] sm:$0xff] %vm821_vm6, %v684_v7  ;;  %900 = vrot.lane.b32.xlu0 %v5273_v39, %s4975_s27  ;;  %v5698_v7 = vld [vmem:[#allocation2 + $0x188] sm:$0xff] }
  0xff   : > { %v686_v8 = vpop.permute.xlu1 %685  ;;  %v688_v9 = vpop.permute.xlu0 %687 }
 0x100   : > { %827 = vst.msk [vmem:[#allocation4 + $0x1e] sm:$0x3] %vm823_vm7, %v686_v8 }
 0x101   : > { %902 = vrot.lane.b32.xlu1 %v5275_v40, %s4975_s27  ;;  %828 = vst.msk [vmem:[#allocation4 + $0x1e] sm:$0xfc] %vm819_vm5, %v688_v9  ;;  %904 = vrot.lane.b32.xlu0 %v5283_v42, %s4975_s27 }
 0x103   : > { %v690_v19 = vpop.permute.xlu1 %689  ;;  %v692_v20 = vpop.permute.xlu0 %691 }
 0x104   : > { %829 = vst.msk [vmem:[#allocation4 + $0x26] sm:$0xff] %vm821_vm6, %v690_v19 }
 0x105   : > { %906 = vrot.lane.b32.xlu1 %v5285_v43, %s4975_s27  ;;  %830 = vst.msk [vmem:[#allocation4 + $0x2e] sm:$0x3] %vm823_vm7, %v692_v20  ;;  %908 = vrot.lane.b32.xlu0 %v5293_v44, %s4975_s27 }
 0x107   : > { %v694_v21 = vpop.permute.xlu1 %693  ;;  %v696_v22 = vpop.permute.xlu0 %695 }
 0x108   : > { %831 = vst.msk [vmem:[#allocation4 + $0x2e] sm:$0xfc] %vm819_vm5, %v694_v21 }
 0x109   : > { %910 = vrot.lane.b32.xlu1 %v5295_v45, %s4975_s27  ;;  %832 = vst.msk [vmem:[#allocation4 + $0x36] sm:$0xff] %vm821_vm6, %v696_v22  ;;  %912 = vrot.lane.b32.xlu0 %v5331_v57, %s4975_s27 }
 0x10b   : > { %v698_v23 = vpop.permute.xlu1 %697  ;;  %v700_v46 = vpop.permute.xlu0 %699 }
 0x10c   : > { %833 = vst.msk [vmem:[#allocation4 + $0x3e] sm:$0x3] %vm823_vm7, %v698_v23 }
 0x10d   : > { %914 = vrot.lane.b32.xlu1 %v5333_v58, %s4975_s27  ;;  %834 = vst.msk [vmem:[#allocation4 + $0x3e] sm:$0xfc] %vm819_vm5, %v700_v46  ;;  %916 = vrot.lane.b32.xlu0 %v5341_v59, %s4975_s27 }
 0x10f   : > { %v702_v47 = vpop.permute.xlu1 %701  ;;  %v704_v48 = vpop.permute.xlu0 %703 }
 0x110   : > { %835 = vst.msk [vmem:[#allocation4 + $0x46] sm:$0xff] %vm821_vm6, %v702_v47 }
 0x111   : > { %918 = vrot.lane.b32.xlu1 %v5343_v60, %s4975_s27  ;;  %836 = vst.msk [vmem:[#allocation4 + $0x4e] sm:$0x3] %vm823_vm7, %v704_v48  ;;  %920 = vrot.lane.b32.xlu0 %v5351_v62, %s4975_s27 }
 0x113   : > { %v706_v49 = vpop.permute.xlu1 %705  ;;  %v708_v50 = vpop.permute.xlu0 %707 }
 0x114   : > { %837 = vst.msk [vmem:[#allocation4 + $0x4e] sm:$0xfc] %vm819_vm5, %v706_v49 }
 0x115   : > { %922 = vrot.lane.b32.xlu1 %v5353_v63, %s4975_s27  ;;  %838 = vst.msk [vmem:[#allocation4 + $0x56] sm:$0xff] %vm821_vm6, %v708_v50  ;;  %924 = vrot.lane.b32.xlu0 %v5361_v1, %s4975_s27 }
 0x117   : > { %v710_v51 = vpop.permute.xlu1 %709  ;;  %v712_v52 = vpop.permute.xlu0 %711 }
 0x118   : > { %839 = vst.msk [vmem:[#allocation4 + $0x5e] sm:$0x3] %vm823_vm7, %v710_v51 }
 0x119   : > { %926 = vrot.lane.b32.xlu1 %v5363_v2, %s4975_s27  ;;  %840 = vst.msk [vmem:[#allocation4 + $0x5e] sm:$0xfc] %vm819_vm5, %v712_v52  ;;  %928 = vrot.lane.b32.xlu0 %v5369_v3, %s4975_s27 }
 0x11b   : > { %v714_v53 = vpop.permute.xlu1 %713  ;;  %v716_v55 = vpop.permute.xlu0 %715 }
 0x11c   : > { %841 = vst.msk [vmem:[#allocation4 + $0x66] sm:$0xff] %vm821_vm6, %v714_v53 }
 0x11d   : > { %930 = vrot.lane.b32.xlu1 %v5371_v4, %s4975_s27  ;;  %842 = vst.msk [vmem:[#allocation4 + $0x6e] sm:$0x3] %vm823_vm7, %v716_v55  ;;  %932 = vrot.lane.b32.xlu0 %v5693_v54, %s4975_s27 }
 0x11f   : > { %v718_v8 = vpop.permute.xlu1 %717  ;;  %v720_v9 = vpop.permute.xlu0 %719 }
 0x120   : > { %843 = vst.msk [vmem:[#allocation4 + $0x6e] sm:$0xfc] %vm819_vm5, %v718_v8 }
 0x121   : > { %934 = vrot.lane.b32.xlu1 %v5698_v7, %s4975_s27  ;;  %844 = vst.msk [vmem:[#allocation4 + $0x76] sm:$0xff] %vm821_vm6, %v720_v9  ;;  %1002 = vrot.lane.b32.xlu0 %v5204_v24, %s4976_s28  ;;  %s7865_s27 = scalar_lea.vmem %s8029_s5, %s4668_s21 }
 0x123   : > { %v722_v19 = vpop.permute.xlu1 %721  ;;  %v724_v20 = vpop.permute.xlu0 %723 }
 0x124   : > { %845 = vst.msk [vmem:[#allocation4 + $0x7e] sm:$0x3] %vm823_vm7, %v722_v19 }
 0x125   : > { %1004 = vrot.lane.b32.xlu1 %v5206_v25, %s4976_s28  ;;  %846 = vst.msk [vmem:[#allocation4 + $0x7e] sm:$0xfc] %vm819_vm5, %v724_v20  ;;  %1006 = vrot.lane.b32.xlu0 %v5221_v28, %s4976_s28 }
 0x127   : > { %v726_v21 = vpop.permute.xlu1 %725  ;;  %v728_v22 = vpop.permute.xlu0 %727 }
 0x128   : > { %847 = vst.msk [vmem:[#allocation4 + $0x86] sm:$0xff] %vm821_vm6, %v726_v21 }
 0x129   : > { %1008 = vrot.lane.b32.xlu1 %v5217_v26, %s4976_s28  ;;  %848 = vst.msk [vmem:[#allocation4 + $0x8e] sm:$0x3] %vm823_vm7, %v728_v22  ;;  %1010 = vrot.lane.b32.xlu0 %v5219_v27, %s4976_s28 }
 0x12b   : > { %v730_v23 = vpop.permute.xlu1 %729  ;;  %v732_v46 = vpop.permute.xlu0 %731 }
 0x12c   : > { %849 = vst.msk [vmem:[#allocation4 + $0x8e] sm:$0xfc] %vm819_vm5, %v730_v23 }
 0x12d   : > { %1012 = vrot.lane.b32.xlu1 %v5277_v41, %s4976_s28  ;;  %850 = vst.msk [vmem:[#allocation4 + $0x96] sm:$0xff] %vm821_vm6, %v732_v46  ;;  %1014 = vrot.lane.b32.xlu0 %v5227_v29, %s4976_s28 }
 0x12f   : > { %v734_v28 = vpop.permute.xlu1 %733  ;;  %v736_v47 = vpop.permute.xlu0 %735 }
 0x130   : > { %851 = vst.msk [vmem:[#allocation4 + $0x9e] sm:$0x3] %vm823_vm7, %v734_v28 }
 0x131   : > { %1016 = vrot.lane.b32.xlu1 %v5229_v30, %s4976_s28  ;;  %852 = vst.msk [vmem:[#allocation4 + $0x9e] sm:$0xfc] %vm819_vm5, %v736_v47  ;;  %1018 = vrot.lane.b32.xlu0 %v5324_v56, %s4976_s28 }
 0x133   : > { %v738_v48 = vpop.permute.xlu1 %737  ;;  %v740_v49 = vpop.permute.xlu0 %739 }
 0x134   : > { %853 = vst.msk [vmem:[#allocation4 + $0xa6] sm:$0xff] %vm821_vm6, %v738_v48 }
 0x135   : > { %1020 = vrot.lane.b32.xlu1 %v5237_v31, %s4976_s28  ;;  %854 = vst.msk [vmem:[#allocation4 + $0xae] sm:$0x3] %vm823_vm7, %v740_v49  ;;  %1022 = vrot.lane.b32.xlu0 %v5239_v32, %s4976_s28 }
 0x137   : > { %v742_v50 = vpop.permute.xlu1 %741  ;;  %v744_v51 = vpop.permute.xlu0 %743 }
 0x138   : > { %855 = vst.msk [vmem:[#allocation4 + $0xae] sm:$0xfc] %vm819_vm5, %v742_v50 }
 0x139   : > { %1024 = vrot.lane.b32.xlu1 %v5345_v61, %s4976_s28  ;;  %856 = vst.msk [vmem:[#allocation4 + $0xb6] sm:$0xff] %vm821_vm6, %v744_v51  ;;  %1026 = vrot.lane.b32.xlu0 %v5245_v33, %s4976_s28 }
 0x13b   : > { %v746_v52 = vpop.permute.xlu1 %745  ;;  %v748_v53 = vpop.permute.xlu0 %747 }
 0x13c   : > { %857 = vst.msk [vmem:[#allocation4 + $0xbe] sm:$0x3] %vm823_vm7, %v746_v52 }
 0x13d   : > { %1028 = vrot.lane.b32.xlu1 %v5247_v34, %s4976_s28  ;;  %858 = vst.msk [vmem:[#allocation4 + $0xbe] sm:$0xfc] %vm819_vm5, %v748_v53  ;;  %1030 = vrot.lane.b32.xlu0 %v5381_v5, %s4976_s28 }
 0x13f   : > { %v750_v55 = vpop.permute.xlu1 %749  ;;  %v752_v8 = vpop.permute.xlu0 %751 }
 0x140   : > { %859 = vst.msk [vmem:[#allocation4 + $0xc6] sm:$0xff] %vm821_vm6, %v750_v55 }
 0x141   : > { %1032 = vrot.lane.b32.xlu1 %v5255_v35, %s4976_s28  ;;  %860 = vst.msk [vmem:[#allocation4 + $0xce] sm:$0x3] %vm823_vm7, %v752_v8  ;;  %1034 = vrot.lane.b32.xlu0 %v5257_v36, %s4976_s28 }
 0x143   : > { %v754_v9 = vpop.permute.xlu1 %753  ;;  %v756_v19 = vpop.permute.xlu0 %755 }
 0x144   : > { %861 = vst.msk [vmem:[#allocation4 + $0xce] sm:$0xfc] %vm819_vm5, %v754_v9 }
 0x145   : > { %1036 = vrot.lane.b32.xlu1 %v5389_v6, %s4976_s28  ;;  %862 = vst.msk [vmem:[#allocation4 + $0xd6] sm:$0xff] %vm821_vm6, %v756_v19  ;;  %1038 = vrot.lane.b32.xlu0 %v5263_v37, %s4976_s28 }
 0x147   : > { %v758_v20 = vpop.permute.xlu1 %757  ;;  %v760_v21 = vpop.permute.xlu0 %759 }
 0x148   : > { %863 = vst.msk [vmem:[#allocation4 + $0xde] sm:$0x3] %vm823_vm7, %v758_v20 }
 0x149   : > { %1040 = vrot.lane.b32.xlu1 %v5265_v38, %s4976_s28  ;;  %864 = vst.msk [vmem:[#allocation4 + $0xde] sm:$0xfc] %vm819_vm5, %v760_v21  ;;  %1042 = vrot.lane.b32.xlu0 %v5397_v10, %s4976_s28 }
 0x14b   : > { %v762_v22 = vpop.permute.xlu1 %761  ;;  %v764_v23 = vpop.permute.xlu0 %763 }
 0x14c   : > { %865 = vst.msk [vmem:[#allocation4 + $0xe6] sm:$0xff] %vm821_vm6, %v762_v22 }
 0x14d   : > { %1044 = vrot.lane.b32.xlu1 %v5273_v39, %s4976_s28  ;;  %866 = vst.msk [vmem:[#allocation4 + $0xee] sm:$0x3] %vm823_vm7, %v764_v23  ;;  %1046 = vrot.lane.b32.xlu0 %v5275_v40, %s4976_s28 }
 0x14f   : > { %v766_v46 = vpop.permute.xlu1 %765  ;;  %v768_v28 = vpop.permute.xlu0 %767 }
 0x150   : > { %867 = vst.msk [vmem:[#allocation4 + $0xee] sm:$0xfc] %vm819_vm5, %v766_v46  ;;  %vm1865_vm5 = vcmask 294144  }
 0x151   : > { %1048 = vrot.lane.b32.xlu1 %v5405_v11, %s4976_s28  ;;  %868 = vst.msk [vmem:[#allocation4 + $0xf6] sm:$0xff] %vm821_vm6, %v768_v28  ;;  %1050 = vrot.lane.b32.xlu0 %v5283_v42, %s4976_s28  ;;  %vm1867_vm6 = vcmask 288000  }
 0x153   : > { %v770_v47 = vpop.permute.xlu1 %769  ;;  %v873_v48 = vpop.permute.xlu0 %872 }
 0x154   : > { %869 = vst.msk [vmem:[#allocation4 + $0xfe] sm:$0x3] %vm823_vm7, %v770_v47  ;;  %vm1958_vm7 = vcmask 293888  }
 0x155   : > { %1052 = vrot.lane.b32.xlu1 %v5285_v43, %s4976_s28  ;;  %969 = vst.msk [vmem:[#allocation4] sm:$0xff] %vm968_vm8, %v873_v48  ;;  %1054 = vrot.lane.b32.xlu0 %v5413_v12, %s4976_s28 }
 0x157   : > { %v875_v49 = vpop.permute.xlu1 %874  ;;  %v877_v50 = vpop.permute.xlu0 %876 }
 0x158   : > { %970 = vst.msk [vmem:[#allocation4 + $0x8] sm:$0xff] %vm968_vm8, %v875_v49  ;;  %971 = vst.msk [vmem:[#allocation4 + $0x10] sm:$0xff] %vm968_vm8, %v877_v50  ;;  %v5844_v50 = vld [vmem:[#allocation2 + $0x190] sm:$0x3] }
 0x159   : > { %1056 = vrot.lane.b32.xlu1 %v5293_v44, %s4976_s28  ;;  %1058 = vrot.lane.b32.xlu0 %v5295_v45, %s4976_s28 }
 0x15b   : > { %v879_v51 = vpop.permute.xlu1 %878  ;;  %v881_v52 = vpop.permute.xlu0 %880 }
 0x15c   : > { %972 = vst.msk [vmem:[#allocation4 + $0x18] sm:$0xff] %vm968_vm8, %v879_v51  ;;  %973 = vst.msk [vmem:[#allocation4 + $0x20] sm:$0xff] %vm968_vm8, %v881_v52 }
 0x15d   : > { %1060 = vrot.lane.b32.xlu1 %v5421_v13, %s4976_s28  ;;  %1062 = vrot.lane.b32.xlu0 %v5331_v57, %s4976_s28 }
 0x15f   : > { %v883_v53 = vpop.permute.xlu1 %882  ;;  %v885_v55 = vpop.permute.xlu0 %884 }
 0x160   : > { %974 = vst.msk [vmem:[#allocation4 + $0x28] sm:$0xff] %vm968_vm8, %v883_v53  ;;  %975 = vst.msk [vmem:[#allocation4 + $0x30] sm:$0xff] %vm968_vm8, %v885_v55  ;;  %v4927_v55 = vld [vmem:[#allocation2 + $0x28] sm:$0x3] }
 0x161   : > { %1064 = vrot.lane.b32.xlu1 %v5333_v58, %s4976_s28  ;;  %1066 = vrot.lane.b32.xlu0 %v5429_v14, %s4976_s28 }
 0x163   : > { %v887_v8 = vpop.permute.xlu1 %886  ;;  %v889_v9 = vpop.permute.xlu0 %888 }
 0x164   : > { %976 = vst.msk [vmem:[#allocation4 + $0x38] sm:$0xff] %vm968_vm8, %v887_v8  ;;  %977 = vst.msk [vmem:[#allocation4 + $0x40] sm:$0xff] %vm968_vm8, %v889_v9 }
 0x165   : > { %1068 = vrot.lane.b32.xlu1 %v5341_v59, %s4976_s28  ;;  %1070 = vrot.lane.b32.xlu0 %v5343_v60, %s4976_s28 }
 0x167   : > { %v891_v19 = vpop.permute.xlu1 %890  ;;  %v893_v20 = vpop.permute.xlu0 %892 }
 0x168   : > { %978 = vst.msk [vmem:[#allocation4 + $0x48] sm:$0xff] %vm968_vm8, %v891_v19  ;;  %979 = vst.msk [vmem:[#allocation4 + $0x50] sm:$0xff] %vm968_vm8, %v893_v20 }
 0x169   : > { %1072 = vrot.lane.b32.xlu1 %v5437_v15, %s4976_s28  ;;  %1074 = vrot.lane.b32.xlu0 %v5351_v62, %s4976_s28 }
 0x16b   : > { %v895_v21 = vpop.permute.xlu1 %894  ;;  %v897_v22 = vpop.permute.xlu0 %896 }
 0x16c   : > { %980 = vst.msk [vmem:[#allocation4 + $0x58] sm:$0xff] %vm968_vm8, %v895_v21  ;;  %981 = vst.msk [vmem:[#allocation4 + $0x60] sm:$0xff] %vm968_vm8, %v897_v22 }
 0x16d   : > { %1076 = vrot.lane.b32.xlu1 %v5353_v63, %s4976_s28  ;;  %1078 = vrot.lane.b32.xlu0 %v5445_v16, %s4976_s28 }
 0x16f   : > { %v899_v23 = vpop.permute.xlu1 %898  ;;  %v901_v46 = vpop.permute.xlu0 %900 }
 0x170   : > { %982 = vst.msk [vmem:[#allocation4 + $0x68] sm:$0xff] %vm968_vm8, %v899_v23  ;;  %983 = vst.msk [vmem:[#allocation4 + $0x70] sm:$0xff] %vm968_vm8, %v901_v46 }
 0x171   : > { %1080 = vrot.lane.b32.xlu1 %v5361_v1, %s4976_s28  ;;  %1082 = vrot.lane.b32.xlu0 %v5363_v2, %s4976_s28 }
 0x173   : > { %v903_v28 = vpop.permute.xlu1 %902  ;;  %v905_v47 = vpop.permute.xlu0 %904 }
 0x174   : > { %984 = vst.msk [vmem:[#allocation4 + $0x78] sm:$0xff] %vm968_vm8, %v903_v28  ;;  %985 = vst.msk [vmem:[#allocation4 + $0x80] sm:$0xff] %vm968_vm8, %v905_v47 }
 0x175   : > { %1084 = vrot.lane.b32.xlu1 %v5453_v17, %s4976_s28  ;;  %1086 = vrot.lane.b32.xlu0 %v5369_v3, %s4976_s28 }
 0x177   : > { %v907_v16 = vpop.permute.xlu1 %906  ;;  %v909_v48 = vpop.permute.xlu0 %908 }
 0x178   : > { %986 = vst.msk [vmem:[#allocation4 + $0x88] sm:$0xff] %vm968_vm8, %v907_v16  ;;  %987 = vst.msk [vmem:[#allocation4 + $0x90] sm:$0xff] %vm968_vm8, %v909_v48 }
 0x179   : > { %1088 = vrot.lane.b32.xlu1 %v5371_v4, %s4976_s28  ;;  %1090 = vrot.lane.b32.xlu0 %v5461_v18, %s4976_s28 }
 0x17b   : > { %v911_v49 = vpop.permute.xlu1 %910  ;;  %v913_v17 = vpop.permute.xlu0 %912 }
 0x17c   : > { %988 = vst.msk [vmem:[#allocation4 + $0x98] sm:$0xff] %vm968_vm8, %v911_v49  ;;  %989 = vst.msk [vmem:[#allocation4 + $0xa0] sm:$0xff] %vm968_vm8, %v913_v17 }
 0x17d   : > { %1092 = vrot.lane.b32.xlu1 %v5693_v54, %s4976_s28  ;;  %1094 = vrot.lane.b32.xlu0 %v5698_v7, %s4976_s28 }
 0x17f   : > { %v915_v51 = vpop.permute.xlu1 %914  ;;  %v917_v52 = vpop.permute.xlu0 %916 }
 0x180   : > { %990 = vst.msk [vmem:[#allocation4 + $0xa8] sm:$0xff] %vm968_vm8, %v915_v51  ;;  %991 = vst.msk [vmem:[#allocation4 + $0xb0] sm:$0xff] %vm968_vm8, %v917_v52 }
 0x181   : > { %1096 = vrot.lane.b32.xlu1 %v5844_v50, %s4976_s28  ;;  %1197 = vrot.lane.b32.xlu0 %v5204_v24, %s4977_s29 }
 0x183   : > { %v919_v18 = vpop.permute.xlu1 %918  ;;  %v921_v53 = vpop.permute.xlu0 %920 }
 0x184   : > { %992 = vst.msk [vmem:[#allocation4 + $0xb8] sm:$0xff] %vm968_vm8, %v919_v18  ;;  %993 = vst.msk [vmem:[#allocation4 + $0xc0] sm:$0xff] %vm968_vm8, %v921_v53 }
 0x185   : > { %1199 = vrot.lane.b32.xlu1 %v5206_v25, %s4977_s29  ;;  %1201 = vrot.lane.b32.xlu0 %v4927_v55, %s4977_s29 }
 0x187   : > { %v923_v8 = vpop.permute.xlu1 %922  ;;  %v925_v9 = vpop.permute.xlu0 %924 }
 0x188   : > { %994 = vst.msk [vmem:[#allocation4 + $0xc8] sm:$0xff] %vm968_vm8, %v923_v8  ;;  %995 = vst.msk [vmem:[#allocation4 + $0xd0] sm:$0xff] %vm968_vm8, %v925_v9 }
 0x189   : > { %1203 = vrot.lane.b32.xlu1 %v5217_v26, %s4977_s29  ;;  %1205 = vrot.lane.b32.xlu0 %v5219_v27, %s4977_s29 }
 0x18b   : > { %v927_v24 = vpop.permute.xlu1 %926  ;;  %v929_v25 = vpop.permute.xlu0 %928 }
 0x18c   : > { %996 = vst.msk [vmem:[#allocation4 + $0xd8] sm:$0xff] %vm968_vm8, %v927_v24  ;;  %997 = vst.msk [vmem:[#allocation4 + $0xe0] sm:$0xff] %vm968_vm8, %v929_v25 }
 0x18d   : > { %1207 = vrot.lane.b32.xlu1 %v5277_v41, %s4977_s29  ;;  %1209 = vrot.lane.b32.xlu0 %v5227_v29, %s4977_s29 }
 0x18f   : > { %v931_v19 = vpop.permute.xlu1 %930  ;;  %v933_v20 = vpop.permute.xlu0 %932 }
 0x190   : > { %998 = vst.msk [vmem:[#allocation4 + $0xe8] sm:$0xff] %vm968_vm8, %v931_v19  ;;  %999 = vst.msk [vmem:[#allocation4 + $0xf0] sm:$0xff] %vm968_vm8, %v933_v20  ;;  %v5965_v20 = vld [vmem:[#allocation2 + $0x148] sm:$0x3] }
 0x191   : > { %1211 = vrot.lane.b32.xlu1 %v5229_v30, %s4977_s29  ;;  %1213 = vrot.lane.b32.xlu0 %v5324_v56, %s4977_s29 }
 0x193   : > { %v935_v21 = vpop.permute.xlu1 %934  ;;  %v1003_v41 = vpop.permute.xlu0 %1002 }
 0x194   : > { %1000 = vst.msk [vmem:[#allocation4 + $0xf8] sm:$0xff] %vm968_vm8, %v935_v21  ;;  %vm2380_vm8 = vcmask 64512  }
 0x195   : > { %1215 = vrot.lane.b32.xlu1 %v5237_v31, %s4977_s29  ;;  %1147 = vst.msk [vmem:[#allocation4 - $0x1] sm:$0xfe] %vm1146_vm9, %v1003_v41  ;;  %1217 = vrot.lane.b32.xlu0 %v5239_v32, %s4977_s29 }
 0x196   : > { %2386 = vst.msk [vmem:[#allocation3 + $0x20] sm:$0xff] %vm2380_vm8, %v4972_v0  ;;  %2381 = vst.msk [vmem:[#allocation3] sm:$0xff] %vm2380_vm8, %v4972_v0 }
 0x197   : > { %v1005_v22 = vpop.permute.xlu1 %1004  ;;  %v1007_v23 = vpop.permute.xlu0 %1006  ;;  %2382 = vst.msk [vmem:[#allocation3 + $0x8] sm:$0xff] %vm2380_vm8, %v4972_v0  ;;  %2385 = vst.msk [vmem:[#allocation3 + $0x18] sm:$0xff] %vm2380_vm8, %v4972_v0 }
 0x198   : > { %1149 = vst.msk [vmem:[#allocation4 + $0x7] sm:$0xff] %vm1148_vm10, %v1005_v22 }
 0x199   : > { %1219 = vrot.lane.b32.xlu1 %v5345_v61, %s4977_s29  ;;  %1151 = vst.msk [vmem:[#allocation4 + $0xf] sm:$0x1] %vm1150_vm11, %v1007_v23  ;;  %1221 = vrot.lane.b32.xlu0 %v5245_v33, %s4977_s29  ;;  %v5976_v23 = vld [vmem:[#allocation2 + $0x160] sm:$0x3] }
 0x19a   : > { %2388 = vst.msk [vmem:[#allocation3 + $0x30] sm:$0xff] %vm2380_vm8, %v4972_v0  ;;  %2389 = vst.msk [vmem:[#allocation3 + $0x38] sm:$0xff] %vm2380_vm8, %v4972_v0 }
 0x19b   : > { %v1009_v56 = vpop.permute.xlu1 %1008  ;;  %v1011_v46 = vpop.permute.xlu0 %1010  ;;  %2391 = vst.msk [vmem:[#allocation3 + $0x48] sm:$0xff] %vm2380_vm8, %v4972_v0  ;;  %2392 = vst.msk [vmem:[#allocation3 + $0x50] sm:$0xff] %vm2380_vm8, %v4972_v0 }
 0x19c   : > { %1152 = vst.msk [vmem:[#allocation4 + $0xf] sm:$0xfe] %vm1146_vm9, %v1009_v56 }
 0x19d   : > { %1223 = vrot.lane.b32.xlu1 %v5247_v34, %s4977_s29  ;;  %1153 = vst.msk [vmem:[#allocation4 + $0x17] sm:$0xff] %vm1148_vm10, %v1011_v46  ;;  %1225 = vrot.lane.b32.xlu0 %v5381_v5, %s4977_s29 }
 0x19e   : > { %2394 = vst.msk [vmem:[#allocation3 + $0x60] sm:$0xff] %vm2380_vm8, %v4972_v0  ;;  %2395 = vst.msk [vmem:[#allocation3 + $0x68] sm:$0xff] %vm2380_vm8, %v4972_v0 }
 0x19f   : > { %v1013_v28 = vpop.permute.xlu1 %1012  ;;  %v1015_v61 = vpop.permute.xlu0 %1014  ;;  %2397 = vst.msk [vmem:[#allocation3 + $0x78] sm:$0xff] %vm2380_vm8, %v4972_v0  ;;  %2398 = vst.msk [vmem:[#allocation3 + $0x80] sm:$0xff] %vm2380_vm8, %v4972_v0 }
 0x1a0   : > { %1154 = vst.msk [vmem:[#allocation4 + $0x1f] sm:$0x1] %vm1150_vm11, %v1013_v28  ;;  %v5987_v28 = vld [vmem:[#allocation2 + $0x178] sm:$0x3] }
 0x1a1   : > { %1227 = vrot.lane.b32.xlu1 %v5255_v35, %s4977_s29  ;;  %1155 = vst.msk [vmem:[#allocation4 + $0x1f] sm:$0xfe] %vm1146_vm9, %v1015_v61  ;;  %1229 = vrot.lane.b32.xlu0 %v5257_v36, %s4977_s29 }
 0x1a2   : > { %2400 = vst.msk [vmem:[#allocation3 + $0x90] sm:$0xff] %vm2380_vm8, %v4972_v0  ;;  %2401 = vst.msk [vmem:[#allocation3 + $0x98] sm:$0xff] %vm2380_vm8, %v4972_v0 }
 0x1a3   : > { %v1017_v47 = vpop.permute.xlu1 %1016  ;;  %v1019_v16 = vpop.permute.xlu0 %1018  ;;  %2403 = vst.msk [vmem:[#allocation3 + $0xa8] sm:$0xff] %vm2380_vm8, %v4972_v0  ;;  %2404 = vst.msk [vmem:[#allocation3 + $0xb0] sm:$0xff] %vm2380_vm8, %v4972_v0 }
 0x1a4   : > { %1156 = vst.msk [vmem:[#allocation4 + $0x27] sm:$0xff] %vm1148_vm10, %v1017_v47 }
 0x1a5   : > { %1231 = vrot.lane.b32.xlu1 %v5389_v6, %s4977_s29  ;;  %1157 = vst.msk [vmem:[#allocation4 + $0x2f] sm:$0x1] %vm1150_vm11, %v1019_v16  ;;  %1233 = vrot.lane.b32.xlu0 %v5263_v37, %s4977_s29 }
 0x1a6   : > { %2406 = vst.msk [vmem:[#allocation3 + $0xc0] sm:$0xff] %vm2380_vm8, %v4972_v0  ;;  %2407 = vst.msk [vmem:[#allocation3 + $0xc8] sm:$0xff] %vm2380_vm8, %v4972_v0 }
 0x1a7   : > { %v1021_v5 = vpop.permute.xlu1 %1020  ;;  %v1023_v48 = vpop.permute.xlu0 %1022  ;;  %2409 = vst.msk [vmem:[#allocation3 + $0xd8] sm:$0xff] %vm2380_vm8, %v4972_v0  ;;  %2410 = vst.msk [vmem:[#allocation3 + $0xe0] sm:$0xff] %vm2380_vm8, %v4972_v0 }
 0x1a8   : > { %1158 = vst.msk [vmem:[#allocation4 + $0x2f] sm:$0xfe] %vm1146_vm9, %v1021_v5 }
 0x1a9   : > { %1235 = vrot.lane.b32.xlu1 %v5265_v38, %s4977_s29  ;;  %1159 = vst.msk [vmem:[#allocation4 + $0x37] sm:$0xff] %vm1148_vm10, %v1023_v48  ;;  %1237 = vrot.lane.b32.xlu0 %v5397_v10, %s4977_s29 }
 0x1aa   : > { %2412 = vst.msk [vmem:[#allocation3 + $0xf0] sm:$0xff] %vm2380_vm8, %v4972_v0  ;;  %2413 = vst.msk [vmem:[#allocation3 + $0xf8] sm:$0xff] %vm2380_vm8, %v4972_v0 }
 0x1ab   : > { %v1025_v49 = vpop.permute.xlu1 %1024  ;;  %v1027_v6 = vpop.permute.xlu0 %1026  ;;  %2415 = vst.msk [vmem:[#allocation3 + $0x108] sm:$0xff] %vm2380_vm8, %v4972_v0  ;;  %2416 = vst.msk [vmem:[#allocation3 + $0x110] sm:$0xff] %vm2380_vm8, %v4972_v0 }
 0x1ac   : > { %1160 = vst.msk [vmem:[#allocation4 + $0x3f] sm:$0x1] %vm1150_vm11, %v1025_v49 }
 0x1ad   : > { %1239 = vrot.lane.b32.xlu1 %v5273_v39, %s4977_s29  ;;  %1161 = vst.msk [vmem:[#allocation4 + $0x3f] sm:$0xfe] %vm1146_vm9, %v1027_v6  ;;  %1241 = vrot.lane.b32.xlu0 %v5275_v40, %s4977_s29 }
 0x1ae   : > { %2418 = vst.msk [vmem:[#allocation3 + $0x120] sm:$0xff] %vm2380_vm8, %v4972_v0  ;;  %2419 = vst.msk [vmem:[#allocation3 + $0x128] sm:$0xff] %vm2380_vm8, %v4972_v0 }
 0x1af   : > { %v1029_v17 = vpop.permute.xlu1 %1028  ;;  %v1031_v51 = vpop.permute.xlu0 %1030  ;;  %2421 = vst.msk [vmem:[#allocation3 + $0x138] sm:$0xff] %vm2380_vm8, %v4972_v0  ;;  %2422 = vst.msk [vmem:[#allocation3 + $0x140] sm:$0xff] %vm2380_vm8, %v4972_v0 }
 0x1b0   : > { %1162 = vst.msk [vmem:[#allocation4 + $0x47] sm:$0xff] %vm1148_vm10, %v1029_v17 }
 0x1b1   : > { %1243 = vrot.lane.b32.xlu1 %v5405_v11, %s4977_s29  ;;  %1163 = vst.msk [vmem:[#allocation4 + $0x4f] sm:$0x1] %vm1150_vm11, %v1031_v51  ;;  %1245 = vrot.lane.b32.xlu0 %v5283_v42, %s4977_s29 }
 0x1b2   : > { %2424 = vst.msk [vmem:[#allocation3 + $0x150] sm:$0xff] %vm2380_vm8, %v4972_v0  ;;  %2425 = vst.msk [vmem:[#allocation3 + $0x158] sm:$0xff] %vm2380_vm8, %v4972_v0 }
 0x1b3   : > { %v1033_v10 = vpop.permute.xlu1 %1032  ;;  %v1035_v52 = vpop.permute.xlu0 %1034  ;;  %2427 = vst.msk [vmem:[#allocation3 + $0x168] sm:$0xff] %vm2380_vm8, %v4972_v0  ;;  %2428 = vst.msk [vmem:[#allocation3 + $0x170] sm:$0xff] %vm2380_vm8, %v4972_v0 }
 0x1b4   : > { %1164 = vst.msk [vmem:[#allocation4 + $0x4f] sm:$0xfe] %vm1146_vm9, %v1033_v10 }
 0x1b5   : > { %1247 = vrot.lane.b32.xlu1 %v5285_v43, %s4977_s29  ;;  %1165 = vst.msk [vmem:[#allocation4 + $0x57] sm:$0xff] %vm1148_vm10, %v1035_v52  ;;  %1249 = vrot.lane.b32.xlu0 %v5413_v12, %s4977_s29 }
 0x1b6   : > { %2430 = vst.msk [vmem:[#allocation3 + $0x180] sm:$0xff] %vm2380_vm8, %v4972_v0  ;;  %2431 = vst.msk [vmem:[#allocation3 + $0x188] sm:$0xff] %vm2380_vm8, %v4972_v0 }
 0x1b7   : > { %v1037_v18 = vpop.permute.xlu1 %1036  ;;  %v1039_v11 = vpop.permute.xlu0 %1038  ;;  %2433 = vst.msk [vmem:[#allocation3 + $0x198] sm:$0xff] %vm2380_vm8, %v4972_v0  ;;  %2434 = vst.msk [vmem:[#allocation3 + $0x1a0] sm:$0xff] %vm2380_vm8, %v4972_v0 }
 0x1b8   : > { %1166 = vst.msk [vmem:[#allocation4 + $0x5f] sm:$0x1] %vm1150_vm11, %v1037_v18 }
 0x1b9   : > { %1251 = vrot.lane.b32.xlu1 %v5293_v44, %s4977_s29  ;;  %1167 = vst.msk [vmem:[#allocation4 + $0x5f] sm:$0xfe] %vm1146_vm9, %v1039_v11  ;;  %1253 = vrot.lane.b32.xlu0 %v5295_v45, %s4977_s29 }
 0x1bb   : > { %v1041_v53 = vpop.permute.xlu1 %1040  ;;  %v1043_v55 = vpop.permute.xlu0 %1042 }
 0x1bc   : > { %1168 = vst.msk [vmem:[#allocation4 + $0x67] sm:$0xff] %vm1148_vm10, %v1041_v53 }
 0x1bd   : > { %1255 = vrot.lane.b32.xlu1 %v5421_v13, %s4977_s29  ;;  %1169 = vst.msk [vmem:[#allocation4 + $0x6f] sm:$0x1] %vm1150_vm11, %v1043_v55  ;;  %1257 = vrot.lane.b32.xlu0 %v5331_v57, %s4977_s29 }
 0x1bf   : > { %v1045_v12 = vpop.permute.xlu1 %1044  ;;  %v1047_v8 = vpop.permute.xlu0 %1046 }
 0x1c0   : > { %1170 = vst.msk [vmem:[#allocation4 + $0x6f] sm:$0xfe] %vm1146_vm9, %v1045_v12 }
 0x1c1   : > { %1259 = vrot.lane.b32.xlu1 %v5333_v58, %s4977_s29  ;;  %1171 = vst.msk [vmem:[#allocation4 + $0x77] sm:$0xff] %vm1148_vm10, %v1047_v8  ;;  %1261 = vrot.lane.b32.xlu0 %v5429_v14, %s4977_s29 }
 0x1c3   : > { %v1049_v9 = vpop.permute.xlu1 %1048  ;;  %v1051_v13 = vpop.permute.xlu0 %1050 }
 0x1c4   : > { %1172 = vst.msk [vmem:[#allocation4 + $0x7f] sm:$0x1] %vm1150_vm11, %v1049_v9 }
 0x1c5   : > { %1263 = vrot.lane.b32.xlu1 %v5341_v59, %s4977_s29  ;;  %1173 = vst.msk [vmem:[#allocation4 + $0x7f] sm:$0xfe] %vm1146_vm9, %v1051_v13  ;;  %1265 = vrot.lane.b32.xlu0 %v5343_v60, %s4977_s29 }
 0x1c7   : > { %v1053_v24 = vpop.permute.xlu1 %1052  ;;  %v1055_v25 = vpop.permute.xlu0 %1054 }
 0x1c8   : > { %1174 = vst.msk [vmem:[#allocation4 + $0x87] sm:$0xff] %vm1148_vm10, %v1053_v24 }
 0x1c9   : > { %1267 = vrot.lane.b32.xlu1 %v5437_v15, %s4977_s29  ;;  %1175 = vst.msk [vmem:[#allocation4 + $0x8f] sm:$0x1] %vm1150_vm11, %v1055_v25  ;;  %1269 = vrot.lane.b32.xlu0 %v5351_v62, %s4977_s29 }
 0x1cb   : > { %v1057_v14 = vpop.permute.xlu1 %1056  ;;  %v1059_v19 = vpop.permute.xlu0 %1058 }
 0x1cc   : > { %1176 = vst.msk [vmem:[#allocation4 + $0x8f] sm:$0xfe] %vm1146_vm9, %v1057_v14 }
 0x1cd   : > { %1271 = vrot.lane.b32.xlu1 %v5353_v63, %s4977_s29  ;;  %1177 = vst.msk [vmem:[#allocation4 + $0x97] sm:$0xff] %vm1148_vm10, %v1059_v19  ;;  %1273 = vrot.lane.b32.xlu0 %v5965_v20, %s4977_s29 }
 0x1cf   : > { %v1061_v15 = vpop.permute.xlu1 %1060  ;;  %v1063_v21 = vpop.permute.xlu0 %1062 }
 0x1d0   : > { %1178 = vst.msk [vmem:[#allocation4 + $0x9f] sm:$0x1] %vm1150_vm11, %v1061_v15 }
 0x1d1   : > { %1275 = vrot.lane.b32.xlu1 %v5361_v1, %s4977_s29  ;;  %1179 = vst.msk [vmem:[#allocation4 + $0x9f] sm:$0xfe] %vm1146_vm9, %v1063_v21  ;;  %1277 = vrot.lane.b32.xlu0 %v5363_v2, %s4977_s29 }
 0x1d3   : > { %v1065_v41 = vpop.permute.xlu1 %1064  ;;  %v1067_v22 = vpop.permute.xlu0 %1066 }
 0x1d4   : > { %1180 = vst.msk [vmem:[#allocation4 + $0xa7] sm:$0xff] %vm1148_vm10, %v1065_v41 }
 0x1d5   : > { %1279 = vrot.lane.b32.xlu1 %v5976_v23, %s4977_s29  ;;  %1181 = vst.msk [vmem:[#allocation4 + $0xaf] sm:$0x1] %vm1150_vm11, %v1067_v22  ;;  %1281 = vrot.lane.b32.xlu0 %v5369_v3, %s4977_s29 }
 0x1d7   : > { %v1069_v56 = vpop.permute.xlu1 %1068  ;;  %v1071_v46 = vpop.permute.xlu0 %1070 }
 0x1d8   : > { %1182 = vst.msk [vmem:[#allocation4 + $0xaf] sm:$0xfe] %vm1146_vm9, %v1069_v56 }
 0x1d9   : > { %1283 = vrot.lane.b32.xlu1 %v5371_v4, %s4977_s29  ;;  %1183 = vst.msk [vmem:[#allocation4 + $0xb7] sm:$0xff] %vm1148_vm10, %v1071_v46  ;;  %1285 = vrot.lane.b32.xlu0 %v5987_v28, %s4977_s29 }
 0x1db   : > { %v1073_v61 = vpop.permute.xlu1 %1072  ;;  %v1075_v47 = vpop.permute.xlu0 %1074 }
 0x1dc   : > { %1184 = vst.msk [vmem:[#allocation4 + $0xbf] sm:$0x1] %vm1150_vm11, %v1073_v61 }
 0x1dd   : > { %1287 = vrot.lane.b32.xlu1 %v5693_v54, %s4977_s29  ;;  %1185 = vst.msk [vmem:[#allocation4 + $0xbf] sm:$0xfe] %vm1146_vm9, %v1075_v47  ;;  %1289 = vrot.lane.b32.xlu0 %v5698_v7, %s4977_s29 }
 0x1df   : > { %v1077_v16 = vpop.permute.xlu1 %1076  ;;  %v1079_v5 = vpop.permute.xlu0 %1078 }
 0x1e0   : > { %1186 = vst.msk [vmem:[#allocation4 + $0xc7] sm:$0xff] %vm1148_vm10, %v1077_v16 }
 0x1e1   : > { %1291 = vrot.lane.b32.xlu1 %v5844_v50, %s4977_s29  ;;  %1187 = vst.msk [vmem:[#allocation4 + $0xcf] sm:$0x1] %vm1150_vm11, %v1079_v5  ;;  %1394 = vrot.lane.b32.xlu0 %v5217_v26, %s4978_s30 }
 0x1e3   : > { %v1081_v48 = vpop.permute.xlu1 %1080  ;;  %v1083_v49 = vpop.permute.xlu0 %1082 }
 0x1e4   : > { %1188 = vst.msk [vmem:[#allocation4 + $0xcf] sm:$0xfe] %vm1146_vm9, %v1081_v48  ;;  %v6088_v48 = vld [vmem:[#allocation2 + $0x198] sm:$0xff] }
 0x1e5   : > { %1396 = vrot.lane.b32.xlu1 %v5219_v27, %s4978_s30  ;;  %1189 = vst.msk [vmem:[#allocation4 + $0xd7] sm:$0xff] %vm1148_vm10, %v1083_v49  ;;  %1398 = vrot.lane.b32.xlu0 %v5227_v29, %s4978_s30 }
 0x1e7   : > { %v1085_v6 = vpop.permute.xlu1 %1084  ;;  %v1087_v17 = vpop.permute.xlu0 %1086 }
 0x1e8   : > { %1190 = vst.msk [vmem:[#allocation4 + $0xdf] sm:$0x1] %vm1150_vm11, %v1085_v6  ;;  %v6093_v6 = vld [vmem:[#allocation2 + $0x1a0] sm:$0xff] }
 0x1e9   : > { %1400 = vrot.lane.b32.xlu1 %v5229_v30, %s4978_s30  ;;  %1191 = vst.msk [vmem:[#allocation4 + $0xdf] sm:$0xfe] %vm1146_vm9, %v1087_v17  ;;  %1402 = vrot.lane.b32.xlu0 %v5237_v31, %s4978_s30 }
 0x1eb   : > { %v1089_v51 = vpop.permute.xlu1 %1088  ;;  %v1091_v10 = vpop.permute.xlu0 %1090 }
 0x1ec   : > { %1192 = vst.msk [vmem:[#allocation4 + $0xe7] sm:$0xff] %vm1148_vm10, %v1089_v51 }
 0x1ed   : > { %1404 = vrot.lane.b32.xlu1 %v5239_v32, %s4978_s30  ;;  %1193 = vst.msk [vmem:[#allocation4 + $0xef] sm:$0x1] %vm1150_vm11, %v1091_v10  ;;  %1406 = vrot.lane.b32.xlu0 %v5245_v33, %s4978_s30  ;;  %v6107_v10 = vld [vmem:[#allocation2 + $0x40] sm:$0x3] }
 0x1ef   : > { %v1093_v52 = vpop.permute.xlu1 %1092  ;;  %v1095_v18 = vpop.permute.xlu0 %1094 }
 0x1f0   : > { %1194 = vst.msk [vmem:[#allocation4 + $0xef] sm:$0xfe] %vm1146_vm9, %v1093_v52  ;;  %vm2383_vm9 = vcmask 58368  }
 0x1f1   : > { %1408 = vrot.lane.b32.xlu1 %v5247_v34, %s4978_s30  ;;  %1195 = vst.msk [vmem:[#allocation4 + $0xf7] sm:$0xff] %vm1148_vm10, %v1095_v18  ;;  %1410 = vrot.lane.b32.xlu0 %v5255_v35, %s4978_s30  ;;  %vm2747_vm10 = vcmask 130113  }
 0x1f2   : > { %2387 = vst.msk [vmem:[#allocation3 + $0x28] sm:$0x3] %vm2383_vm9, %v4972_v0  ;;  %2384 = vst.msk [vmem:[#allocation3 + $0x10] sm:$0x3] %vm2383_vm9, %v4972_v0 }
 0x1f3   : > { %v1097_v11 = vpop.permute.xlu1 %1096  ;;  %v1198_v53 = vpop.permute.xlu0 %1197  ;;  %2390 = vst.msk [vmem:[#allocation3 + $0x40] sm:$0x3] %vm2383_vm9, %v4972_v0  ;;  %2393 = vst.msk [vmem:[#allocation3 + $0x58] sm:$0x3] %vm2383_vm9, %v4972_v0 }
 0x1f4   : > { %1196 = vst.msk [vmem:[#allocation4 + $0xff] sm:$0x1] %vm1150_vm11, %v1097_v11  ;;  %vm2751_vm11 = vcmask 122944  }
 0x1f5   : > { %1412 = vrot.lane.b32.xlu1 %v5257_v36, %s4978_s30  ;;  %1342 = vst.msk [vmem:[#allocation4 - $0x2] sm:$0xfc] %vm1341_vm12, %v1198_v53  ;;  %1414 = vrot.lane.b32.xlu0 %v5263_v37, %s4978_s30 }
 0x1f6   : > { %2396 = vst.msk [vmem:[#allocation3 + $0x70] sm:$0x3] %vm2383_vm9, %v4972_v0  ;;  %2399 = vst.msk [vmem:[#allocation3 + $0x88] sm:$0x3] %vm2383_vm9, %v4972_v0 }
 0x1f7   : > { %v1200_v55 = vpop.permute.xlu1 %1199  ;;  %v1202_v12 = vpop.permute.xlu0 %1201  ;;  %2402 = vst.msk [vmem:[#allocation3 + $0xa0] sm:$0x3] %vm2383_vm9, %v4972_v0  ;;  %2405 = vst.msk [vmem:[#allocation3 + $0xb8] sm:$0x3] %vm2383_vm9, %v4972_v0 }
 0x1f8   : > { %1344 = vst.msk [vmem:[#allocation4 + $0x6] sm:$0xff] %vm1343_vm13, %v1200_v55  ;;  %v6118_v55 = vld [vmem:[#allocation2 + $0x58] sm:$0x3] }
 0x1f9   : > { %1416 = vrot.lane.b32.xlu1 %v5265_v38, %s4978_s30  ;;  %1346 = vst.msk [vmem:[#allocation4 + $0xe] sm:$0x3] %vm1345_vm14, %v1202_v12  ;;  %1418 = vrot.lane.b32.xlu0 %v5273_v39, %s4978_s30 }
 0x1fa   : > { %2408 = vst.msk [vmem:[#allocation3 + $0xd0] sm:$0x3] %vm2383_vm9, %v4972_v0  ;;  %2411 = vst.msk [vmem:[#allocation3 + $0xe8] sm:$0x3] %vm2383_vm9, %v4972_v0 }
 0x1fb   : > { %v1204_v8 = vpop.permute.xlu1 %1203  ;;  %v1206_v9 = vpop.permute.xlu0 %1205  ;;  %2414 = vst.msk [vmem:[#allocation3 + $0x100] sm:$0x3] %vm2383_vm9, %v4972_v0  ;;  %2417 = vst.msk [vmem:[#allocation3 + $0x118] sm:$0x3] %vm2383_vm9, %v4972_v0 }
 0x1fc   : > { %1347 = vst.msk [vmem:[#allocation4 + $0xe] sm:$0xfc] %vm1341_vm12, %v1204_v8 }
 0x1fd   : > { %1420 = vrot.lane.b32.xlu1 %v5275_v40, %s4978_s30  ;;  %1348 = vst.msk [vmem:[#allocation4 + $0x16] sm:$0xff] %vm1343_vm13, %v1206_v9  ;;  %1422 = vrot.lane.b32.xlu0 %v5283_v42, %s4978_s30  ;;  %v6129_v9 = vld [vmem:[#allocation2 + $0x70] sm:$0x3] }
 0x1fe   : > { %2420 = vst.msk [vmem:[#allocation3 + $0x130] sm:$0x3] %vm2383_vm9, %v4972_v0  ;;  %2423 = vst.msk [vmem:[#allocation3 + $0x148] sm:$0x3] %vm2383_vm9, %v4972_v0 }
 0x1ff   : > { %v1208_v13 = vpop.permute.xlu1 %1207  ;;  %v1210_v24 = vpop.permute.xlu0 %1209  ;;  %2426 = vst.msk [vmem:[#allocation3 + $0x160] sm:$0x3] %vm2383_vm9, %v4972_v0  ;;  %2429 = vst.msk [vmem:[#allocation3 + $0x178] sm:$0x3] %vm2383_vm9, %v4972_v0 }
 0x200   : > { %1349 = vst.msk [vmem:[#allocation4 + $0x1e] sm:$0x3] %vm1345_vm14, %v1208_v13 }
 0x201   : > { %1424 = vrot.lane.b32.xlu1 %v5285_v43, %s4978_s30  ;;  %1350 = vst.msk [vmem:[#allocation4 + $0x1e] sm:$0xfc] %vm1341_vm12, %v1210_v24  ;;  %1426 = vrot.lane.b32.xlu0 %v5293_v44, %s4978_s30 }
 0x202   : > { %2432 = vst.msk [vmem:[#allocation3 + $0x190] sm:$0x3] %vm2383_vm9, %v4972_v0  ;;  %2435 = vst.msk [vmem:[#allocation3 + $0x1a8] sm:$0x3] %vm2383_vm9, %v4972_v0 }
 0x203   : > { %v1212_v25 = vpop.permute.xlu1 %1211  ;;  %v1214_v14 = vpop.permute.xlu0 %1213 }
 0x204   : > { %1351 = vst.msk [vmem:[#allocation4 + $0x26] sm:$0xff] %vm1343_vm13, %v1212_v25 }
 0x205   : > { %1428 = vrot.lane.b32.xlu1 %v5295_v45, %s4978_s30  ;;  %1352 = vst.msk [vmem:[#allocation4 + $0x2e] sm:$0x3] %vm1345_vm14, %v1214_v14  ;;  %1430 = vrot.lane.b32.xlu0 %v5331_v57, %s4978_s30 }
 0x207   : > { %v1216_v19 = vpop.permute.xlu1 %1215  ;;  %v1218_v15 = vpop.permute.xlu0 %1217 }
 0x208   : > { %1353 = vst.msk [vmem:[#allocation4 + $0x2e] sm:$0xfc] %vm1341_vm12, %v1216_v19  ;;  %v6140_v19 = vld [vmem:[#allocation2 + $0x88] sm:$0x3] }
 0x209   : > { %1432 = vrot.lane.b32.xlu1 %v5333_v58, %s4978_s30  ;;  %1354 = vst.msk [vmem:[#allocation4 + $0x36] sm:$0xff] %vm1343_vm13, %v1218_v15  ;;  %1434 = vrot.lane.b32.xlu0 %v5341_v59, %s4978_s30 }
 0x20b   : > { %v1220_v21 = vpop.permute.xlu1 %1219  ;;  %v1222_v41 = vpop.permute.xlu0 %1221 }
 0x20c   : > { %1355 = vst.msk [vmem:[#allocation4 + $0x3e] sm:$0x3] %vm1345_vm14, %v1220_v21 }
 0x20d   : > { %1436 = vrot.lane.b32.xlu1 %v5343_v60, %s4978_s30  ;;  %1356 = vst.msk [vmem:[#allocation4 + $0x3e] sm:$0xfc] %vm1341_vm12, %v1222_v41  ;;  %1438 = vrot.lane.b32.xlu0 %v5351_v62, %s4978_s30  ;;  %v6151_v41 = vld [vmem:[#allocation2 + $0xa0] sm:$0x3] }
 0x20f   : > { %v1224_v22 = vpop.permute.xlu1 %1223  ;;  %v1226_v56 = vpop.permute.xlu0 %1225 }
 0x210   : > { %1357 = vst.msk [vmem:[#allocation4 + $0x46] sm:$0xff] %vm1343_vm13, %v1224_v22 }
 0x211   : > { %1440 = vrot.lane.b32.xlu1 %v5353_v63, %s4978_s30  ;;  %1358 = vst.msk [vmem:[#allocation4 + $0x4e] sm:$0x3] %vm1345_vm14, %v1226_v56  ;;  %1442 = vrot.lane.b32.xlu0 %v5361_v1, %s4978_s30 }
 0x213   : > { %v1228_v46 = vpop.permute.xlu1 %1227  ;;  %v1230_v61 = vpop.permute.xlu0 %1229 }
 0x214   : > { %1359 = vst.msk [vmem:[#allocation4 + $0x4e] sm:$0xfc] %vm1341_vm12, %v1228_v46 }
 0x215   : > { %1444 = vrot.lane.b32.xlu1 %v5363_v2, %s4978_s30  ;;  %1360 = vst.msk [vmem:[#allocation4 + $0x56] sm:$0xff] %vm1343_vm13, %v1230_v61  ;;  %1446 = vrot.lane.b32.xlu0 %v5369_v3, %s4978_s30 }
 0x217   : > { %v1232_v47 = vpop.permute.xlu1 %1231  ;;  %v1234_v16 = vpop.permute.xlu0 %1233 }
 0x218   : > { %1361 = vst.msk [vmem:[#allocation4 + $0x5e] sm:$0x3] %vm1345_vm14, %v1232_v47  ;;  %v6162_v47 = vld [vmem:[#allocation2 + $0xb8] sm:$0x3] }
 0x219   : > { %1448 = vrot.lane.b32.xlu1 %v5371_v4, %s4978_s30  ;;  %1362 = vst.msk [vmem:[#allocation4 + $0x5e] sm:$0xfc] %vm1341_vm12, %v1234_v16  ;;  %1450 = vrot.lane.b32.xlu0 %v5693_v54, %s4978_s30 }
 0x21b   : > { %v1236_v5 = vpop.permute.xlu1 %1235  ;;  %v1238_v49 = vpop.permute.xlu0 %1237 }
 0x21c   : > { %1363 = vst.msk [vmem:[#allocation4 + $0x66] sm:$0xff] %vm1343_vm13, %v1236_v5 }
 0x21d   : > { %1452 = vrot.lane.b32.xlu1 %v5698_v7, %s4978_s30  ;;  %1364 = vst.msk [vmem:[#allocation4 + $0x6e] sm:$0x3] %vm1345_vm14, %v1238_v49  ;;  %1454 = vrot.lane.b32.xlu0 %v6088_v48, %s4978_s30  ;;  %v6173_v49 = vld [vmem:[#allocation2 + $0xd0] sm:$0x3] }
 0x21f   : > { %v1240_v17 = vpop.permute.xlu1 %1239  ;;  %v1242_v54 = vpop.permute.xlu0 %1241 }
 0x220   : > { %1365 = vst.msk [vmem:[#allocation4 + $0x6e] sm:$0xfc] %vm1341_vm12, %v1240_v17 }
 0x221   : > { %1456 = vrot.lane.b32.xlu1 %v6093_v6, %s4978_s30  ;;  %1366 = vst.msk [vmem:[#allocation4 + $0x76] sm:$0xff] %vm1343_vm13, %v1242_v54  ;;  %1524 = vrot.lane.b32.xlu0 %v5217_v26, %s4979_s6 }
 0x223   : > { %v1244_v7 = vpop.permute.xlu1 %1243  ;;  %v1246_v51 = vpop.permute.xlu0 %1245 }
 0x224   : > { %1367 = vst.msk [vmem:[#allocation4 + $0x7e] sm:$0x3] %vm1345_vm14, %v1244_v7 }
 0x225   : > { %1526 = vrot.lane.b32.xlu1 %v5219_v27, %s4979_s6  ;;  %1368 = vst.msk [vmem:[#allocation4 + $0x7e] sm:$0xfc] %vm1341_vm12, %v1246_v51  ;;  %1528 = vrot.lane.b32.xlu0 %v6107_v10, %s4979_s6 }
 0x227   : > { %v1248_v52 = vpop.permute.xlu1 %1247  ;;  %v1250_v18 = vpop.permute.xlu0 %1249 }
 0x228   : > { %1369 = vst.msk [vmem:[#allocation4 + $0x86] sm:$0xff] %vm1343_vm13, %v1248_v52  ;;  %v6184_v52 = vld [vmem:[#allocation2 + $0xe8] sm:$0x3] }
 0x229   : > { %1530 = vrot.lane.b32.xlu1 %v5227_v29, %s4979_s6  ;;  %1370 = vst.msk [vmem:[#allocation4 + $0x8e] sm:$0x3] %vm1345_vm14, %v1250_v18  ;;  %1532 = vrot.lane.b32.xlu0 %v5229_v30, %s4979_s6 }
 0x22b   : > { %v1252_v11 = vpop.permute.xlu1 %1251  ;;  %v1254_v53 = vpop.permute.xlu0 %1253 }
 0x22c   : > { %1371 = vst.msk [vmem:[#allocation4 + $0x8e] sm:$0xfc] %vm1341_vm12, %v1252_v11 }
 0x22d   : > { %1534 = vrot.lane.b32.xlu1 %v6118_v55, %s4979_s6  ;;  %1372 = vst.msk [vmem:[#allocation4 + $0x96] sm:$0xff] %vm1343_vm13, %v1254_v53  ;;  %1536 = vrot.lane.b32.xlu0 %v5237_v31, %s4979_s6  ;;  %v6195_v53 = vld [vmem:[#allocation2 + $0x100] sm:$0x3] }
 0x22f   : > { %v1256_v12 = vpop.permute.xlu1 %1255  ;;  %v1258_v8 = vpop.permute.xlu0 %1257 }
 0x230   : > { %1373 = vst.msk [vmem:[#allocation4 + $0x9e] sm:$0x3] %vm1345_vm14, %v1256_v12 }
 0x231   : > { %1538 = vrot.lane.b32.xlu1 %v5239_v32, %s4979_s6  ;;  %1374 = vst.msk [vmem:[#allocation4 + $0x9e] sm:$0xfc] %vm1341_vm12, %v1258_v8  ;;  %1540 = vrot.lane.b32.xlu0 %v6129_v9, %s4979_s6 }
 0x233   : > { %v1260_v13 = vpop.permute.xlu1 %1259  ;;  %v1262_v24 = vpop.permute.xlu0 %1261 }
 0x234   : > { %1375 = vst.msk [vmem:[#allocation4 + $0xa6] sm:$0xff] %vm1343_vm13, %v1260_v13 }
 0x235   : > { %1542 = vrot.lane.b32.xlu1 %v5245_v33, %s4979_s6  ;;  %1376 = vst.msk [vmem:[#allocation4 + $0xae] sm:$0x3] %vm1345_vm14, %v1262_v24  ;;  %1544 = vrot.lane.b32.xlu0 %v5247_v34, %s4979_s6 }
 0x237   : > { %v1264_v25 = vpop.permute.xlu1 %1263  ;;  %v1266_v14 = vpop.permute.xlu0 %1265 }
 0x238   : > { %1377 = vst.msk [vmem:[#allocation4 + $0xae] sm:$0xfc] %vm1341_vm12, %v1264_v25  ;;  %v6206_v25 = vld [vmem:[#allocation2 + $0x118] sm:$0x3] }
 0x239   : > { %1546 = vrot.lane.b32.xlu1 %v6140_v19, %s4979_s6  ;;  %1378 = vst.msk [vmem:[#allocation4 + $0xb6] sm:$0xff] %vm1343_vm13, %v1266_v14  ;;  %1548 = vrot.lane.b32.xlu0 %v5255_v35, %s4979_s6 }
 0x23b   : > { %v1268_v15 = vpop.permute.xlu1 %1267  ;;  %v1270_v21 = vpop.permute.xlu0 %1269 }
 0x23c   : > { %1379 = vst.msk [vmem:[#allocation4 + $0xbe] sm:$0x3] %vm1345_vm14, %v1268_v15 }
 0x23d   : > { %1550 = vrot.lane.b32.xlu1 %v5257_v36, %s4979_s6  ;;  %1380 = vst.msk [vmem:[#allocation4 + $0xbe] sm:$0xfc] %vm1341_vm12, %v1270_v21  ;;  %1552 = vrot.lane.b32.xlu0 %v6151_v41, %s4979_s6  ;;  %v6217_v21 = vld [vmem:[#allocation2 + $0x130] sm:$0x3] }
 0x23f   : > { %v1272_v22 = vpop.permute.xlu1 %1271  ;;  %v1274_v56 = vpop.permute.xlu0 %1273 }
 0x240   : > { %1381 = vst.msk [vmem:[#allocation4 + $0xc6] sm:$0xff] %vm1343_vm13, %v1272_v22 }
 0x241   : > { %1554 = vrot.lane.b32.xlu1 %v5263_v37, %s4979_s6  ;;  %1382 = vst.msk [vmem:[#allocation4 + $0xce] sm:$0x3] %vm1345_vm14, %v1274_v56  ;;  %1556 = vrot.lane.b32.xlu0 %v5265_v38, %s4979_s6 }
 0x243   : > { %v1276_v46 = vpop.permute.xlu1 %1275  ;;  %v1278_v61 = vpop.permute.xlu0 %1277 }
 0x244   : > { %1383 = vst.msk [vmem:[#allocation4 + $0xce] sm:$0xfc] %vm1341_vm12, %v1276_v46 }
 0x245   : > { %1558 = vrot.lane.b32.xlu1 %v6162_v47, %s4979_s6  ;;  %1384 = vst.msk [vmem:[#allocation4 + $0xd6] sm:$0xff] %vm1343_vm13, %v1278_v61  ;;  %1560 = vrot.lane.b32.xlu0 %v5273_v39, %s4979_s6 }
 0x247   : > { %v1280_v16 = vpop.permute.xlu1 %1279  ;;  %v1282_v5 = vpop.permute.xlu0 %1281 }
 0x248   : > { %1385 = vst.msk [vmem:[#allocation4 + $0xde] sm:$0x3] %vm1345_vm14, %v1280_v16 }
 0x249   : > { %1562 = vrot.lane.b32.xlu1 %v5275_v40, %s4979_s6  ;;  %1386 = vst.msk [vmem:[#allocation4 + $0xde] sm:$0xfc] %vm1341_vm12, %v1282_v5  ;;  %1564 = vrot.lane.b32.xlu0 %v6173_v49, %s4979_s6 }
 0x24b   : > { %v1284_v17 = vpop.permute.xlu1 %1283  ;;  %v1286_v54 = vpop.permute.xlu0 %1285 }
 0x24c   : > { %1387 = vst.msk [vmem:[#allocation4 + $0xe6] sm:$0xff] %vm1343_vm13, %v1284_v17 }
 0x24d   : > { %1566 = vrot.lane.b32.xlu1 %v5283_v42, %s4979_s6  ;;  %1388 = vst.msk [vmem:[#allocation4 + $0xee] sm:$0x3] %vm1345_vm14, %v1286_v54  ;;  %1568 = vrot.lane.b32.xlu0 %v5285_v43, %s4979_s6 }
 0x24f   : > { %v1288_v7 = vpop.permute.xlu1 %1287  ;;  %v1290_v51 = vpop.permute.xlu0 %1289 }
 0x250   : > { %1389 = vst.msk [vmem:[#allocation4 + $0xee] sm:$0xfc] %vm1341_vm12, %v1288_v7  ;;  %vm2749_vm12 = vcmask 130112  }
 0x251   : > { %1570 = vrot.lane.b32.xlu1 %v6184_v52, %s4979_s6  ;;  %1390 = vst.msk [vmem:[#allocation4 + $0xf6] sm:$0xff] %vm1343_vm13, %v1290_v51  ;;  %1572 = vrot.lane.b32.xlu0 %v5293_v44, %s4979_s6 }
 0x253   : > { %v1292_v18 = vpop.permute.xlu1 %1291  ;;  %v1395_v11 = vpop.permute.xlu0 %1394 }
 0x254   : > { %1391 = vst.msk [vmem:[#allocation4 + $0xfe] sm:$0x3] %vm1345_vm14, %v1292_v18  ;;  %v1946_v18 = vld [vmem:[%s8025_s1] sm:$0xff] }
 0x255   : > { %1574 = vrot.lane.b32.xlu1 %v5295_v45, %s4979_s6  ;;  %1491 = vst.msk [vmem:[#allocation4] sm:$0xff] %vm1490_vm15, %v1395_v11  ;;  %1576 = vrot.lane.b32.xlu0 %v6195_v53, %s4979_s6  ;;  %v1947_v11 = vld [vmem:[%s8025_s1 + $0x8] sm:$0xff] }
 0x257   : > { %v1397_v12 = vpop.permute.xlu1 %1396  ;;  %v1399_v8 = vpop.permute.xlu0 %1398 }
 0x258   : > { %1492 = vst.msk [vmem:[#allocation4 + $0x8] sm:$0xff] %vm1490_vm15, %v1397_v12  ;;  %1493 = vst.msk [vmem:[#allocation4 + $0x10] sm:$0xff] %vm1490_vm15, %v1399_v8  ;;  %v4872_v12 = vpack.c.bf16 %v1947_v11, %v1946_v18  ;;  %v6255_v8 = vld [vmem:[#allocation2 + $0x180] sm:$0xff] }
 0x259   : > { %1578 = vrot.lane.b32.xlu1 %v5331_v57, %s4979_s6  ;;  %1580 = vrot.lane.b32.xlu0 %v5333_v58, %s4979_s6 }
 0x25a   : > { %4873 = vmatprep.subr.bf16.mxu0 %v4872_v12 }
 0x25b   : > { %v1401_v13 = vpop.permute.xlu1 %1400  ;;  %v1403_v24 = vpop.permute.xlu0 %1402  ;;  %4875 = vmatpush3.bf16.msra.mxu0 %v4872_v12 }
 0x25c   : > { %1494 = vst.msk [vmem:[#allocation4 + $0x18] sm:$0xff] %vm1490_vm15, %v1401_v13  ;;  %1495 = vst.msk [vmem:[#allocation4 + $0x20] sm:$0xff] %vm1490_vm15, %v1403_v24 }
 0x25d   : > { %1582 = vrot.lane.b32.xlu1 %v6206_v25, %s4979_s6  ;;  %1584 = vrot.lane.b32.xlu0 %v5341_v59, %s4979_s6 }
 0x25f   : > { %v1405_v14 = vpop.permute.xlu1 %1404  ;;  %v1407_v15 = vpop.permute.xlu0 %1406 }
 0x260   : > { %1496 = vst.msk [vmem:[#allocation4 + $0x28] sm:$0xff] %vm1490_vm15, %v1405_v14  ;;  %1497 = vst.msk [vmem:[#allocation4 + $0x30] sm:$0xff] %vm1490_vm15, %v1407_v15  ;;  %v6260_v14 = vld [vmem:[#allocation2 + $0x188] sm:$0xff]  ;;  %v1948_v15 = vld [vmem:[%s8025_s1 + $0x10] sm:$0xff] }
 0x261   : > { %1586 = vrot.lane.b32.xlu1 %v5343_v60, %s4979_s6  ;;  %1588 = vrot.lane.b32.xlu0 %v6217_v21, %s4979_s6 }
 0x263   : > { %v1409_v22 = vpop.permute.xlu1 %1408  ;;  %v1411_v56 = vpop.permute.xlu0 %1410 }
 0x264   : > { %1498 = vst.msk [vmem:[#allocation4 + $0x38] sm:$0xff] %vm1490_vm15, %v1409_v22  ;;  %1499 = vst.msk [vmem:[#allocation4 + $0x40] sm:$0xff] %vm1490_vm15, %v1411_v56  ;;  %v1949_v22 = vld [vmem:[%s8025_s1 + $0x18] sm:$0xff] }
 0x265   : > { %1590 = vrot.lane.b32.xlu1 %v5351_v62, %s4979_s6  ;;  %1592 = vrot.lane.b32.xlu0 %v5353_v63, %s4979_s6  ;;  %v4876_v56 = vpack.c.bf16 %v1949_v22, %v1948_v15 }
 0x267   : > { %v1413_v46 = vpop.permute.xlu1 %1412  ;;  %v1415_v61 = vpop.permute.xlu0 %1414  ;;  %4877 = vmatprep.subr.bf16.mxu0 %v4876_v56 }
 0x268   : > { %1500 = vst.msk [vmem:[#allocation4 + $0x48] sm:$0xff] %vm1490_vm15, %v1413_v46  ;;  %1501 = vst.msk [vmem:[#allocation4 + $0x50] sm:$0xff] %vm1490_vm15, %v1415_v61  ;;  %4879 = vmatpush3.bf16.msra.mxu0 %v4876_v56 }
 0x269   : > { %1594 = vrot.lane.b32.xlu1 %v5965_v20, %s4979_s6  ;;  %1596 = vrot.lane.b32.xlu0 %v5361_v1, %s4979_s6 }
 0x26b   : > { %v1417_v16 = vpop.permute.xlu1 %1416  ;;  %v1419_v5 = vpop.permute.xlu0 %1418 }
 0x26c   : > { %1502 = vst.msk [vmem:[#allocation4 + $0x58] sm:$0xff] %vm1490_vm15, %v1417_v16  ;;  %1503 = vst.msk [vmem:[#allocation4 + $0x60] sm:$0xff] %vm1490_vm15, %v1419_v5  ;;  %v6277_v16 = vld [vmem:[#allocation2 + $0x1a8] sm:$0x3] }
 0x26d   : > { %1598 = vrot.lane.b32.xlu1 %v5363_v2, %s4979_s6  ;;  %1600 = vrot.lane.b32.xlu0 %v5976_v23, %s4979_s6 }
 0x26f   : > { %v1421_v17 = vpop.permute.xlu1 %1420  ;;  %v1423_v54 = vpop.permute.xlu0 %1422 }
 0x270   : > { %1504 = vst.msk [vmem:[#allocation4 + $0x68] sm:$0xff] %vm1490_vm15, %v1421_v17  ;;  %1505 = vst.msk [vmem:[#allocation4 + $0x70] sm:$0xff] %vm1490_vm15, %v1423_v54 }
 0x271   : > { %1602 = vrot.lane.b32.xlu1 %v5369_v3, %s4979_s6  ;;  %1604 = vrot.lane.b32.xlu0 %v5371_v4, %s4979_s6 }
 0x273   : > { %v1425_v7 = vpop.permute.xlu1 %1424  ;;  %v1427_v51 = vpop.permute.xlu0 %1426 }
 0x274   : > { %1506 = vst.msk [vmem:[#allocation4 + $0x78] sm:$0xff] %vm1490_vm15, %v1425_v7  ;;  %1507 = vst.msk [vmem:[#allocation4 + $0x80] sm:$0xff] %vm1490_vm15, %v1427_v51 }
 0x275   : > { %1606 = vrot.lane.b32.xlu1 %v5987_v28, %s4979_s6  ;;  %1608 = vrot.lane.b32.xlu0 %v6255_v8, %s4979_s6 }
 0x277   : > { %v1429_v13 = vpop.permute.xlu1 %1428  ;;  %v1431_v24 = vpop.permute.xlu0 %1430 }
 0x278   : > { %1508 = vst.msk [vmem:[#allocation4 + $0x88] sm:$0xff] %vm1490_vm15, %v1429_v13  ;;  %1509 = vst.msk [vmem:[#allocation4 + $0x90] sm:$0xff] %vm1490_vm15, %v1431_v24 }
 0x279   : > { %1610 = vrot.lane.b32.xlu1 %v6260_v14, %s4979_s6  ;;  %1612 = vrot.lane.b32.xlu0 %v5844_v50, %s4979_s6  ;;  %v1950_v50 = vld [vmem:[%s8025_s1 + $0x20] sm:$0xf] }
 0x27a   : > { %4756 = vmatprep.subr.msk.mxu0 %vm2055_vm0, %v1950_v50 }
 0x27b   : > { %v1433_v46 = vpop.permute.xlu1 %1432  ;;  %v1435_v61 = vpop.permute.xlu0 %1434  ;;  %4757 = vmatpush3.msk.msra.mxu0 %vm2055_vm0, %v1950_v50 }
 0x27c   : > { %1510 = vst.msk [vmem:[#allocation4 + $0x98] sm:$0xff] %vm1490_vm15, %v1433_v46  ;;  %1511 = vst.msk [vmem:[#allocation4 + $0xa0] sm:$0xff] %vm1490_vm15, %v1435_v61 }
 0x27d   : > { %1614 = vrot.lane.b32.xlu1 %v6088_v48, %s4979_s6  ;;  %1616 = vrot.lane.b32.xlu0 %v6093_v6, %s4979_s6 }
 0x27f   : > { %v1437_v5 = vpop.permute.xlu1 %1436  ;;  %v1439_v17 = vpop.permute.xlu0 %1438 }
 0x280   : > { %1512 = vst.msk [vmem:[#allocation4 + $0xa8] sm:$0xff] %vm1490_vm15, %v1437_v5  ;;  %1513 = vst.msk [vmem:[#allocation4 + $0xb0] sm:$0xff] %vm1490_vm15, %v1439_v17 }
 0x281   : > { %1618 = vrot.lane.b32.xlu1 %v6277_v16, %s4979_s6  ;;  %1719 = vrot.lane.b32.xlu0 %v5217_v26, %s4980_s17 }
 0x283   : > { %v1441_v54 = vpop.permute.xlu1 %1440  ;;  %v1443_v7 = vpop.permute.xlu0 %1442 }
 0x284   : > { %1514 = vst.msk [vmem:[#allocation4 + $0xb8] sm:$0xff] %vm1490_vm15, %v1441_v54  ;;  %1515 = vst.msk [vmem:[#allocation4 + $0xc0] sm:$0xff] %vm1490_vm15, %v1443_v7 }
 0x285   : > { %1721 = vrot.lane.b32.xlu1 %v5219_v27, %s4980_s17  ;;  %1723 = vrot.lane.b32.xlu0 %v6107_v10, %s4980_s17 }
 0x287   : > { %v1445_v51 = vpop.permute.xlu1 %1444  ;;  %v1447_v18 = vpop.permute.xlu0 %1446 }
 0x288   : > { %1516 = vst.msk [vmem:[#allocation4 + $0xc8] sm:$0xff] %vm1490_vm15, %v1445_v51  ;;  %1517 = vst.msk [vmem:[#allocation4 + $0xd0] sm:$0xff] %vm1490_vm15, %v1447_v18 }
 0x289   : > { %1725 = vrot.lane.b32.xlu1 %v5227_v29, %s4980_s17  ;;  %1727 = vrot.lane.b32.xlu0 %v5229_v30, %s4980_s17 }
 0x28b   : > { %v1449_v26 = vpop.permute.xlu1 %1448  ;;  %v1451_v27 = vpop.permute.xlu0 %1450 }
 0x28c   : > { %1518 = vst.msk [vmem:[#allocation4 + $0xd8] sm:$0xff] %vm1490_vm15, %v1449_v26  ;;  %1519 = vst.msk [vmem:[#allocation4 + $0xe0] sm:$0xff] %vm1490_vm15, %v1451_v27 }
 0x28d   : > { %1729 = vrot.lane.b32.xlu1 %v6118_v55, %s4980_s17  ;;  %1731 = vrot.lane.b32.xlu0 %v5237_v31, %s4980_s17 }
 0x28f   : > { %v1453_v10 = vpop.permute.xlu1 %1452  ;;  %v1455_v29 = vpop.permute.xlu0 %1454 }
 0x290   : > { %1520 = vst.msk [vmem:[#allocation4 + $0xe8] sm:$0xff] %vm1490_vm15, %v1453_v10  ;;  %1521 = vst.msk [vmem:[#allocation4 + $0xf0] sm:$0xff] %vm1490_vm15, %v1455_v29 }
 0x291   : > { %1733 = vrot.lane.b32.xlu1 %v5239_v32, %s4980_s17  ;;  %1735 = vrot.lane.b32.xlu0 %v6129_v9, %s4980_s17 }
 0x293   : > { %v1457_v30 = vpop.permute.xlu1 %1456  ;;  %v1525_v55 = vpop.permute.xlu0 %1524 }
 0x294   : > { %1522 = vst.msk [vmem:[#allocation4 + $0xf8] sm:$0xff] %vm1490_vm15, %v1457_v30 }
 0x295   : > { %1737 = vrot.lane.b32.xlu1 %v5245_v33, %s4980_s17  ;;  %1669 = vst.msk [vmem:[#allocation4 - $0x1] sm:$0xfe] %vm1668_vm1, %v1525_v55  ;;  %1739 = vrot.lane.b32.xlu0 %v5247_v34, %s4980_s17 }
 0x297   : > { %v1527_v31 = vpop.permute.xlu1 %1526  ;;  %v1529_v32 = vpop.permute.xlu0 %1528 }
 0x298   : > { %1671 = vst.msk [vmem:[#allocation4 + $0x7] sm:$0xff] %vm1670_vm2, %v1527_v31 }
 0x299   : > { %1741 = vrot.lane.b32.xlu1 %v6140_v19, %s4980_s17  ;;  %1673 = vst.msk [vmem:[#allocation4 + $0xf] sm:$0x1] %vm1672_vm3, %v1529_v32  ;;  %1743 = vrot.lane.b32.xlu0 %v5255_v35, %s4980_s17 }
 0x29b   : > { %v1531_v33 = vpop.permute.xlu1 %1530  ;;  %v1533_v9 = vpop.permute.xlu0 %1532 }
 0x29c   : > { %1674 = vst.msk [vmem:[#allocation4 + $0xf] sm:$0xfe] %vm1668_vm1, %v1531_v33 }
 0x29d   : > { %1745 = vrot.lane.b32.xlu1 %v5257_v36, %s4980_s17  ;;  %1675 = vst.msk [vmem:[#allocation4 + $0x17] sm:$0xff] %vm1670_vm2, %v1533_v9  ;;  %1747 = vrot.lane.b32.xlu0 %v6151_v41, %s4980_s17 }
 0x29f   : > { %v1535_v34 = vpop.permute.xlu1 %1534  ;;  %v1537_v19 = vpop.permute.xlu0 %1536 }
 0x2a0   : > { %1676 = vst.msk [vmem:[#allocation4 + $0x1f] sm:$0x1] %vm1672_vm3, %v1535_v34 }
 0x2a1   : > { %1749 = vrot.lane.b32.xlu1 %v5263_v37, %s4980_s17  ;;  %1677 = vst.msk [vmem:[#allocation4 + $0x1f] sm:$0xfe] %vm1668_vm1, %v1537_v19  ;;  %1751 = vrot.lane.b32.xlu0 %v5265_v38, %s4980_s17 }
 0x2a3   : > { %v1539_v35 = vpop.permute.xlu1 %1538  ;;  %v1541_v36 = vpop.permute.xlu0 %1540 }
 0x2a4   : > { %1678 = vst.msk [vmem:[#allocation4 + $0x27] sm:$0xff] %vm1670_vm2, %v1539_v35 }
 0x2a5   : > { %1753 = vrot.lane.b32.xlu1 %v6162_v47, %s4980_s17  ;;  %1679 = vst.msk [vmem:[#allocation4 + $0x2f] sm:$0x1] %vm1672_vm3, %v1541_v36  ;;  %1755 = vrot.lane.b32.xlu0 %v5273_v39, %s4980_s17 }
 0x2a7   : > { %v1543_v41 = vpop.permute.xlu1 %1542  ;;  %v1545_v37 = vpop.permute.xlu0 %1544 }
 0x2a8   : > { %1680 = vst.msk [vmem:[#allocation4 + $0x2f] sm:$0xfe] %vm1668_vm1, %v1543_v41 }
 0x2a9   : > { %1757 = vrot.lane.b32.xlu1 %v5275_v40, %s4980_s17  ;;  %1681 = vst.msk [vmem:[#allocation4 + $0x37] sm:$0xff] %vm1670_vm2, %v1545_v37  ;;  %1759 = vrot.lane.b32.xlu0 %v6173_v49, %s4980_s17 }
 0x2ab   : > { %v1547_v38 = vpop.permute.xlu1 %1546  ;;  %v1549_v47 = vpop.permute.xlu0 %1548 }
 0x2ac   : > { %1682 = vst.msk [vmem:[#allocation4 + $0x3f] sm:$0x1] %vm1672_vm3, %v1547_v38 }
 0x2ad   : > { %1761 = vrot.lane.b32.xlu1 %v5283_v42, %s4980_s17  ;;  %1683 = vst.msk [vmem:[#allocation4 + $0x3f] sm:$0xfe] %vm1668_vm1, %v1549_v47  ;;  %1763 = vrot.lane.b32.xlu0 %v5285_v43, %s4980_s17 }
 0x2af   : > { %v1551_v39 = vpop.permute.xlu1 %1550  ;;  %v1553_v40 = vpop.permute.xlu0 %1552 }
 0x2b0   : > { %1684 = vst.msk [vmem:[#allocation4 + $0x47] sm:$0xff] %vm1670_vm2, %v1551_v39 }
 0x2b1   : > { %1765 = vrot.lane.b32.xlu1 %v6184_v52, %s4980_s17  ;;  %1685 = vst.msk [vmem:[#allocation4 + $0x4f] sm:$0x1] %vm1672_vm3, %v1553_v40  ;;  %1767 = vrot.lane.b32.xlu0 %v5293_v44, %s4980_s17 }
 0x2b3   : > { %v1555_v49 = vpop.permute.xlu1 %1554  ;;  %v1557_v42 = vpop.permute.xlu0 %1556 }
 0x2b4   : > { %1686 = vst.msk [vmem:[#allocation4 + $0x4f] sm:$0xfe] %vm1668_vm1, %v1555_v49 }
 0x2b5   : > { %1769 = vrot.lane.b32.xlu1 %v5295_v45, %s4980_s17  ;;  %1687 = vst.msk [vmem:[#allocation4 + $0x57] sm:$0xff] %vm1670_vm2, %v1557_v42  ;;  %1771 = vrot.lane.b32.xlu0 %v6195_v53, %s4980_s17 }
 0x2b7   : > { %v1559_v43 = vpop.permute.xlu1 %1558  ;;  %v1561_v52 = vpop.permute.xlu0 %1560 }
 0x2b8   : > { %1688 = vst.msk [vmem:[#allocation4 + $0x5f] sm:$0x1] %vm1672_vm3, %v1559_v43 }
 0x2b9   : > { %1773 = vrot.lane.b32.xlu1 %v5331_v57, %s4980_s17  ;;  %1689 = vst.msk [vmem:[#allocation4 + $0x5f] sm:$0xfe] %vm1668_vm1, %v1561_v52  ;;  %1775 = vrot.lane.b32.xlu0 %v5333_v58, %s4980_s17 }
 0x2bb   : > { %v1563_v44 = vpop.permute.xlu1 %1562  ;;  %v1565_v45 = vpop.permute.xlu0 %1564 }
 0x2bc   : > { %1690 = vst.msk [vmem:[#allocation4 + $0x67] sm:$0xff] %vm1670_vm2, %v1563_v44 }
 0x2bd   : > { %1777 = vrot.lane.b32.xlu1 %v6206_v25, %s4980_s17  ;;  %1691 = vst.msk [vmem:[#allocation4 + $0x6f] sm:$0x1] %vm1672_vm3, %v1565_v45  ;;  %1779 = vrot.lane.b32.xlu0 %v5341_v59, %s4980_s17 }
 0x2bf   : > { %v1567_v53 = vpop.permute.xlu1 %1566  ;;  %v1569_v57 = vpop.permute.xlu0 %1568 }
 0x2c0   : > { %1692 = vst.msk [vmem:[#allocation4 + $0x6f] sm:$0xfe] %vm1668_vm1, %v1567_v53 }
 0x2c1   : > { %1781 = vrot.lane.b32.xlu1 %v5343_v60, %s4980_s17  ;;  %1693 = vst.msk [vmem:[#allocation4 + $0x77] sm:$0xff] %vm1670_vm2, %v1569_v57  ;;  %1783 = vrot.lane.b32.xlu0 %v6217_v21, %s4980_s17 }
 0x2c3   : > { %v1571_v58 = vpop.permute.xlu1 %1570  ;;  %v1573_v25 = vpop.permute.xlu0 %1572 }
 0x2c4   : > { %1694 = vst.msk [vmem:[#allocation4 + $0x7f] sm:$0x1] %vm1672_vm3, %v1571_v58 }
 0x2c5   : > { %1785 = vrot.lane.b32.xlu1 %v5351_v62, %s4980_s17  ;;  %1695 = vst.msk [vmem:[#allocation4 + $0x7f] sm:$0xfe] %vm1668_vm1, %v1573_v25  ;;  %1787 = vrot.lane.b32.xlu0 %v5353_v63, %s4980_s17 }
 0x2c7   : > { %v1575_v59 = vpop.permute.xlu1 %1574  ;;  %v1577_v60 = vpop.permute.xlu0 %1576 }
 0x2c8   : > { %1696 = vst.msk [vmem:[#allocation4 + $0x87] sm:$0xff] %vm1670_vm2, %v1575_v59 }
 0x2c9   : > { %1789 = vrot.lane.b32.xlu1 %v5965_v20, %s4980_s17  ;;  %1697 = vst.msk [vmem:[#allocation4 + $0x8f] sm:$0x1] %vm1672_vm3, %v1577_v60  ;;  %1791 = vrot.lane.b32.xlu0 %v5361_v1, %s4980_s17 }
 0x2cb   : > { %v1579_v21 = vpop.permute.xlu1 %1578  ;;  %v1581_v62 = vpop.permute.xlu0 %1580 }
 0x2cc   : > { %1698 = vst.msk [vmem:[#allocation4 + $0x8f] sm:$0xfe] %vm1668_vm1, %v1579_v21 }
 0x2cd   : > { %1793 = vrot.lane.b32.xlu1 %v5363_v2, %s4980_s17  ;;  %1699 = vst.msk [vmem:[#allocation4 + $0x97] sm:$0xff] %vm1670_vm2, %v1581_v62  ;;  %1795 = vrot.lane.b32.xlu0 %v5976_v23, %s4980_s17 }
 0x2cf   : > { %v1583_v63 = vpop.permute.xlu1 %1582  ;;  %v1585_v20 = vpop.permute.xlu0 %1584 }
 0x2d0   : > { %1700 = vst.msk [vmem:[#allocation4 + $0x9f] sm:$0x1] %vm1672_vm3, %v1583_v63 }
 0x2d1   : > { %1797 = vrot.lane.b32.xlu1 %v5369_v3, %s4980_s17  ;;  %1701 = vst.msk [vmem:[#allocation4 + $0x9f] sm:$0xfe] %vm1668_vm1, %v1585_v20  ;;  %1799 = vrot.lane.b32.xlu0 %v5371_v4, %s4980_s17  ;;  %v4944_v4 = vld [vmem:[#allocation2 + $0x190] sm:$0x3] }
 0x2d3   : > { %v1587_v1 = vpop.permute.xlu1 %1586  ;;  %v1589_v2 = vpop.permute.xlu0 %1588 }
 0x2d4   : > { %1702 = vst.msk [vmem:[#allocation4 + $0xa7] sm:$0xff] %vm1670_vm2, %v1587_v1 }
 0x2d5   : > { %1801 = vrot.lane.b32.xlu1 %v5987_v28, %s4980_s17  ;;  %1703 = vst.msk [vmem:[#allocation4 + $0xaf] sm:$0x1] %vm1672_vm3, %v1589_v2  ;;  %1803 = vrot.lane.b32.xlu0 %v6255_v8, %s4980_s17 }
 0x2d7   : > { %v1591_v23 = vpop.permute.xlu1 %1590  ;;  %v1593_v3 = vpop.permute.xlu0 %1592 }
 0x2d8   : > { %1704 = vst.msk [vmem:[#allocation4 + $0xaf] sm:$0xfe] %vm1668_vm1, %v1591_v23 }
 0x2d9   : > { %1805 = vrot.lane.b32.xlu1 %v6260_v14, %s4980_s17  ;;  %1705 = vst.msk [vmem:[#allocation4 + $0xb7] sm:$0xff] %vm1670_vm2, %v1593_v3  ;;  %1807 = vrot.lane.b32.xlu0 %v4944_v4, %s4980_s17 }
 0x2db   : > { %v1595_v11 = vpop.permute.xlu1 %1594  ;;  %v1597_v28 = vpop.permute.xlu0 %1596 }
 0x2dc   : > { %1706 = vst.msk [vmem:[#allocation4 + $0xbf] sm:$0x1] %vm1672_vm3, %v1595_v11 }
 0x2dd   : > { %1809 = vrot.lane.b32.xlu1 %v6088_v48, %s4980_s17  ;;  %1707 = vst.msk [vmem:[#allocation4 + $0xbf] sm:$0xfe] %vm1668_vm1, %v1597_v28  ;;  %1811 = vrot.lane.b32.xlu0 %v6093_v6, %s4980_s17 }
 0x2df   : > { %v1599_v12 = vpop.permute.xlu1 %1598  ;;  %v1601_v8 = vpop.permute.xlu0 %1600 }
 0x2e0   : > { %1708 = vst.msk [vmem:[#allocation4 + $0xc7] sm:$0xff] %vm1670_vm2, %v1599_v12 }
 0x2e1   : > { %1813 = vrot.lane.b32.xlu1 %v6277_v16, %s4980_s17  ;;  %1709 = vst.msk [vmem:[#allocation4 + $0xcf] sm:$0x1] %vm1672_vm3, %v1601_v8 }
 0x2e3   : > { %v1603_v13 = vpop.permute.xlu1 %1602  ;;  %v1605_v24 = vpop.permute.xlu0 %1604 }
 0x2e4   : > { %1710 = vst.msk [vmem:[#allocation4 + $0xcf] sm:$0xfe] %vm1668_vm1, %v1603_v13 }
 0x2e5   : > { %1711 = vst.msk [vmem:[#allocation4 + $0xd7] sm:$0xff] %vm1670_vm2, %v1605_v24 }
 0x2e7   : > { %v1607_v48 = vpop.permute.xlu1 %1606  ;;  %v1609_v14 = vpop.permute.xlu0 %1608 }
 0x2e8   : > { %1712 = vst.msk [vmem:[#allocation4 + $0xdf] sm:$0x1] %vm1672_vm3, %v1607_v48 }
 0x2e9   : > { %1713 = vst.msk [vmem:[#allocation4 + $0xdf] sm:$0xfe] %vm1668_vm1, %v1609_v14 }
 0x2eb   : > { %v1611_v6 = vpop.permute.xlu1 %1610  ;;  %v1613_v15 = vpop.permute.xlu0 %1612 }
 0x2ec   : > { %1714 = vst.msk [vmem:[#allocation4 + $0xe7] sm:$0xff] %vm1670_vm2, %v1611_v6 }
 0x2ed   : > { %1715 = vst.msk [vmem:[#allocation4 + $0xef] sm:$0x1] %vm1672_vm3, %v1613_v15 }
 0x2ef   : > { %v1615_v22 = vpop.permute.xlu1 %1614  ;;  %v1617_v56 = vpop.permute.xlu0 %1616 }
 0x2f0   : > { %1716 = vst.msk [vmem:[#allocation4 + $0xef] sm:$0xfe] %vm1668_vm1, %v1615_v22 }
 0x2f1   : > { %1717 = vst.msk [vmem:[#allocation4 + $0xf7] sm:$0xff] %vm1670_vm2, %v1617_v56 }
 0x2f3   : > { %v1619_v46 = vpop.permute.xlu1 %1618  ;;  %v1720_v61 = vpop.permute.xlu0 %1719 }
 0x2f4   : > { %1718 = vst.msk [vmem:[#allocation4 + $0xff] sm:$0x1] %vm1672_vm3, %v1619_v46 }
 0x2f5   : > { %1864 = vst.msk [vmem:[#allocation4 - $0x2] sm:$0xfc] %vm1863_vm4, %v1720_v61 }
 0x2f7   : > { %v1722_v16 = vpop.permute.xlu1 %1721  ;;  %v1724_v5 = vpop.permute.xlu0 %1723 }
 0x2f8   : > { %1866 = vst.msk [vmem:[#allocation4 + $0x6] sm:$0xff] %vm1865_vm5, %v1722_v16 }
 0x2f9   : > { %1868 = vst.msk [vmem:[#allocation4 + $0xe] sm:$0x3] %vm1867_vm6, %v1724_v5 }
 0x2fb   : > { %v1726_v50 = vpop.permute.xlu1 %1725  ;;  %v1728_v17 = vpop.permute.xlu0 %1727 }
 0x2fc   : > { %1869 = vst.msk [vmem:[#allocation4 + $0xe] sm:$0xfc] %vm1863_vm4, %v1726_v50 }
 0x2fd   : > { %1870 = vst.msk [vmem:[#allocation4 + $0x16] sm:$0xff] %vm1865_vm5, %v1728_v17 }
 0x2ff   : > { %v1730_v54 = vpop.permute.xlu1 %1729  ;;  %v1914_v7 = vld [vmem:[#allocation4] sm:$0xff]  ;;  %v1732_v51 = vpop.permute.xlu0 %1731 }
 0x300   : > { %1871 = vst.msk [vmem:[#allocation4 + $0x1e] sm:$0x3] %vm1867_vm6, %v1730_v54  ;;  %4758 = vmatprep.mubr.msk.f32.mxu0 %vm1958_vm7, %v1914_v7  ;;  %v1915_v18 = vld [vmem:[#allocation4 + $0x8] sm:$0xff] }
 0x301   : > { %1872 = vst.msk [vmem:[#allocation4 + $0x1e] sm:$0xfc] %vm1863_vm4, %v1732_v51  ;;  %4759 = vmatmul.mubr.msk.f32.vlgmr.msra.gmra.mrb[0].mxu0 %vm1958_vm7, %v1915_v18 }
 0x303   : > { %v1734_v26 = vpop.permute.xlu1 %1733  ;;  %v1736_v27 = vpop.permute.xlu0 %1735 }
 0x304   : > { %1873 = vst.msk [vmem:[#allocation4 + $0x26] sm:$0xff] %vm1865_vm5, %v1734_v26  ;;  %v1916_v10 = vld [vmem:[#allocation4 + $0x10] sm:$0xff] }
 0x305   : > { %1874 = vst.msk [vmem:[#allocation4 + $0x2e] sm:$0x3] %vm1867_vm6, %v1736_v27  ;;  %4761 = vmatprep.mubr.msk.f32.mxu0 %vm1958_vm7, %v1916_v10 }
 0x307   : > { %v1738_v29 = vpop.permute.xlu1 %1737  ;;  %v1917_v30 = vld [vmem:[#allocation4 + $0x18] sm:$0xff]  ;;  %v1740_v55 = vpop.permute.xlu0 %1739 }
 0x308   : > { %1875 = vst.msk [vmem:[#allocation4 + $0x2e] sm:$0xfc] %vm1863_vm4, %v1738_v29  ;;  %4762 = vmatmul.mubr.msk.f32.gmra.mrb[2].mxu0 %vm1958_vm7, %v1917_v30  ;;  %v6623_v29 = vld [vmem:[#allocation3] sm:$0xff]  ;;  %v6629_v30 = vld [vmem:[#allocation3 + $0x10] sm:$0x3] }
 0x309   : > { %1876 = vst.msk [vmem:[#allocation4 + $0x36] sm:$0xff] %vm1865_vm5, %v1740_v55  ;;  %2603 = vrot.lane.b32.xlu0 %v6623_v29, %s4974_s26  ;;  %v6631_v55 = vld [vmem:[#allocation3 + $0x8] sm:$0xff] }
 0x30a   : > { %2523 = vst.msk [vmem:[#allocation5] sm:$0xff] %vm2380_vm8, %v6623_v29  ;;  %2605 = vrot.lane.b32.xlu1 %v6631_v55, %s4974_s26  ;;  %2524 = vst.msk [vmem:[#allocation5 + $0x8] sm:$0xff] %vm2380_vm8, %v6631_v55 }
 0x30b   : > { %v1742_v31 = vpop.permute.xlu1 %1741  ;;  %v1918_v32 = vld [vmem:[#allocation4 + $0x20] sm:$0xff]  ;;  %v1744_v33 = vpop.permute.xlu0 %1743 }
 0x30c   : > { %1877 = vst.msk [vmem:[#allocation4 + $0x3e] sm:$0x3] %vm1867_vm6, %v1742_v31  ;;  %4764 = vmatprep.mubr.msk.f32.mxu0 %vm1958_vm7, %v1918_v32  ;;  %v1919_v9 = vld [vmem:[#allocation4 + $0x28] sm:$0xff] }
 0x30d   : > { %1878 = vst.msk [vmem:[#allocation4 + $0x3e] sm:$0xfc] %vm1863_vm4, %v1744_v33  ;;  %4765 = vmatmul.mubr.msk.f32.gmra.mrb[4].mxu0 %vm1958_vm7, %v1919_v9  ;;  %2607 = vrot.lane.b32.xlu0 %v6629_v30, %s4974_s26 }
 0x30f   : > { %v1746_v34 = vpop.permute.xlu1 %1745  ;;  %v1748_v19 = vpop.permute.xlu0 %1747 }
 0x310   : > { %1879 = vst.msk [vmem:[#allocation4 + $0x46] sm:$0xff] %vm1865_vm5, %v1746_v34  ;;  %v1920_v35 = vld [vmem:[#allocation4 + $0x30] sm:$0xff] }
 0x311   : > { %1880 = vst.msk [vmem:[#allocation4 + $0x4e] sm:$0x3] %vm1867_vm6, %v1748_v19  ;;  %4767 = vmatprep.mubr.msk.f32.mxu0 %vm1958_vm7, %v1920_v35 }
 0x313   : > { %v1750_v36 = vpop.permute.xlu1 %1749  ;;  %v1921_v41 = vld [vmem:[#allocation4 + $0x38] sm:$0xff]  ;;  %v1752_v37 = vpop.permute.xlu0 %1751 }
 0x314   : > { %1881 = vst.msk [vmem:[#allocation4 + $0x4e] sm:$0xfc] %vm1863_vm4, %v1750_v36  ;;  %4768 = vmatmul.mubr.msk.f32.gmra.mrb[6].mxu0 %vm1958_vm7, %v1921_v41  ;;  %v6648_v36 = vld [vmem:[%s8026_s2] ss:$0 sm:$0xff] }
 0x315   : > { %1882 = vst.msk [vmem:[#allocation4 + $0x56] sm:$0xff] %vm1865_vm5, %v1752_v37 }
 0x317   : > { %v1754_v38 = vpop.permute.xlu1 %1753  ;;  %v1922_v47 = vld [vmem:[#allocation4 + $0x40] sm:$0xff]  ;;  %v1756_v39 = vpop.permute.xlu0 %1755 }
 0x318   : > { %1883 = vst.msk [vmem:[#allocation4 + $0x5e] sm:$0x3] %vm1867_vm6, %v1754_v38  ;;  %4770 = vmatprep.mubr.msk.f32.mxu0 %vm1958_vm7, %v1922_v47  ;;  %v1923_v40 = vld [vmem:[#allocation4 + $0x48] sm:$0xff] }
 0x319   : > { %1884 = vst.msk [vmem:[#allocation4 + $0x5e] sm:$0xfc] %vm1863_vm4, %v1756_v39  ;;  %4771 = vmatmul.mubr.msk.f32.gmra.mrb[8].mxu0 %vm1958_vm7, %v1923_v40 }
 0x31b   : > { %v1758_v49 = vpop.permute.xlu1 %1757  ;;  %v1760_v42 = vpop.permute.xlu0 %1759 }
 0x31c   : > { %1885 = vst.msk [vmem:[#allocation4 + $0x66] sm:$0xff] %vm1865_vm5, %v1758_v49  ;;  %v1924_v43 = vld [vmem:[#allocation4 + $0x50] sm:$0xff] }
 0x31d   : > { %1886 = vst.msk [vmem:[#allocation4 + $0x6e] sm:$0x3] %vm1867_vm6, %v1760_v42  ;;  %4773 = vmatprep.mubr.msk.f32.mxu0 %vm1958_vm7, %v1924_v43 }
 0x31f   : > { %v1762_v52 = vpop.permute.xlu1 %1761  ;;  %v1925_v44 = vld [vmem:[#allocation4 + $0x58] sm:$0xff]  ;;  %v1764_v45 = vpop.permute.xlu0 %1763 }
 0x320   : > { %1887 = vst.msk [vmem:[#allocation4 + $0x6e] sm:$0xfc] %vm1863_vm4, %v1762_v52  ;;  %4774 = vmatmul.mubr.msk.f32.gmra.mrb[10].mxu0 %vm1958_vm7, %v1925_v44 }
 0x321   : > { %1888 = vst.msk [vmem:[#allocation4 + $0x76] sm:$0xff] %vm1865_vm5, %v1764_v45 }
 0x323   : > { %v1766_v53 = vpop.permute.xlu1 %1765  ;;  %v1926_v57 = vld [vmem:[#allocation4 + $0x60] sm:$0xff]  ;;  %v1768_v58 = vpop.permute.xlu0 %1767 }
 0x324   : > { %1889 = vst.msk [vmem:[#allocation4 + $0x7e] sm:$0x3] %vm1867_vm6, %v1766_v53  ;;  %4776 = vmatprep.mubr.msk.f32.mxu0 %vm1958_vm7, %v1926_v57  ;;  %v1927_v25 = vld [vmem:[#allocation4 + $0x68] sm:$0xff] }
 0x325   : > { %1890 = vst.msk [vmem:[#allocation4 + $0x7e] sm:$0xfc] %vm1863_vm4, %v1768_v58  ;;  %4777 = vmatmul.mubr.msk.f32.gmra.mrb[12].mxu0 %vm1958_vm7, %v1927_v25 }
 0x327   : > { %v1770_v59 = vpop.permute.xlu1 %1769  ;;  %v1772_v60 = vpop.permute.xlu0 %1771 }
 0x328   : > { %1891 = vst.msk [vmem:[#allocation4 + $0x86] sm:$0xff] %vm1865_vm5, %v1770_v59  ;;  %v1928_v21 = vld [vmem:[#allocation4 + $0x70] sm:$0xff] }
 0x329   : > { %1892 = vst.msk [vmem:[#allocation4 + $0x8e] sm:$0x3] %vm1867_vm6, %v1772_v60  ;;  %4779 = vmatprep.mubr.msk.f32.mxu0 %vm1958_vm7, %v1928_v21 }
 0x32b   : > { %v1774_v62 = vpop.permute.xlu1 %1773  ;;  %v1929_v63 = vld [vmem:[#allocation4 + $0x78] sm:$0xff]  ;;  %v1776_v20 = vpop.permute.xlu0 %1775 }
 0x32c   : > { %1893 = vst.msk [vmem:[#allocation4 + $0x8e] sm:$0xfc] %vm1863_vm4, %v1774_v62  ;;  %4780 = vmatmul.mubr.msk.f32.gmra.mrb[14].mxu0 %vm1958_vm7, %v1929_v63 }
 0x32d   : > { %1894 = vst.msk [vmem:[#allocation4 + $0x96] sm:$0xff] %vm1865_vm5, %v1776_v20 }
 0x32f   : > { %v1778_v1 = vpop.permute.xlu1 %1777  ;;  %v1930_v2 = vld [vmem:[#allocation4 + $0x80] sm:$0xff]  ;;  %v1780_v23 = vpop.permute.xlu0 %1779 }
 0x330   : > { %1895 = vst.msk [vmem:[#allocation4 + $0x9e] sm:$0x3] %vm1867_vm6, %v1778_v1  ;;  %4782 = vmatprep.mubr.msk.f32.mxu0 %vm1958_vm7, %v1930_v2  ;;  %v1931_v3 = vld [vmem:[#allocation4 + $0x88] sm:$0xff] }
 0x331   : > { %1896 = vst.msk [vmem:[#allocation4 + $0x9e] sm:$0xfc] %vm1863_vm4, %v1780_v23  ;;  %4783 = vmatmul.mubr.msk.f32.gmra.mrb[16].mxu0 %vm1958_vm7, %v1931_v3 }
 0x333   : > { %v1782_v4 = vpop.permute.xlu1 %1781  ;;  %v1784_v11 = vpop.permute.xlu0 %1783 }
 0x334   : > { %1897 = vst.msk [vmem:[#allocation4 + $0xa6] sm:$0xff] %vm1865_vm5, %v1782_v4  ;;  %v1932_v28 = vld [vmem:[#allocation4 + $0x90] sm:$0xff] }
 0x335   : > { %1898 = vst.msk [vmem:[#allocation4 + $0xae] sm:$0x3] %vm1867_vm6, %v1784_v11  ;;  %4785 = vmatprep.mubr.msk.f32.mxu0 %vm1958_vm7, %v1932_v28 }
 0x337   : > { %v1786_v12 = vpop.permute.xlu1 %1785  ;;  %v1933_v8 = vld [vmem:[#allocation4 + $0x98] sm:$0xff]  ;;  %v1788_v13 = vpop.permute.xlu0 %1787 }
 0x338   : > { %1899 = vst.msk [vmem:[#allocation4 + $0xae] sm:$0xfc] %vm1863_vm4, %v1786_v12  ;;  %4786 = vmatmul.mubr.msk.f32.gmra.mrb[18].mxu0 %vm1958_vm7, %v1933_v8 }
 0x339   : > { %1900 = vst.msk [vmem:[#allocation4 + $0xb6] sm:$0xff] %vm1865_vm5, %v1788_v13 }
 0x33b   : > { %v1790_v24 = vpop.permute.xlu1 %1789  ;;  %v1934_v48 = vld [vmem:[#allocation4 + $0xa0] sm:$0xff]  ;;  %v1792_v14 = vpop.permute.xlu0 %1791 }
 0x33c   : > { %1901 = vst.msk [vmem:[#allocation4 + $0xbe] sm:$0x3] %vm1867_vm6, %v1790_v24  ;;  %4788 = vmatprep.mubr.msk.f32.mxu0 %vm1958_vm7, %v1934_v48  ;;  %v1935_v6 = vld [vmem:[#allocation4 + $0xa8] sm:$0xff] }
 0x33d   : > { %1902 = vst.msk [vmem:[#allocation4 + $0xbe] sm:$0xfc] %vm1863_vm4, %v1792_v14  ;;  %4789 = vmatmul.mubr.msk.f32.gmra.mrb[20].mxu0 %vm1958_vm7, %v1935_v6 }
 0x33f   : > { %v1794_v15 = vpop.permute.xlu1 %1793  ;;  %v1796_v22 = vpop.permute.xlu0 %1795 }
 0x340   : > { %1903 = vst.msk [vmem:[#allocation4 + $0xc6] sm:$0xff] %vm1865_vm5, %v1794_v15  ;;  %v1936_v56 = vld [vmem:[#allocation4 + $0xb0] sm:$0xff] }
 0x341   : > { %1904 = vst.msk [vmem:[#allocation4 + $0xce] sm:$0x3] %vm1867_vm6, %v1796_v22  ;;  %4791 = vmatprep.mubr.msk.f32.mxu0 %vm1958_vm7, %v1936_v56 }
 0x343   : > { %v1798_v46 = vpop.permute.xlu1 %1797  ;;  %v1937_v61 = vld [vmem:[#allocation4 + $0xb8] sm:$0xff]  ;;  %v1800_v16 = vpop.permute.xlu0 %1799 }
 0x344   : > { %1905 = vst.msk [vmem:[#allocation4 + $0xce] sm:$0xfc] %vm1863_vm4, %v1798_v46  ;;  %4792 = vmatmul.mubr.msk.f32.gmra.mrb[22].mxu0 %vm1958_vm7, %v1937_v61 }
 0x345   : > { %1906 = vst.msk [vmem:[#allocation4 + $0xd6] sm:$0xff] %vm1865_vm5, %v1800_v16 }
 0x347   : > { %v1802_v5 = vpop.permute.xlu1 %1801  ;;  %v1938_v50 = vld [vmem:[#allocation4 + $0xc0] sm:$0xff]  ;;  %v1804_v17 = vpop.permute.xlu0 %1803 }
 0x348   : > { %1907 = vst.msk [vmem:[#allocation4 + $0xde] sm:$0x3] %vm1867_vm6, %v1802_v5  ;;  %4794 = vmatprep.mubr.msk.f32.mxu0 %vm1958_vm7, %v1938_v50  ;;  %v1939_v54 = vld [vmem:[#allocation4 + $0xc8] sm:$0xff] }
 0x349   : > { %1908 = vst.msk [vmem:[#allocation4 + $0xde] sm:$0xfc] %vm1863_vm4, %v1804_v17  ;;  %4795 = vmatmul.mubr.msk.f32.gmra.mrb[24].mxu0 %vm1958_vm7, %v1939_v54 }
 0x34b   : > { %v1806_v7 = vpop.permute.xlu1 %1805  ;;  %v1808_v51 = vpop.permute.xlu0 %1807 }
 0x34c   : > { %1909 = vst.msk [vmem:[#allocation4 + $0xe6] sm:$0xff] %vm1865_vm5, %v1806_v7  ;;  %v1940_v18 = vld [vmem:[#allocation4 + $0xd0] sm:$0xff] }
 0x34d   : > { %1910 = vst.msk [vmem:[#allocation4 + $0xee] sm:$0x3] %vm1867_vm6, %v1808_v51  ;;  %4797 = vmatprep.mubr.msk.f32.mxu0 %vm1958_vm7, %v1940_v18 }
 0x34f   : > { %v1941_v26 = vld [vmem:[#allocation4 + $0xd8] sm:$0xff]  ;;  %v1810_v0 = vpop.permute.xlu1 %1809  ;;  %v1812_v31 = vpop.permute.xlu0 %1811 }
 0x350   : > { %4798 = vmatmul.mubr.msk.f32.gmra.mrb[26].mxu0 %vm1958_vm7, %v1941_v26  ;;  %1911 = vst.msk [vmem:[#allocation4 + $0xee] sm:$0xfc] %vm1863_vm4, %v1810_v0 }
 0x351   : > { %1912 = vst.msk [vmem:[#allocation4 + $0xf6] sm:$0xff] %vm1865_vm5, %v1812_v31 }
 0x353   : > { %v1942_v27 = vld [vmem:[#allocation4 + $0xe0] sm:$0xff]  ;;  %v1814_v32 = vpop.permute.xlu1 %1813 }
 0x354   : > { %4800 = vmatprep.mubr.msk.f32.mxu0 %vm1958_vm7, %v1942_v27  ;;  %v1943_v10 = vld [vmem:[#allocation4 + $0xe8] sm:$0xff]  ;;  %1913 = vst.msk [vmem:[#allocation4 + $0xfe] sm:$0x3] %vm1867_vm6, %v1814_v32 }
 0x355   : > { %4801 = vmatmul.mubr.msk.f32.gmra.mrb[28].mxu0 %vm1958_vm7, %v1943_v10 }
 0x358   : > { %v1944_v33 = vld [vmem:[#allocation4 + $0xf0] sm:$0xff] }
 0x359   : > { %4803 = vmatprep.mubr.msk.f32.mxu0 %vm1958_vm7, %v1944_v33 }
 0x35b   : > { %v1945_v9 = vld [vmem:[#allocation4 + $0xf8] sm:$0xff] }
 0x35c   : > { %4804 = vmatmul.mubr.msk.f32.gmra.mrb[30].mxu0 %vm1958_vm7, %v1945_v9 }
 0x37b   : > { %v2604_v34 = vpop.permute.xlu0 %2603 }
 0x37c   : > { %2748 = vst.msk [vmem:[#allocation5 - $0x1] sm:$0xfe] %vm2747_vm10, %v2604_v34  ;;  %v2606_v35 = vpop.permute.xlu1 %2605 }
 0x37d   : > { %2750 = vst.msk [vmem:[#allocation5 + $0x7] sm:$0xff] %vm2749_vm12, %v2606_v35 }
 0x37f   : > { %v2608_v19 = vpop.permute.xlu0 %2607 }
 0x380   : > { %2752 = vst.msk [vmem:[#allocation5 + $0xf] sm:$0x1] %vm2751_vm11, %v2608_v19 }
 0x3d4   : > { %v4760_v41 = vpop.f32.mrb[0].mxu0 }
 0x3d5   : > { %v2131_v37 = vadd.f32 %v4760_v41, %v6648_v36  ;;  %v2125_v38 = vpop.f32.mrb[1].mxu0 }
 0x3d6   : > { %v2126_v47 = vadd.f32 %v6648_v36, %v2125_v38 }
 0x3d7   : > { %vm2285_vm13 = vcmp.ge.f32.partialorder %v2131_v37, 0.0  ;;  %v2317_v39 = vmul.f32 0.01, %v2131_v37 }
 0x3d8   : > { %vm2284_vm14 = vcmp.ge.f32.partialorder %v2126_v47, 0.0  ;;  %v2316_v40 = vmul.f32 0.01, %v2126_v47 }
 0x3d9   : > { %v2349_v49 = vsel %vm2285_vm13, %v2131_v37, %v2317_v39 }
 0x3da   : > { %2438 = vst.msk [vmem:[#allocation3 + $0x21] sm:$0xff] %vm2380_vm8, %v2349_v49  ;;  %v2348_v42 = vsel %vm2284_vm14, %v2126_v47, %v2316_v40 }
 0x3db   : > { %v4763_v43 = vpop.f32.mrb[2].mxu0  ;;  %2437 = vst.msk [vmem:[#allocation3 + $0x19] sm:$0xff] %vm2380_vm8, %v2348_v42 }
 0x3dc   : > { %v2141_v52 = vadd.f32 %v4763_v43, %v6648_v36  ;;  %v2135_v44 = vpop.f32.mrb[3].mxu0 }
 0x3dd   : > { %v2136_v45 = vadd.f32 %v6648_v36, %v2135_v44 }
 0x3de   : > { %vm2287_vm15 = vcmp.ge.f32.partialorder %v2141_v52, 0.0  ;;  %v2319_v53 = vmul.f32 0.01, %v2141_v52 }
 0x3df   : > { %vm2286_vm0 = vcmp.ge.f32.partialorder %v2136_v45, 0.0  ;;  %v2318_v57 = vmul.f32 0.01, %v2136_v45 }
 0x3e0   : > { %v2351_v58 = vsel %vm2287_vm15, %v2141_v52, %v2319_v53  ;;  %v4766_v59 = vpop.f32.mrb[4].mxu0 }
 0x3e1   : > { %2440 = vst.msk [vmem:[#allocation3 + $0x39] sm:$0xff] %vm2380_vm8, %v2351_v58  ;;  %v2350_v25 = vsel %vm2286_vm0, %v2136_v45, %v2318_v57  ;;  %v2151_v60 = vadd.f32 %v4766_v59, %v6648_v36  ;;  %v2145_v21 = vpop.f32.mrb[5].mxu0  ;;  %v6675_v11 = vld [vmem:[#allocation3 + $0x28] sm:$0x3] }
 0x3e2   : > { %2439 = vst.msk [vmem:[#allocation3 + $0x31] sm:$0xff] %vm2380_vm8, %v2350_v25  ;;  %v2146_v62 = vadd.f32 %v6648_v36, %v2145_v21  ;;  %v6662_v63 = vld [vmem:[#allocation3 + $0x20] sm:$0xff]  ;;  %v6664_v20 = vld [vmem:[#allocation3 + $0x18] sm:$0xff] }
 0x3e3   : > { %vm2289_vm1 = vcmp.ge.f32.partialorder %v2151_v60, 0.0  ;;  %v2321_v1 = vmul.f32 0.01, %v2151_v60  ;;  %2611 = vrot.lane.b32.xlu0 %v6662_v63, %s4974_s26  ;;  %2526 = vst.msk [vmem:[#allocation5 + $0x18] sm:$0xff] %vm2380_vm8, %v6662_v63  ;;  %2609 = vrot.lane.b32.xlu1 %v6664_v20, %s4974_s26  ;;  %2525 = vst.msk [vmem:[#allocation5 + $0x10] sm:$0xff] %vm2380_vm8, %v6664_v20 }
 0x3e4   : > { %vm2288_vm2 = vcmp.ge.f32.partialorder %v2146_v62, 0.0  ;;  %v2320_v2 = vmul.f32 0.01, %v2146_v62 }
 0x3e5   : > { %v2353_v23 = vsel %vm2289_vm1, %v2151_v60, %v2321_v1 }
 0x3e6   : > { %2442 = vst.msk [vmem:[#allocation3 + $0x51] sm:$0xff] %vm2380_vm8, %v2353_v23  ;;  %v2352_v3 = vsel %vm2288_vm2, %v2146_v62, %v2320_v2 }
 0x3e7   : > { %v4769_v4 = vpop.f32.mrb[6].mxu0  ;;  %2441 = vst.msk [vmem:[#allocation3 + $0x49] sm:$0xff] %vm2380_vm8, %v2352_v3  ;;  %2613 = vrot.lane.b32.xlu1 %v6675_v11, %s4974_s26 }
 0x3e8   : > { %v2161_v28 = vadd.f32 %v4769_v4, %v6648_v36  ;;  %v2155_v12 = vpop.f32.mrb[7].mxu0  ;;  %v6695_v56 = vld [vmem:[#allocation3 + $0x40] sm:$0x3] }
 0x3e9   : > { %v2156_v8 = vadd.f32 %v6648_v36, %v2155_v12  ;;  %v6682_v13 = vld [vmem:[#allocation3 + $0x30] sm:$0xff]  ;;  %v6684_v24 = vld [vmem:[#allocation3 + $0x38] sm:$0xff] }
 0x3ea   : > { %vm2291_vm3 = vcmp.ge.f32.partialorder %v2161_v28, 0.0  ;;  %v2323_v48 = vmul.f32 0.01, %v2161_v28  ;;  %2615 = vrot.lane.b32.xlu0 %v6682_v13, %s4974_s26  ;;  %2527 = vst.msk [vmem:[#allocation5 + $0x20] sm:$0xff] %vm2380_vm8, %v6682_v13  ;;  %2528 = vst.msk [vmem:[#allocation5 + $0x28] sm:$0xff] %vm2380_vm8, %v6684_v24 }
 0x3eb   : > { %vm2290_vm4 = vcmp.ge.f32.partialorder %v2156_v8, 0.0  ;;  %v2322_v14 = vmul.f32 0.01, %v2156_v8  ;;  %2617 = vrot.lane.b32.xlu1 %v6684_v24, %s4974_s26 }
 0x3ec   : > { %v2355_v6 = vsel %vm2291_vm3, %v2161_v28, %v2323_v48  ;;  %v4772_v22 = vpop.f32.mrb[8].mxu0 }
 0x3ed   : > { %2444 = vst.msk [vmem:[#allocation3 + $0x69] sm:$0xff] %vm2380_vm8, %v2355_v6  ;;  %v2354_v15 = vsel %vm2290_vm4, %v2156_v8, %v2322_v14  ;;  %v2171_v46 = vadd.f32 %v4772_v22, %v6648_v36  ;;  %v2165_v61 = vpop.f32.mrb[9].mxu0  ;;  %v6715_v26 = vld [vmem:[#allocation3 + $0x58] sm:$0x3] }
 0x3ee   : > { %2443 = vst.msk [vmem:[#allocation3 + $0x61] sm:$0xff] %vm2380_vm8, %v2354_v15  ;;  %2619 = vrot.lane.b32.xlu0 %v6695_v56, %s4974_s26  ;;  %v2166_v16 = vadd.f32 %v6648_v36, %v2165_v61  ;;  %v6702_v5 = vld [vmem:[#allocation3 + $0x48] sm:$0xff]  ;;  %v6704_v50 = vld [vmem:[#allocation3 + $0x50] sm:$0xff] }
 0x3ef   : > { %vm2293_vm5 = vcmp.ge.f32.partialorder %v2171_v46, 0.0  ;;  %v2325_v17 = vmul.f32 0.01, %v2171_v46  ;;  %2621 = vrot.lane.b32.xlu1 %v6702_v5, %s4974_s26  ;;  %2529 = vst.msk [vmem:[#allocation5 + $0x30] sm:$0xff] %vm2380_vm8, %v6702_v5  ;;  %2530 = vst.msk [vmem:[#allocation5 + $0x38] sm:$0xff] %vm2380_vm8, %v6704_v50 }
 0x3f0   : > { %vm2292_vm6 = vcmp.ge.f32.partialorder %v2166_v16, 0.0  ;;  %v2324_v54 = vmul.f32 0.01, %v2166_v16 }
 0x3f1   : > { %v2357_v7 = vsel %vm2293_vm5, %v2171_v46, %v2325_v17 }
 0x3f2   : > { %2623 = vrot.lane.b32.xlu0 %v6704_v50, %s4974_s26  ;;  %2446 = vst.msk [vmem:[#allocation3 + $0x81] sm:$0xff] %vm2380_vm8, %v2357_v7  ;;  %v2356_v51 = vsel %vm2292_vm6, %v2166_v16, %v2324_v54 }
 0x3f3   : > { %v4775_v18 = vpop.f32.mrb[10].mxu0  ;;  %2445 = vst.msk [vmem:[#allocation3 + $0x79] sm:$0xff] %vm2380_vm8, %v2356_v51  ;;  %2625 = vrot.lane.b32.xlu1 %v6715_v26, %s4974_s26 }
 0x3f4   : > { %v2181_v27 = vadd.f32 %v4775_v18, %v6648_v36  ;;  %v2175_v10 = vpop.f32.mrb[11].mxu0  ;;  %v6735_v41 = vld [vmem:[#allocation3 + $0x70] sm:$0x3] }
 0x3f5   : > { %v2176_v0 = vadd.f32 %v6648_v36, %v2175_v10  ;;  %v6722_v31 = vld [vmem:[#allocation3 + $0x60] sm:$0xff]  ;;  %v6724_v32 = vld [vmem:[#allocation3 + $0x68] sm:$0xff] }
 0x3f6   : > { %vm2295_vm7 = vcmp.ge.f32.partialorder %v2181_v27, 0.0  ;;  %v2327_v33 = vmul.f32 0.01, %v2181_v27  ;;  %2627 = vrot.lane.b32.xlu0 %v6722_v31, %s4974_s26  ;;  %2531 = vst.msk [vmem:[#allocation5 + $0x40] sm:$0xff] %vm2380_vm8, %v6722_v31  ;;  %2532 = vst.msk [vmem:[#allocation5 + $0x48] sm:$0xff] %vm2380_vm8, %v6724_v32 }
 0x3f7   : > { %vm2294_vm9 = vcmp.ge.f32.partialorder %v2176_v0, 0.0  ;;  %v2326_v9 = vmul.f32 0.01, %v2176_v0  ;;  %2629 = vrot.lane.b32.xlu1 %v6724_v32, %s4974_s26 }
 0x3f8   : > { %v2359_v34 = vsel %vm2295_vm7, %v2181_v27, %v2327_v33  ;;  %v4778_v35 = vpop.f32.mrb[12].mxu0 }
 0x3f9   : > { %2448 = vst.msk [vmem:[#allocation3 + $0x99] sm:$0xff] %vm2380_vm8, %v2359_v34  ;;  %v2358_v19 = vsel %vm2294_vm9, %v2176_v0, %v2326_v9  ;;  %v2191_v37 = vadd.f32 %v4778_v35, %v6648_v36  ;;  %v2185_v38 = vpop.f32.mrb[13].mxu0  ;;  %v6755_v45 = vld [vmem:[#allocation3 + $0x88] sm:$0x3] }
 0x3fa   : > { %2447 = vst.msk [vmem:[#allocation3 + $0x91] sm:$0xff] %vm2380_vm8, %v2358_v19  ;;  %2631 = vrot.lane.b32.xlu0 %v6735_v41, %s4974_s26  ;;  %v2186_v47 = vadd.f32 %v6648_v36, %v2185_v38  ;;  %v6742_v39 = vld [vmem:[#allocation3 + $0x78] sm:$0xff]  ;;  %v6744_v40 = vld [vmem:[#allocation3 + $0x80] sm:$0xff] }
 0x3fb   : > { %vm2297_vm13 = vcmp.ge.f32.partialorder %v2191_v37, 0.0  ;;  %v2329_v49 = vmul.f32 0.01, %v2191_v37  ;;  %2633 = vrot.lane.b32.xlu1 %v6742_v39, %s4974_s26  ;;  %2533 = vst.msk [vmem:[#allocation5 + $0x50] sm:$0xff] %vm2380_vm8, %v6742_v39  ;;  %2534 = vst.msk [vmem:[#allocation5 + $0x58] sm:$0xff] %vm2380_vm8, %v6744_v40 }
 0x3fc   : > { %vm2296_vm14 = vcmp.ge.f32.partialorder %v2186_v47, 0.0  ;;  %v2328_v42 = vmul.f32 0.01, %v2186_v47 }
 0x3fd   : > { %v2361_v43 = vsel %vm2297_vm13, %v2191_v37, %v2329_v49 }
 0x3fe   : > { %2635 = vrot.lane.b32.xlu0 %v6744_v40, %s4974_s26  ;;  %2450 = vst.msk [vmem:[#allocation3 + $0xb1] sm:$0xff] %vm2380_vm8, %v2361_v43  ;;  %v2360_v52 = vsel %vm2296_vm14, %v2186_v47, %v2328_v42 }
 0x3ff   : > { %v4781_v44 = vpop.f32.mrb[14].mxu0  ;;  %2449 = vst.msk [vmem:[#allocation3 + $0xa9] sm:$0xff] %vm2380_vm8, %v2360_v52  ;;  %2637 = vrot.lane.b32.xlu1 %v6755_v45, %s4974_s26 }
 0x400   : > { %v2201_v53 = vadd.f32 %v4781_v44, %v6648_v36  ;;  %v2195_v57 = vpop.f32.mrb[15].mxu0  ;;  %v6775_v23 = vld [vmem:[#allocation3 + $0xa0] sm:$0x3] }
 0x401   : > { %v2196_v58 = vadd.f32 %v6648_v36, %v2195_v57  ;;  %v6762_v25 = vld [vmem:[#allocation3 + $0x90] sm:$0xff]  ;;  %v6764_v59 = vld [vmem:[#allocation3 + $0x98] sm:$0xff] }
 0x402   : > { %vm2299_vm15 = vcmp.ge.f32.partialorder %v2201_v53, 0.0  ;;  %v2331_v60 = vmul.f32 0.01, %v2201_v53  ;;  %2639 = vrot.lane.b32.xlu0 %v6762_v25, %s4974_s26  ;;  %2535 = vst.msk [vmem:[#allocation5 + $0x60] sm:$0xff] %vm2380_vm8, %v6762_v25  ;;  %2536 = vst.msk [vmem:[#allocation5 + $0x68] sm:$0xff] %vm2380_vm8, %v6764_v59 }
 0x403   : > { %vm2298_vm0 = vcmp.ge.f32.partialorder %v2196_v58, 0.0  ;;  %v2330_v21 = vmul.f32 0.01, %v2196_v58  ;;  %2641 = vrot.lane.b32.xlu1 %v6764_v59, %s4974_s26 }
 0x404   : > { %v2363_v62 = vsel %vm2299_vm15, %v2201_v53, %v2331_v60  ;;  %v4784_v2 = vpop.f32.mrb[16].mxu0 }
 0x405   : > { %2452 = vst.msk [vmem:[#allocation3 + $0xc9] sm:$0xff] %vm2380_vm8, %v2363_v62  ;;  %v2362_v1 = vsel %vm2298_vm0, %v2196_v58, %v2330_v21  ;;  %v2211_v3 = vadd.f32 %v4784_v2, %v6648_v36  ;;  %v2205_v4 = vpop.f32.mrb[17].mxu0  ;;  %v6795_v46 = vld [vmem:[#allocation3 + $0xb8] sm:$0x3] }
 0x406   : > { %2451 = vst.msk [vmem:[#allocation3 + $0xc1] sm:$0xff] %vm2380_vm8, %v2362_v1  ;;  %2643 = vrot.lane.b32.xlu0 %v6775_v23, %s4974_s26  ;;  %v2206_v28 = vadd.f32 %v6648_v36, %v2205_v4  ;;  %v6782_v12 = vld [vmem:[#allocation3 + $0xa8] sm:$0xff]  ;;  %v6784_v8 = vld [vmem:[#allocation3 + $0xb0] sm:$0xff] }
 0x407   : > { %vm2301_vm1 = vcmp.ge.f32.partialorder %v2211_v3, 0.0  ;;  %v2333_v48 = vmul.f32 0.01, %v2211_v3  ;;  %2645 = vrot.lane.b32.xlu1 %v6782_v12, %s4974_s26  ;;  %2537 = vst.msk [vmem:[#allocation5 + $0x70] sm:$0xff] %vm2380_vm8, %v6782_v12  ;;  %2538 = vst.msk [vmem:[#allocation5 + $0x78] sm:$0xff] %vm2380_vm8, %v6784_v8 }
 0x408   : > { %vm2300_vm2 = vcmp.ge.f32.partialorder %v2206_v28, 0.0  ;;  %v2332_v14 = vmul.f32 0.01, %v2206_v28 }
 0x409   : > { %v2365_v6 = vsel %vm2301_vm1, %v2211_v3, %v2333_v48 }
 0x40a   : > { %2647 = vrot.lane.b32.xlu0 %v6784_v8, %s4974_s26  ;;  %2454 = vst.msk [vmem:[#allocation3 + $0xe1] sm:$0xff] %vm2380_vm8, %v2365_v6  ;;  %v2364_v15 = vsel %vm2300_vm2, %v2206_v28, %v2332_v14 }
 0x40b   : > { %v4787_v22 = vpop.f32.mrb[18].mxu0  ;;  %2453 = vst.msk [vmem:[#allocation3 + $0xd9] sm:$0xff] %vm2380_vm8, %v2364_v15  ;;  %2649 = vrot.lane.b32.xlu1 %v6795_v46, %s4974_s26 }
 0x40c   : > { %v2221_v61 = vadd.f32 %v4787_v22, %v6648_v36  ;;  %v2215_v16 = vpop.f32.mrb[19].mxu0  ;;  %v6815_v33 = vld [vmem:[#allocation3 + $0xd0] sm:$0x3] }
 0x40d   : > { %v2216_v17 = vadd.f32 %v6648_v36, %v2215_v16  ;;  %v6802_v54 = vld [vmem:[#allocation3 + $0xc0] sm:$0xff]  ;;  %v6804_v7 = vld [vmem:[#allocation3 + $0xc8] sm:$0xff] }
 0x40e   : > { %vm2303_vm3 = vcmp.ge.f32.partialorder %v2221_v61, 0.0  ;;  %v2335_v51 = vmul.f32 0.01, %v2221_v61  ;;  %2651 = vrot.lane.b32.xlu0 %v6802_v54, %s4974_s26  ;;  %2539 = vst.msk [vmem:[#allocation5 + $0x80] sm:$0xff] %vm2380_vm8, %v6802_v54  ;;  %2540 = vst.msk [vmem:[#allocation5 + $0x88] sm:$0xff] %vm2380_vm8, %v6804_v7 }
 0x40f   : > { %vm2302_vm4 = vcmp.ge.f32.partialorder %v2216_v17, 0.0  ;;  %v2334_v18 = vmul.f32 0.01, %v2216_v17  ;;  %2653 = vrot.lane.b32.xlu1 %v6804_v7, %s4974_s26 }
 0x410   : > { %v2367_v27 = vsel %vm2303_vm3, %v2221_v61, %v2335_v51  ;;  %v4790_v0 = vpop.f32.mrb[20].mxu0 }
 0x411   : > { %2456 = vst.msk [vmem:[#allocation3 + $0xf9] sm:$0xff] %vm2380_vm8, %v2367_v27  ;;  %v2366_v10 = vsel %vm2302_vm4, %v2216_v17, %v2334_v18  ;;  %v2231_v9 = vadd.f32 %v4790_v0, %v6648_v36  ;;  %v2225_v34 = vpop.f32.mrb[21].mxu0  ;;  %v6835_v52 = vld [vmem:[#allocation3 + $0xe8] sm:$0x3] }
 0x412   : > { %2455 = vst.msk [vmem:[#allocation3 + $0xf1] sm:$0xff] %vm2380_vm8, %v2366_v10  ;;  %2655 = vrot.lane.b32.xlu0 %v6815_v33, %s4974_s26  ;;  %v2226_v19 = vadd.f32 %v6648_v36, %v2225_v34  ;;  %v6822_v35 = vld [vmem:[#allocation3 + $0xd8] sm:$0xff]  ;;  %v6824_v37 = vld [vmem:[#allocation3 + $0xe0] sm:$0xff] }
 0x413   : > { %vm2305_vm5 = vcmp.ge.f32.partialorder %v2231_v9, 0.0  ;;  %v2337_v38 = vmul.f32 0.01, %v2231_v9  ;;  %2657 = vrot.lane.b32.xlu1 %v6822_v35, %s4974_s26  ;;  %2541 = vst.msk [vmem:[#allocation5 + $0x90] sm:$0xff] %vm2380_vm8, %v6822_v35  ;;  %2542 = vst.msk [vmem:[#allocation5 + $0x98] sm:$0xff] %vm2380_vm8, %v6824_v37 }
 0x414   : > { %vm2304_vm6 = vcmp.ge.f32.partialorder %v2226_v19, 0.0  ;;  %v2336_v47 = vmul.f32 0.01, %v2226_v19 }
 0x415   : > { %v2369_v49 = vsel %vm2305_vm5, %v2231_v9, %v2337_v38  ;;  %vm2942_vm5 = vcmask 195714  }
 0x416   : > { %2659 = vrot.lane.b32.xlu0 %v6824_v37, %s4974_s26  ;;  %2458 = vst.msk [vmem:[#allocation3 + $0x111] sm:$0xff] %vm2380_vm8, %v2369_v49  ;;  %v2368_v42 = vsel %vm2304_vm6, %v2226_v19, %v2336_v47  ;;  %vm2944_vm6 = vcmask 195712  }
 0x417   : > { %v4793_v43 = vpop.f32.mrb[22].mxu0  ;;  %2457 = vst.msk [vmem:[#allocation3 + $0x109] sm:$0xff] %vm2380_vm8, %v2368_v42  ;;  %2661 = vrot.lane.b32.xlu1 %v6835_v52, %s4974_s26 }
 0x418   : > { %v2241_v44 = vadd.f32 %v4793_v43, %v6648_v36  ;;  %v2235_v53 = vpop.f32.mrb[23].mxu0  ;;  %v6855_v4 = vld [vmem:[#allocation3 + $0x100] sm:$0x3] }
 0x419   : > { %v2236_v57 = vadd.f32 %v6648_v36, %v2235_v53  ;;  %v6842_v58 = vld [vmem:[#allocation3 + $0xf0] sm:$0xff]  ;;  %v6844_v60 = vld [vmem:[#allocation3 + $0xf8] sm:$0xff] }
 0x41a   : > { %vm2307_vm7 = vcmp.ge.f32.partialorder %v2241_v44, 0.0  ;;  %v2339_v21 = vmul.f32 0.01, %v2241_v44  ;;  %2663 = vrot.lane.b32.xlu0 %v6842_v58, %s4974_s26  ;;  %2543 = vst.msk [vmem:[#allocation5 + $0xa0] sm:$0xff] %vm2380_vm8, %v6842_v58  ;;  %2544 = vst.msk [vmem:[#allocation5 + $0xa8] sm:$0xff] %vm2380_vm8, %v6844_v60 }
 0x41b   : > { %vm2306_vm9 = vcmp.ge.f32.partialorder %v2236_v57, 0.0  ;;  %v2338_v62 = vmul.f32 0.01, %v2236_v57  ;;  %2665 = vrot.lane.b32.xlu1 %v6844_v60, %s4974_s26 }
 0x41c   : > { %v2371_v1 = vsel %vm2307_vm7, %v2241_v44, %v2339_v21  ;;  %v4796_v3 = vpop.f32.mrb[24].mxu0  ;;  %vm3271_vm7 = vcmask 326912  }
 0x41d   : > { %2460 = vst.msk [vmem:[#allocation3 + $0x129] sm:$0xff] %vm2380_vm8, %v2371_v1  ;;  %v2370_v2 = vsel %vm2306_vm9, %v2236_v57, %v2338_v62  ;;  %v2251_v28 = vadd.f32 %v4796_v3, %v6648_v36  ;;  %v2245_v48 = vpop.f32.mrb[25].mxu0  ;;  %v6875_v18 = vld [vmem:[#allocation3 + $0x118] sm:$0x3]  ;;  %vm3273_vm9 = vcmask 319744  }
 0x41e   : > { %2459 = vst.msk [vmem:[#allocation3 + $0x121] sm:$0xff] %vm2380_vm8, %v2370_v2  ;;  %2667 = vrot.lane.b32.xlu0 %v6855_v4, %s4974_s26  ;;  %v2246_v14 = vadd.f32 %v6648_v36, %v2245_v48  ;;  %v6862_v6 = vld [vmem:[#allocation3 + $0x108] sm:$0xff]  ;;  %v6864_v15 = vld [vmem:[#allocation3 + $0x110] sm:$0xff] }
 0x41f   : > { %vm2309_vm13 = vcmp.ge.f32.partialorder %v2251_v28, 0.0  ;;  %v2341_v22 = vmul.f32 0.01, %v2251_v28  ;;  %2669 = vrot.lane.b32.xlu1 %v6862_v6, %s4974_s26  ;;  %2545 = vst.msk [vmem:[#allocation5 + $0xb0] sm:$0xff] %vm2380_vm8, %v6862_v6  ;;  %2546 = vst.msk [vmem:[#allocation5 + $0xb8] sm:$0xff] %vm2380_vm8, %v6864_v15 }
 0x420   : > { %vm2308_vm14 = vcmp.ge.f32.partialorder %v2246_v14, 0.0  ;;  %v2340_v61 = vmul.f32 0.01, %v2246_v14 }
 0x421   : > { %v2373_v16 = vsel %vm2309_vm13, %v2251_v28, %v2341_v22  ;;  %vm3464_vm13 = vcmask 392514  }
 0x422   : > { %2671 = vrot.lane.b32.xlu0 %v6864_v15, %s4974_s26  ;;  %2462 = vst.msk [vmem:[#allocation3 + $0x141] sm:$0xff] %vm2380_vm8, %v2373_v16  ;;  %v2372_v17 = vsel %vm2308_vm14, %v2246_v14, %v2340_v61  ;;  %vm3466_vm14 = vcmask 392512  }
 0x423   : > { %v4799_v51 = vpop.f32.mrb[26].mxu0  ;;  %2461 = vst.msk [vmem:[#allocation3 + $0x139] sm:$0xff] %vm2380_vm8, %v2372_v17  ;;  %2673 = vrot.lane.b32.xlu1 %v6875_v18, %s4974_s26 }
 0x424   : > { %v2261_v27 = vadd.f32 %v4799_v51, %v6648_v36  ;;  %v2255_v10 = vpop.f32.mrb[27].mxu0  ;;  %v6895_v43 = vld [vmem:[#allocation3 + $0x130] sm:$0x3] }
 0x425   : > { %v2256_v0 = vadd.f32 %v6648_v36, %v2255_v10  ;;  %v6882_v9 = vld [vmem:[#allocation3 + $0x120] sm:$0xff]  ;;  %v6884_v34 = vld [vmem:[#allocation3 + $0x128] sm:$0xff] }
 0x426   : > { %vm2311_vm15 = vcmp.ge.f32.partialorder %v2261_v27, 0.0  ;;  %v2343_v19 = vmul.f32 0.01, %v2261_v27  ;;  %2675 = vrot.lane.b32.xlu0 %v6882_v9, %s4974_s26  ;;  %2547 = vst.msk [vmem:[#allocation5 + $0xc0] sm:$0xff] %vm2380_vm8, %v6882_v9  ;;  %2548 = vst.msk [vmem:[#allocation5 + $0xc8] sm:$0xff] %vm2380_vm8, %v6884_v34 }
 0x427   : > { %vm2310_vm0 = vcmp.ge.f32.partialorder %v2256_v0, 0.0  ;;  %v2342_v38 = vmul.f32 0.01, %v2256_v0  ;;  %2677 = vrot.lane.b32.xlu1 %v6884_v34, %s4974_s26 }
 0x428   : > { %v2375_v47 = vsel %vm2311_vm15, %v2261_v27, %v2343_v19  ;;  %v4802_v42 = vpop.f32.mrb[28].mxu0  ;;  %vm3468_vm15 = vcmask 386368  }
 0x429   : > { %2464 = vst.msk [vmem:[#allocation3 + $0x159] sm:$0xff] %vm2380_vm8, %v2375_v47  ;;  %v2374_v49 = vsel %vm2310_vm0, %v2256_v0, %v2342_v38  ;;  %v2271_v44 = vadd.f32 %v4802_v42, %v6648_v36  ;;  %v2265_v53 = vpop.f32.mrb[29].mxu0  ;;  %v6915_v48 = vld [vmem:[#allocation3 + $0x148] sm:$0x3]  ;;  %vm3613_vm0 = vcmask 458112  }
 0x42a   : > { %2463 = vst.msk [vmem:[#allocation3 + $0x151] sm:$0xff] %vm2380_vm8, %v2374_v49  ;;  %2679 = vrot.lane.b32.xlu0 %v6895_v43, %s4974_s26  ;;  %v2266_v57 = vadd.f32 %v6648_v36, %v2265_v53  ;;  %v6902_v21 = vld [vmem:[#allocation3 + $0x138] sm:$0xff]  ;;  %v6904_v62 = vld [vmem:[#allocation3 + $0x140] sm:$0xff] }
 0x42b   : > { %vm2313_vm1 = vcmp.ge.f32.partialorder %v2271_v44, 0.0  ;;  %v2345_v1 = vmul.f32 0.01, %v2271_v44  ;;  %2681 = vrot.lane.b32.xlu1 %v6902_v21, %s4974_s26  ;;  %2549 = vst.msk [vmem:[#allocation5 + $0xd0] sm:$0xff] %vm2380_vm8, %v6902_v21  ;;  %2550 = vst.msk [vmem:[#allocation5 + $0xd8] sm:$0xff] %vm2380_vm8, %v6904_v62 }
 0x42c   : > { %vm2312_vm2 = vcmp.ge.f32.partialorder %v2266_v57, 0.0  ;;  %v2344_v2 = vmul.f32 0.01, %v2266_v57 }
 0x42d   : > { %v2377_v3 = vsel %vm2313_vm1, %v2271_v44, %v2345_v1  ;;  %vm3791_vm1 = vcmask 523713  }
 0x42e   : > { %2683 = vrot.lane.b32.xlu0 %v6904_v62, %s4974_s26  ;;  %2466 = vst.msk [vmem:[#allocation3 + $0x171] sm:$0xff] %vm2380_vm8, %v2377_v3  ;;  %v2376_v28 = vsel %vm2312_vm2, %v2266_v57, %v2344_v2  ;;  %vm3793_vm2 = vcmask 523712  }
 0x42f   : > { %2465 = vst.msk [vmem:[#allocation3 + $0x169] sm:$0xff] %vm2380_vm8, %v2376_v28  ;;  %2685 = vrot.lane.b32.xlu1 %v6915_v48, %s4974_s26  ;;  %v4805_v27 = vpop.f32.mrb[30].mxu0 }
 0x430   : > { %v6932_v61 = vld [vmem:[#allocation3 + $0x160] sm:$0x3]  ;;  %v2275_v10 = vpop.f32.mrb[31].mxu0 }
 0x431   : > { %v6920_v14 = vld [vmem:[#allocation3 + $0x150] sm:$0xff]  ;;  %v6922_v22 = vld [vmem:[#allocation3 + $0x158] sm:$0xff] }
 0x432   : > { %2687 = vrot.lane.b32.xlu0 %v6920_v14, %s4974_s26  ;;  %2551 = vst.msk [vmem:[#allocation5 + $0xe0] sm:$0xff] %vm2380_vm8, %v6920_v14  ;;  %2552 = vst.msk [vmem:[#allocation5 + $0xe8] sm:$0xff] %vm2380_vm8, %v6922_v22 }
 0x433   : > { %2689 = vrot.lane.b32.xlu1 %v6922_v22, %s4974_s26 }
 0x435   : > { %v6948_v51 = vld [vmem:[#allocation3 + $0x178] sm:$0x3] }
 0x436   : > { %2691 = vrot.lane.b32.xlu0 %v6932_v61, %s4974_s26  ;;  %v6936_v16 = vld [vmem:[#allocation3 + $0x168] sm:$0xff]  ;;  %v6938_v17 = vld [vmem:[#allocation3 + $0x170] sm:$0xff] }
 0x437   : > { %2693 = vrot.lane.b32.xlu1 %v6936_v16, %s4974_s26  ;;  %2553 = vst.msk [vmem:[#allocation5 + $0xf0] sm:$0xff] %vm2380_vm8, %v6936_v16  ;;  %2554 = vst.msk [vmem:[#allocation5 + $0xf8] sm:$0xff] %vm2380_vm8, %v6938_v17 }
 0x43a   : > { %2695 = vrot.lane.b32.xlu0 %v6938_v17, %s4974_s26 }
 0x43b   : > { %2697 = vrot.lane.b32.xlu1 %v6948_v51, %s4974_s26 }
 0x43e   : > { %2798 = vrot.lane.b32.xlu0 %v6623_v29, %s4976_s28  ;;  %v2281_v29 = vadd.f32 %v4805_v27, %v6648_v36 }
 0x43f   : > { %2800 = vrot.lane.b32.xlu1 %v6631_v55, %s4976_s28  ;;  %v2276_v55 = vadd.f32 %v6648_v36, %v2275_v10 }
 0x440   : > { %vm2315_vm3 = vcmp.ge.f32.partialorder %v2281_v29, 0.0 }
 0x441   : > { %vm2314_vm4 = vcmp.ge.f32.partialorder %v2276_v55, 0.0  ;;  %v2346_v0 = vmul.f32 0.01, %v2276_v55 }
 0x442   : > { %2802 = vrot.lane.b32.xlu0 %v6629_v30, %s4976_s28  ;;  %v2347_v30 = vmul.f32 0.01, %v2281_v29 }
 0x443   : > { %2804 = vrot.lane.b32.xlu1 %v6664_v20, %s4976_s28  ;;  %v2378_v38 = vsel %vm2314_vm4, %v2276_v55, %v2346_v0  ;;  %vm3986_vm4 = vcmask 589314  }
 0x444   : > { %v2379_v19 = vsel %vm2315_vm3, %v2281_v29, %v2347_v30  ;;  %2467 = vst.msk [vmem:[#allocation3 + $0x181] sm:$0xff] %vm2380_vm8, %v2378_v38  ;;  %vm3795_vm3 = vcmask 516544  }
 0x445   : > { %2468 = vst.msk [vmem:[#allocation3 + $0x189] sm:$0xff] %vm2380_vm8, %v2379_v19 }
 0x446   : > { %2806 = vrot.lane.b32.xlu0 %v6662_v63, %s4976_s28 }
 0x447   : > { %2808 = vrot.lane.b32.xlu1 %v6675_v11, %s4976_s28 }
 0x44a   : > { %2810 = vrot.lane.b32.xlu0 %v6682_v13, %s4976_s28 }
 0x44b   : > { %2812 = vrot.lane.b32.xlu1 %v6684_v24, %s4976_s28 }
 0x44e   : > { %2814 = vrot.lane.b32.xlu0 %v6695_v56, %s4976_s28 }
 0x44f   : > { %2816 = vrot.lane.b32.xlu1 %v6702_v5, %s4976_s28 }
 0x452   : > { %2818 = vrot.lane.b32.xlu0 %v6704_v50, %s4976_s28 }
 0x453   : > { %2820 = vrot.lane.b32.xlu1 %v6715_v26, %s4976_s28 }
 0x455   : > { %v2612_v36 = vpop.permute.xlu0 %2611  ;;  %v2610_v47 = vpop.permute.xlu1 %2609 }
 0x456   : > { %2822 = vrot.lane.b32.xlu0 %v6722_v31, %s4976_s28  ;;  %2754 = vst.msk [vmem:[#allocation5 + $0x17] sm:$0xff] %vm2749_vm12, %v2612_v36 }
 0x457   : > { %2753 = vst.msk [vmem:[#allocation5 + $0xf] sm:$0xfe] %vm2747_vm10, %v2610_v47  ;;  %2824 = vrot.lane.b32.xlu1 %v6724_v32, %s4976_s28 }
 0x459   : > { %v2614_v49 = vpop.permute.xlu1 %2613 }
 0x45a   : > { %2826 = vrot.lane.b32.xlu0 %v6735_v41, %s4976_s28  ;;  %2755 = vst.msk [vmem:[#allocation5 + $0x1f] sm:$0x1] %vm2751_vm11, %v2614_v49 }
 0x45b   : > { %2828 = vrot.lane.b32.xlu1 %v6742_v39, %s4976_s28 }
 0x45c   : > { %v2616_v42 = vpop.permute.xlu0 %2615 }
 0x45d   : > { %2756 = vst.msk [vmem:[#allocation5 + $0x1f] sm:$0xfe] %vm2747_vm10, %v2616_v42  ;;  %v2618_v44 = vpop.permute.xlu1 %2617 }
 0x45e   : > { %2830 = vrot.lane.b32.xlu0 %v6744_v40, %s4976_s28  ;;  %2757 = vst.msk [vmem:[#allocation5 + $0x27] sm:$0xff] %vm2749_vm12, %v2618_v44 }
 0x45f   : > { %2832 = vrot.lane.b32.xlu1 %v6755_v45, %s4976_s28 }
 0x460   : > { %v2620_v53 = vpop.permute.xlu0 %2619 }
 0x461   : > { %2758 = vst.msk [vmem:[#allocation5 + $0x2f] sm:$0x1] %vm2751_vm11, %v2620_v53  ;;  %v2622_v57 = vpop.permute.xlu1 %2621 }
 0x462   : > { %2834 = vrot.lane.b32.xlu0 %v6762_v25, %s4976_s28  ;;  %2759 = vst.msk [vmem:[#allocation5 + $0x2f] sm:$0xfe] %vm2747_vm10, %v2622_v57 }
 0x463   : > { %2836 = vrot.lane.b32.xlu1 %v6764_v59, %s4976_s28 }
 0x464   : > { %v2624_v1 = vpop.permute.xlu0 %2623 }
 0x465   : > { %2760 = vst.msk [vmem:[#allocation5 + $0x37] sm:$0xff] %vm2749_vm12, %v2624_v1  ;;  %v2626_v2 = vpop.permute.xlu1 %2625 }
 0x466   : > { %2838 = vrot.lane.b32.xlu0 %v6775_v23, %s4976_s28  ;;  %2761 = vst.msk [vmem:[#allocation5 + $0x3f] sm:$0x1] %vm2751_vm11, %v2626_v2 }
 0x467   : > { %2840 = vrot.lane.b32.xlu1 %v6782_v12, %s4976_s28 }
 0x468   : > { %v2628_v3 = vpop.permute.xlu0 %2627 }
 0x469   : > { %2762 = vst.msk [vmem:[#allocation5 + $0x3f] sm:$0xfe] %vm2747_vm10, %v2628_v3  ;;  %v2630_v28 = vpop.permute.xlu1 %2629 }
 0x46a   : > { %2842 = vrot.lane.b32.xlu0 %v6784_v8, %s4976_s28  ;;  %2763 = vst.msk [vmem:[#allocation5 + $0x47] sm:$0xff] %vm2749_vm12, %v2630_v28 }
 0x46b   : > { %2844 = vrot.lane.b32.xlu1 %v6795_v46, %s4976_s28 }
 0x46c   : > { %v2632_v27 = vpop.permute.xlu0 %2631 }
 0x46d   : > { %2764 = vst.msk [vmem:[#allocation5 + $0x4f] sm:$0x1] %vm2751_vm11, %v2632_v27  ;;  %v2634_v29 = vpop.permute.xlu1 %2633 }
 0x46e   : > { %2846 = vrot.lane.b32.xlu0 %v6802_v54, %s4976_s28  ;;  %2765 = vst.msk [vmem:[#allocation5 + $0x4f] sm:$0xfe] %vm2747_vm10, %v2634_v29 }
 0x46f   : > { %2848 = vrot.lane.b32.xlu1 %v6804_v7, %s4976_s28 }
 0x470   : > { %v2636_v10 = vpop.permute.xlu0 %2635 }
 0x471   : > { %2766 = vst.msk [vmem:[#allocation5 + $0x57] sm:$0xff] %vm2749_vm12, %v2636_v10  ;;  %v2638_v55 = vpop.permute.xlu1 %2637 }
 0x472   : > { %2850 = vrot.lane.b32.xlu0 %v6815_v33, %s4976_s28  ;;  %2767 = vst.msk [vmem:[#allocation5 + $0x5f] sm:$0x1] %vm2751_vm11, %v2638_v55 }
 0x473   : > { %2852 = vrot.lane.b32.xlu1 %v6822_v35, %s4976_s28 }
 0x474   : > { %v2640_v30 = vpop.permute.xlu0 %2639 }
 0x475   : > { %2768 = vst.msk [vmem:[#allocation5 + $0x5f] sm:$0xfe] %vm2747_vm10, %v2640_v30  ;;  %v2642_v0 = vpop.permute.xlu1 %2641 }
 0x476   : > { %2854 = vrot.lane.b32.xlu0 %v6824_v37, %s4976_s28  ;;  %2769 = vst.msk [vmem:[#allocation5 + $0x67] sm:$0xff] %vm2749_vm12, %v2642_v0 }
 0x477   : > { %2856 = vrot.lane.b32.xlu1 %v6835_v52, %s4976_s28 }
 0x478   : > { %v2644_v19 = vpop.permute.xlu0 %2643 }
 0x479   : > { %2770 = vst.msk [vmem:[#allocation5 + $0x6f] sm:$0x1] %vm2751_vm11, %v2644_v19  ;;  %v2646_v38 = vpop.permute.xlu1 %2645 }
 0x47a   : > { %2858 = vrot.lane.b32.xlu0 %v6842_v58, %s4976_s28  ;;  %2771 = vst.msk [vmem:[#allocation5 + $0x6f] sm:$0xfe] %vm2747_vm10, %v2646_v38 }
 0x47b   : > { %2860 = vrot.lane.b32.xlu1 %v6844_v60, %s4976_s28 }
 0x47c   : > { %v2648_v36 = vpop.permute.xlu0 %2647 }
 0x47d   : > { %2772 = vst.msk [vmem:[#allocation5 + $0x77] sm:$0xff] %vm2749_vm12, %v2648_v36  ;;  %v2650_v47 = vpop.permute.xlu1 %2649 }
 0x47e   : > { %2862 = vrot.lane.b32.xlu0 %v6855_v4, %s4976_s28  ;;  %2773 = vst.msk [vmem:[#allocation5 + $0x7f] sm:$0x1] %vm2751_vm11, %v2650_v47 }
 0x47f   : > { %2864 = vrot.lane.b32.xlu1 %v6862_v6, %s4976_s28 }
 0x480   : > { %v2652_v49 = vpop.permute.xlu0 %2651 }
 0x481   : > { %2774 = vst.msk [vmem:[#allocation5 + $0x7f] sm:$0xfe] %vm2747_vm10, %v2652_v49  ;;  %v2654_v42 = vpop.permute.xlu1 %2653 }
 0x482   : > { %2866 = vrot.lane.b32.xlu0 %v6864_v15, %s4976_s28  ;;  %2775 = vst.msk [vmem:[#allocation5 + $0x87] sm:$0xff] %vm2749_vm12, %v2654_v42 }
 0x483   : > { %2868 = vrot.lane.b32.xlu1 %v6875_v18, %s4976_s28 }
 0x484   : > { %v2656_v44 = vpop.permute.xlu0 %2655 }
 0x485   : > { %2776 = vst.msk [vmem:[#allocation5 + $0x8f] sm:$0x1] %vm2751_vm11, %v2656_v44  ;;  %v2658_v53 = vpop.permute.xlu1 %2657 }
 0x486   : > { %2870 = vrot.lane.b32.xlu0 %v6882_v9, %s4976_s28  ;;  %2777 = vst.msk [vmem:[#allocation5 + $0x8f] sm:$0xfe] %vm2747_vm10, %v2658_v53 }
 0x487   : > { %2872 = vrot.lane.b32.xlu1 %v6884_v34, %s4976_s28 }
 0x488   : > { %v2660_v57 = vpop.permute.xlu0 %2659 }
 0x489   : > { %2778 = vst.msk [vmem:[#allocation5 + $0x97] sm:$0xff] %vm2749_vm12, %v2660_v57  ;;  %v2662_v1 = vpop.permute.xlu1 %2661 }
 0x48a   : > { %2874 = vrot.lane.b32.xlu0 %v6895_v43, %s4976_s28  ;;  %2779 = vst.msk [vmem:[#allocation5 + $0x9f] sm:$0x1] %vm2751_vm11, %v2662_v1 }
 0x48b   : > { %2876 = vrot.lane.b32.xlu1 %v6902_v21, %s4976_s28 }
 0x48c   : > { %v2664_v2 = vpop.permute.xlu0 %2663 }
 0x48d   : > { %2780 = vst.msk [vmem:[#allocation5 + $0x9f] sm:$0xfe] %vm2747_vm10, %v2664_v2  ;;  %v2666_v3 = vpop.permute.xlu1 %2665 }
 0x48e   : > { %2878 = vrot.lane.b32.xlu0 %v6904_v62, %s4976_s28  ;;  %2781 = vst.msk [vmem:[#allocation5 + $0xa7] sm:$0xff] %vm2749_vm12, %v2666_v3 }
 0x48f   : > { %2880 = vrot.lane.b32.xlu1 %v6915_v48, %s4976_s28 }
 0x490   : > { %v2668_v28 = vpop.permute.xlu0 %2667 }
 0x491   : > { %2782 = vst.msk [vmem:[#allocation5 + $0xaf] sm:$0x1] %vm2751_vm11, %v2668_v28  ;;  %v2670_v27 = vpop.permute.xlu1 %2669 }
 0x492   : > { %2882 = vrot.lane.b32.xlu0 %v6920_v14, %s4976_s28  ;;  %2783 = vst.msk [vmem:[#allocation5 + $0xaf] sm:$0xfe] %vm2747_vm10, %v2670_v27 }
 0x493   : > { %2884 = vrot.lane.b32.xlu1 %v6922_v22, %s4976_s28 }
 0x494   : > { %v2672_v29 = vpop.permute.xlu0 %2671 }
 0x495   : > { %2784 = vst.msk [vmem:[#allocation5 + $0xb7] sm:$0xff] %vm2749_vm12, %v2672_v29  ;;  %v2674_v10 = vpop.permute.xlu1 %2673 }
 0x496   : > { %2886 = vrot.lane.b32.xlu0 %v6932_v61, %s4976_s28  ;;  %2785 = vst.msk [vmem:[#allocation5 + $0xbf] sm:$0x1] %vm2751_vm11, %v2674_v10 }
 0x497   : > { %2888 = vrot.lane.b32.xlu1 %v6936_v16, %s4976_s28 }
 0x498   : > { %v2676_v55 = vpop.permute.xlu0 %2675 }
 0x499   : > { %2786 = vst.msk [vmem:[#allocation5 + $0xbf] sm:$0xfe] %vm2747_vm10, %v2676_v55  ;;  %v2678_v30 = vpop.permute.xlu1 %2677 }
 0x49a   : > { %2890 = vrot.lane.b32.xlu0 %v6938_v17, %s4976_s28  ;;  %2787 = vst.msk [vmem:[#allocation5 + $0xc7] sm:$0xff] %vm2749_vm12, %v2678_v30 }
 0x49b   : > { %2892 = vrot.lane.b32.xlu1 %v6948_v51, %s4976_s28 }
 0x49c   : > { %v2680_v0 = vpop.permute.xlu0 %2679 }
 0x49d   : > { %2788 = vst.msk [vmem:[#allocation5 + $0xcf] sm:$0x1] %vm2751_vm11, %v2680_v0  ;;  %v2682_v19 = vpop.permute.xlu1 %2681 }
 0x49e   : > { %2995 = vrot.lane.b32.xlu0 %v6664_v20, %s4978_s30  ;;  %2789 = vst.msk [vmem:[#allocation5 + $0xcf] sm:$0xfe] %vm2747_vm10, %v2682_v19 }
 0x49f   : > { %2997 = vrot.lane.b32.xlu1 %v6662_v63, %s4978_s30 }
 0x4a0   : > { %v2684_v38 = vpop.permute.xlu0 %2683 }
 0x4a1   : > { %2790 = vst.msk [vmem:[#allocation5 + $0xd7] sm:$0xff] %vm2749_vm12, %v2684_v38  ;;  %v2686_v36 = vpop.permute.xlu1 %2685 }
 0x4a2   : > { %2999 = vrot.lane.b32.xlu0 %v6682_v13, %s4978_s30  ;;  %2791 = vst.msk [vmem:[#allocation5 + $0xdf] sm:$0x1] %vm2751_vm11, %v2686_v36 }
 0x4a3   : > { %3001 = vrot.lane.b32.xlu1 %v6684_v24, %s4978_s30 }
 0x4a4   : > { %v2688_v47 = vpop.permute.xlu0 %2687 }
 0x4a5   : > { %2792 = vst.msk [vmem:[#allocation5 + $0xdf] sm:$0xfe] %vm2747_vm10, %v2688_v47  ;;  %v2690_v49 = vpop.permute.xlu1 %2689 }
 0x4a6   : > { %3003 = vrot.lane.b32.xlu0 %v6702_v5, %s4978_s30  ;;  %2793 = vst.msk [vmem:[#allocation5 + $0xe7] sm:$0xff] %vm2749_vm12, %v2690_v49 }
 0x4a7   : > { %3005 = vrot.lane.b32.xlu1 %v6704_v50, %s4978_s30 }
 0x4a8   : > { %v2692_v42 = vpop.permute.xlu0 %2691 }
 0x4a9   : > { %2794 = vst.msk [vmem:[#allocation5 + $0xef] sm:$0x1] %vm2751_vm11, %v2692_v42  ;;  %v2694_v44 = vpop.permute.xlu1 %2693 }
 0x4aa   : > { %3007 = vrot.lane.b32.xlu0 %v6722_v31, %s4978_s30  ;;  %2795 = vst.msk [vmem:[#allocation5 + $0xef] sm:$0xfe] %vm2747_vm10, %v2694_v44  ;;  %vm2946_vm10 = vcmask 189568  }
 0x4ab   : > { %3009 = vrot.lane.b32.xlu1 %v6724_v32, %s4978_s30 }
 0x4ac   : > { %v2696_v53 = vpop.permute.xlu0 %2695 }
 0x4ad   : > { %2796 = vst.msk [vmem:[#allocation5 + $0xf7] sm:$0xff] %vm2749_vm12, %v2696_v53  ;;  %v2698_v57 = vpop.permute.xlu1 %2697  ;;  %vm3269_vm12 = vcmask 326913  }
 0x4ae   : > { %3011 = vrot.lane.b32.xlu0 %v6742_v39, %s4978_s30  ;;  %2797 = vst.msk [vmem:[#allocation5 + $0xff] sm:$0x1] %vm2751_vm11, %v2698_v57  ;;  %vm3091_vm11 = vcmask 261312  }
 0x4af   : > { %3013 = vrot.lane.b32.xlu1 %v6744_v40, %s4978_s30 }
 0x4b0   : > { %v2799_v1 = vpop.permute.xlu0 %2798 }
 0x4b1   : > { %2943 = vst.msk [vmem:[#allocation5 - $0x2] sm:$0xfc] %vm2942_vm5, %v2799_v1  ;;  %v2801_v2 = vpop.permute.xlu1 %2800 }
 0x4b2   : > { %3015 = vrot.lane.b32.xlu0 %v6762_v25, %s4978_s30  ;;  %2945 = vst.msk [vmem:[#allocation5 + $0x6] sm:$0xff] %vm2944_vm6, %v2801_v2 }
 0x4b3   : > { %3017 = vrot.lane.b32.xlu1 %v6764_v59, %s4978_s30 }
 0x4b4   : > { %v2803_v3 = vpop.permute.xlu0 %2802 }
 0x4b5   : > { %2947 = vst.msk [vmem:[#allocation5 + $0xe] sm:$0x3] %vm2946_vm10, %v2803_v3  ;;  %v2805_v28 = vpop.permute.xlu1 %2804  ;;  %v7178_v3 = vld [vmem:[#allocation3 + $0x180] sm:$0xff] }
 0x4b6   : > { %3019 = vrot.lane.b32.xlu0 %v6782_v12, %s4978_s30  ;;  %2948 = vst.msk [vmem:[#allocation5 + $0xe] sm:$0xfc] %vm2942_vm5, %v2805_v28 }
 0x4b7   : > { %3021 = vrot.lane.b32.xlu1 %v6784_v8, %s4978_s30 }
 0x4b8   : > { %v2807_v27 = vpop.permute.xlu0 %2806 }
 0x4b9   : > { %2949 = vst.msk [vmem:[#allocation5 + $0x16] sm:$0xff] %vm2944_vm6, %v2807_v27  ;;  %v2809_v29 = vpop.permute.xlu1 %2808  ;;  %v7183_v27 = vld [vmem:[#allocation3 + $0x188] sm:$0xff] }
 0x4ba   : > { %3023 = vrot.lane.b32.xlu0 %v6802_v54, %s4978_s30  ;;  %2950 = vst.msk [vmem:[#allocation5 + $0x1e] sm:$0x3] %vm2946_vm10, %v2809_v29 }
 0x4bb   : > { %3025 = vrot.lane.b32.xlu1 %v6804_v7, %s4978_s30 }
 0x4bc   : > { %v2811_v10 = vpop.permute.xlu0 %2810 }
 0x4bd   : > { %2951 = vst.msk [vmem:[#allocation5 + $0x1e] sm:$0xfc] %vm2942_vm5, %v2811_v10  ;;  %v2813_v55 = vpop.permute.xlu1 %2812 }
 0x4be   : > { %3027 = vrot.lane.b32.xlu0 %v6822_v35, %s4978_s30  ;;  %2952 = vst.msk [vmem:[#allocation5 + $0x26] sm:$0xff] %vm2944_vm6, %v2813_v55 }
 0x4bf   : > { %3029 = vrot.lane.b32.xlu1 %v6824_v37, %s4978_s30 }
 0x4c0   : > { %v2815_v30 = vpop.permute.xlu0 %2814 }
 0x4c1   : > { %2953 = vst.msk [vmem:[#allocation5 + $0x2e] sm:$0x3] %vm2946_vm10, %v2815_v30  ;;  %v2817_v0 = vpop.permute.xlu1 %2816 }
 0x4c2   : > { %3031 = vrot.lane.b32.xlu0 %v6842_v58, %s4978_s30  ;;  %2954 = vst.msk [vmem:[#allocation5 + $0x2e] sm:$0xfc] %vm2942_vm5, %v2817_v0 }
 0x4c3   : > { %3033 = vrot.lane.b32.xlu1 %v6844_v60, %s4978_s30 }
 0x4c4   : > { %v2819_v19 = vpop.permute.xlu0 %2818 }
 0x4c5   : > { %2955 = vst.msk [vmem:[#allocation5 + $0x36] sm:$0xff] %vm2944_vm6, %v2819_v19  ;;  %v2821_v38 = vpop.permute.xlu1 %2820 }
 0x4c6   : > { %3035 = vrot.lane.b32.xlu0 %v6862_v6, %s4978_s30  ;;  %2956 = vst.msk [vmem:[#allocation5 + $0x3e] sm:$0x3] %vm2946_vm10, %v2821_v38 }
 0x4c7   : > { %3037 = vrot.lane.b32.xlu1 %v6864_v15, %s4978_s30 }
 0x4c8   : > { %v2823_v36 = vpop.permute.xlu0 %2822 }
 0x4c9   : > { %2957 = vst.msk [vmem:[#allocation5 + $0x3e] sm:$0xfc] %vm2942_vm5, %v2823_v36  ;;  %v2825_v47 = vpop.permute.xlu1 %2824 }
 0x4ca   : > { %3039 = vrot.lane.b32.xlu0 %v6882_v9, %s4978_s30  ;;  %2958 = vst.msk [vmem:[#allocation5 + $0x46] sm:$0xff] %vm2944_vm6, %v2825_v47 }
 0x4cb   : > { %3041 = vrot.lane.b32.xlu1 %v6884_v34, %s4978_s30 }
 0x4cc   : > { %v2827_v49 = vpop.permute.xlu0 %2826 }
 0x4cd   : > { %2959 = vst.msk [vmem:[#allocation5 + $0x4e] sm:$0x3] %vm2946_vm10, %v2827_v49  ;;  %v2829_v42 = vpop.permute.xlu1 %2828 }
 0x4ce   : > { %3043 = vrot.lane.b32.xlu0 %v6902_v21, %s4978_s30  ;;  %2960 = vst.msk [vmem:[#allocation5 + $0x4e] sm:$0xfc] %vm2942_vm5, %v2829_v42 }
 0x4cf   : > { %3045 = vrot.lane.b32.xlu1 %v6904_v62, %s4978_s30 }
 0x4d0   : > { %v2831_v44 = vpop.permute.xlu0 %2830 }
 0x4d1   : > { %2961 = vst.msk [vmem:[#allocation5 + $0x56] sm:$0xff] %vm2944_vm6, %v2831_v44  ;;  %v2833_v53 = vpop.permute.xlu1 %2832 }
 0x4d2   : > { %3047 = vrot.lane.b32.xlu0 %v6920_v14, %s4978_s30  ;;  %2962 = vst.msk [vmem:[#allocation5 + $0x5e] sm:$0x3] %vm2946_vm10, %v2833_v53 }
 0x4d3   : > { %3049 = vrot.lane.b32.xlu1 %v6922_v22, %s4978_s30 }
 0x4d4   : > { %v2835_v57 = vpop.permute.xlu0 %2834 }
 0x4d5   : > { %2963 = vst.msk [vmem:[#allocation5 + $0x5e] sm:$0xfc] %vm2942_vm5, %v2835_v57  ;;  %v2837_v1 = vpop.permute.xlu1 %2836 }
 0x4d6   : > { %3051 = vrot.lane.b32.xlu0 %v6936_v16, %s4978_s30  ;;  %2964 = vst.msk [vmem:[#allocation5 + $0x66] sm:$0xff] %vm2944_vm6, %v2837_v1 }
 0x4d7   : > { %3053 = vrot.lane.b32.xlu1 %v6938_v17, %s4978_s30 }
 0x4d8   : > { %v2839_v2 = vpop.permute.xlu0 %2838 }
 0x4d9   : > { %2965 = vst.msk [vmem:[#allocation5 + $0x6e] sm:$0x3] %vm2946_vm10, %v2839_v2  ;;  %v2841_v28 = vpop.permute.xlu1 %2840 }
 0x4da   : > { %3055 = vrot.lane.b32.xlu0 %v7178_v3, %s4978_s30  ;;  %2966 = vst.msk [vmem:[#allocation5 + $0x6e] sm:$0xfc] %vm2942_vm5, %v2841_v28 }
 0x4db   : > { %3057 = vrot.lane.b32.xlu1 %v7183_v27, %s4978_s30 }
 0x4dc   : > { %v2843_v29 = vpop.permute.xlu0 %2842 }
 0x4dd   : > { %2967 = vst.msk [vmem:[#allocation5 + $0x76] sm:$0xff] %vm2944_vm6, %v2843_v29  ;;  %v2845_v10 = vpop.permute.xlu1 %2844 }
 0x4de   : > { %3125 = vrot.lane.b32.xlu0 %v6664_v20, %s4980_s17  ;;  %2968 = vst.msk [vmem:[#allocation5 + $0x7e] sm:$0x3] %vm2946_vm10, %v2845_v10 }
 0x4df   : > { %3127 = vrot.lane.b32.xlu1 %v6662_v63, %s4980_s17 }
 0x4e0   : > { %v2847_v55 = vpop.permute.xlu0 %2846 }
 0x4e1   : > { %2969 = vst.msk [vmem:[#allocation5 + $0x7e] sm:$0xfc] %vm2942_vm5, %v2847_v55  ;;  %v2849_v30 = vpop.permute.xlu1 %2848 }
 0x4e2   : > { %3129 = vrot.lane.b32.xlu0 %v6675_v11, %s4980_s17  ;;  %2970 = vst.msk [vmem:[#allocation5 + $0x86] sm:$0xff] %vm2944_vm6, %v2849_v30 }
 0x4e3   : > { %3131 = vrot.lane.b32.xlu1 %v6682_v13, %s4980_s17 }
 0x4e4   : > { %v2851_v0 = vpop.permute.xlu0 %2850 }
 0x4e5   : > { %2971 = vst.msk [vmem:[#allocation5 + $0x8e] sm:$0x3] %vm2946_vm10, %v2851_v0  ;;  %v2853_v19 = vpop.permute.xlu1 %2852 }
 0x4e6   : > { %3133 = vrot.lane.b32.xlu0 %v6684_v24, %s4980_s17  ;;  %2972 = vst.msk [vmem:[#allocation5 + $0x8e] sm:$0xfc] %vm2942_vm5, %v2853_v19 }
 0x4e7   : > { %3135 = vrot.lane.b32.xlu1 %v6695_v56, %s4980_s17 }
 0x4e8   : > { %v2855_v38 = vpop.permute.xlu0 %2854 }
 0x4e9   : > { %2973 = vst.msk [vmem:[#allocation5 + $0x96] sm:$0xff] %vm2944_vm6, %v2855_v38  ;;  %v2857_v11 = vpop.permute.xlu1 %2856 }
 0x4ea   : > { %3137 = vrot.lane.b32.xlu0 %v6702_v5, %s4980_s17  ;;  %2974 = vst.msk [vmem:[#allocation5 + $0x9e] sm:$0x3] %vm2946_vm10, %v2857_v11 }
 0x4eb   : > { %3139 = vrot.lane.b32.xlu1 %v6704_v50, %s4980_s17 }
 0x4ec   : > { %v2859_v36 = vpop.permute.xlu0 %2858 }
 0x4ed   : > { %2975 = vst.msk [vmem:[#allocation5 + $0x9e] sm:$0xfc] %vm2942_vm5, %v2859_v36  ;;  %v2861_v47 = vpop.permute.xlu1 %2860 }
 0x4ee   : > { %3141 = vrot.lane.b32.xlu0 %v6715_v26, %s4980_s17  ;;  %2976 = vst.msk [vmem:[#allocation5 + $0xa6] sm:$0xff] %vm2944_vm6, %v2861_v47 }
 0x4ef   : > { %3143 = vrot.lane.b32.xlu1 %v6722_v31, %s4980_s17 }
 0x4f0   : > { %v2863_v56 = vpop.permute.xlu0 %2862 }
 0x4f1   : > { %2977 = vst.msk [vmem:[#allocation5 + $0xae] sm:$0x3] %vm2946_vm10, %v2863_v56  ;;  %v2865_v49 = vpop.permute.xlu1 %2864 }
 0x4f2   : > { %3145 = vrot.lane.b32.xlu0 %v6724_v32, %s4980_s17  ;;  %2978 = vst.msk [vmem:[#allocation5 + $0xae] sm:$0xfc] %vm2942_vm5, %v2865_v49 }
 0x4f3   : > { %3147 = vrot.lane.b32.xlu1 %v6735_v41, %s4980_s17 }
 0x4f4   : > { %v2867_v42 = vpop.permute.xlu0 %2866 }
 0x4f5   : > { %2979 = vst.msk [vmem:[#allocation5 + $0xb6] sm:$0xff] %vm2944_vm6, %v2867_v42  ;;  %v2869_v26 = vpop.permute.xlu1 %2868 }
 0x4f6   : > { %3149 = vrot.lane.b32.xlu0 %v6742_v39, %s4980_s17  ;;  %2980 = vst.msk [vmem:[#allocation5 + $0xbe] sm:$0x3] %vm2946_vm10, %v2869_v26 }
 0x4f7   : > { %3151 = vrot.lane.b32.xlu1 %v6744_v40, %s4980_s17 }
 0x4f8   : > { %v2871_v44 = vpop.permute.xlu0 %2870 }
 0x4f9   : > { %2981 = vst.msk [vmem:[#allocation5 + $0xbe] sm:$0xfc] %vm2942_vm5, %v2871_v44  ;;  %v2873_v53 = vpop.permute.xlu1 %2872 }
 0x4fa   : > { %3153 = vrot.lane.b32.xlu0 %v6755_v45, %s4980_s17  ;;  %2982 = vst.msk [vmem:[#allocation5 + $0xc6] sm:$0xff] %vm2944_vm6, %v2873_v53 }
 0x4fb   : > { %3155 = vrot.lane.b32.xlu1 %v6762_v25, %s4980_s17 }
 0x4fc   : > { %v2875_v41 = vpop.permute.xlu0 %2874 }
 0x4fd   : > { %2983 = vst.msk [vmem:[#allocation5 + $0xce] sm:$0x3] %vm2946_vm10, %v2875_v41  ;;  %v2877_v57 = vpop.permute.xlu1 %2876 }
 0x4fe   : > { %3157 = vrot.lane.b32.xlu0 %v6764_v59, %s4980_s17  ;;  %2984 = vst.msk [vmem:[#allocation5 + $0xce] sm:$0xfc] %vm2942_vm5, %v2877_v57  ;;  %v2519_v57 = vld [vmem:[#allocation3 + $0x190] sm:$0x3] }
 0x4ff   : > { %3159 = vrot.lane.b32.xlu1 %v6775_v23, %s4980_s17 }
 0x500   : > { %v2879_v1 = vpop.permute.xlu0 %2878 }
 0x501   : > { %2985 = vst.msk [vmem:[#allocation5 + $0xd6] sm:$0xff] %vm2944_vm6, %v2879_v1  ;;  %v2881_v45 = vpop.permute.xlu1 %2880 }
 0x502   : > { %3161 = vrot.lane.b32.xlu0 %v6782_v12, %s4980_s17  ;;  %2986 = vst.msk [vmem:[#allocation5 + $0xde] sm:$0x3] %vm2946_vm10, %v2881_v45  ;;  %v4945_v45 = vld [vmem:[#allocation3 + $0x28] sm:$0x3] }
 0x503   : > { %3163 = vrot.lane.b32.xlu1 %v6784_v8, %s4980_s17 }
 0x504   : > { %v2883_v2 = vpop.permute.xlu0 %2882 }
 0x505   : > { %2987 = vst.msk [vmem:[#allocation5 + $0xde] sm:$0xfc] %vm2942_vm5, %v2883_v2  ;;  %v2885_v28 = vpop.permute.xlu1 %2884 }
 0x506   : > { %3165 = vrot.lane.b32.xlu0 %v6795_v46, %s4980_s17  ;;  %2988 = vst.msk [vmem:[#allocation5 + $0xe6] sm:$0xff] %vm2944_vm6, %v2885_v28 }
 0x507   : > { %3167 = vrot.lane.b32.xlu1 %v6802_v54, %s4980_s17 }
 0x508   : > { %v2887_v23 = vpop.permute.xlu0 %2886 }
 0x509   : > { %2989 = vst.msk [vmem:[#allocation5 + $0xee] sm:$0x3] %vm2946_vm10, %v2887_v23  ;;  %v2889_v29 = vpop.permute.xlu1 %2888 }
 0x50a   : > { %3169 = vrot.lane.b32.xlu0 %v6804_v7, %s4980_s17  ;;  %2990 = vst.msk [vmem:[#allocation5 + $0xee] sm:$0xfc] %vm2942_vm5, %v2889_v29  ;;  %v4946_v29 = vld [vmem:[#allocation3 + $0x40] sm:$0x3]  ;;  %vm3988_vm5 = vcmask 589312  }
 0x50b   : > { %3171 = vrot.lane.b32.xlu1 %v6815_v33, %s4980_s17 }
 0x50c   : > { %v2891_v10 = vpop.permute.xlu0 %2890 }
 0x50d   : > { %2991 = vst.msk [vmem:[#allocation5 + $0xf6] sm:$0xff] %vm2944_vm6, %v2891_v10  ;;  %v2893_v46 = vpop.permute.xlu1 %2892  ;;  %vm3990_vm6 = vcmask 583168  }
 0x50e   : > { %3173 = vrot.lane.b32.xlu0 %v6822_v35, %s4980_s17  ;;  %2992 = vst.msk [vmem:[#allocation5 + $0xfe] sm:$0x3] %vm2946_vm10, %v2893_v46  ;;  %v4071_v46 = vld [vmem:[%s8027_s3 + $0x10] sm:$0xff]  ;;  %vm4085_vm10 = vcmask 588800  }
 0x50f   : > { %3175 = vrot.lane.b32.xlu1 %v6824_v37, %s4980_s17 }
 0x510   : > { %v2996_v55 = vpop.permute.xlu0 %2995 }
 0x511   : > { %3092 = vst.msk [vmem:[#allocation5] sm:$0xff] %vm3091_vm11, %v2996_v55  ;;  %v2998_v30 = vpop.permute.xlu1 %2997  ;;  %v4072_v55 = vld [vmem:[%s8027_s3 + $0x18] sm:$0xff] }
 0x512   : > { %3177 = vrot.lane.b32.xlu0 %v6835_v52, %s4980_s17  ;;  %3093 = vst.msk [vmem:[#allocation5 + $0x8] sm:$0xff] %vm3091_vm11, %v2998_v30  ;;  %v4884_v30 = vpack.c.bf16 %v4072_v55, %v4071_v46 }
 0x513   : > { %3179 = vrot.lane.b32.xlu1 %v6842_v58, %s4980_s17 }
 0x514   : > { %v3000_v33 = vpop.permute.xlu0 %2999 }
 0x515   : > { %3094 = vst.msk [vmem:[#allocation5 + $0x10] sm:$0xff] %vm3091_vm11, %v3000_v33  ;;  %v3002_v0 = vpop.permute.xlu1 %3001 }
 0x516   : > { %3181 = vrot.lane.b32.xlu0 %v6844_v60, %s4980_s17  ;;  %3095 = vst.msk [vmem:[#allocation5 + $0x18] sm:$0xff] %vm3091_vm11, %v3002_v0 }
 0x517   : > { %3183 = vrot.lane.b32.xlu1 %v6855_v4, %s4980_s17 }
 0x518   : > { %v3004_v19 = vpop.permute.xlu0 %3003 }
 0x519   : > { %3096 = vst.msk [vmem:[#allocation5 + $0x20] sm:$0xff] %vm3091_vm11, %v3004_v19  ;;  %v3006_v52 = vpop.permute.xlu1 %3005  ;;  %v4073_v19 = vld [vmem:[%s8027_s3 + $0x20] sm:$0xff] }
 0x51a   : > { %3185 = vrot.lane.b32.xlu0 %v6862_v6, %s4980_s17  ;;  %3097 = vst.msk [vmem:[#allocation5 + $0x28] sm:$0xff] %vm3091_vm11, %v3006_v52  ;;  %v4074_v52 = vld [vmem:[%s8027_s3 + $0x28] sm:$0xff] }
 0x51b   : > { %3187 = vrot.lane.b32.xlu1 %v6864_v15, %s4980_s17 }
 0x51c   : > { %v3008_v38 = vpop.permute.xlu0 %3007 }
 0x51d   : > { %3098 = vst.msk [vmem:[#allocation5 + $0x30] sm:$0xff] %vm3091_vm11, %v3008_v38  ;;  %v3010_v11 = vpop.permute.xlu1 %3009  ;;  %v4888_v38 = vpack.c.bf16 %v4074_v52, %v4073_v19 }
 0x51e   : > { %3189 = vrot.lane.b32.xlu0 %v6875_v18, %s4980_s17  ;;  %3099 = vst.msk [vmem:[#allocation5 + $0x38] sm:$0xff] %vm3091_vm11, %v3010_v11 }
 0x51f   : > { %3191 = vrot.lane.b32.xlu1 %v6882_v9, %s4980_s17 }
 0x520   : > { %v3012_v4 = vpop.permute.xlu0 %3011 }
 0x521   : > { %3100 = vst.msk [vmem:[#allocation5 + $0x40] sm:$0xff] %vm3091_vm11, %v3012_v4  ;;  %v3014_v36 = vpop.permute.xlu1 %3013 }
 0x522   : > { %3193 = vrot.lane.b32.xlu0 %v6884_v34, %s4980_s17  ;;  %3101 = vst.msk [vmem:[#allocation5 + $0x48] sm:$0xff] %vm3091_vm11, %v3014_v36  ;;  %v4075_v36 = vld [vmem:[%s8027_s3 + $0x30] sm:$0xff] }
 0x523   : > { %3195 = vrot.lane.b32.xlu1 %v6895_v43, %s4980_s17 }
 0x524   : > { %v3016_v47 = vpop.permute.xlu0 %3015 }
 0x525   : > { %3102 = vst.msk [vmem:[#allocation5 + $0x50] sm:$0xff] %vm3091_vm11, %v3016_v47  ;;  %v3018_v18 = vpop.permute.xlu1 %3017  ;;  %v4076_v47 = vld [vmem:[%s8027_s3 + $0x38] sm:$0xff] }
 0x526   : > { %3197 = vrot.lane.b32.xlu0 %v6902_v21, %s4980_s17  ;;  %3103 = vst.msk [vmem:[#allocation5 + $0x58] sm:$0xff] %vm3091_vm11, %v3018_v18  ;;  %v4892_v18 = vpack.c.bf16 %v4076_v47, %v4075_v36 }
 0x527   : > { %3199 = vrot.lane.b32.xlu1 %v6904_v62, %s4980_s17 }
 0x528   : > { %v3020_v56 = vpop.permute.xlu0 %3019 }
 0x529   : > { %3104 = vst.msk [vmem:[#allocation5 + $0x60] sm:$0xff] %vm3091_vm11, %v3020_v56  ;;  %v3022_v49 = vpop.permute.xlu1 %3021 }
 0x52a   : > { %3201 = vrot.lane.b32.xlu0 %v6915_v48, %s4980_s17  ;;  %3105 = vst.msk [vmem:[#allocation5 + $0x68] sm:$0xff] %vm3091_vm11, %v3022_v49  ;;  %v4947_v49 = vld [vmem:[#allocation3 + $0x58] sm:$0x3] }
 0x52b   : > { %3203 = vrot.lane.b32.xlu1 %v6920_v14, %s4980_s17 }
 0x52c   : > { %v3024_v43 = vpop.permute.xlu0 %3023 }
 0x52d   : > { %3106 = vst.msk [vmem:[#allocation5 + $0x70] sm:$0xff] %vm3091_vm11, %v3024_v43  ;;  %v3026_v42 = vpop.permute.xlu1 %3025 }
 0x52e   : > { %3205 = vrot.lane.b32.xlu0 %v6922_v22, %s4980_s17  ;;  %3107 = vst.msk [vmem:[#allocation5 + $0x78] sm:$0xff] %vm3091_vm11, %v3026_v42 }
 0x52f   : > { %3207 = vrot.lane.b32.xlu1 %v6932_v61, %s4980_s17 }
 0x530   : > { %v3028_v26 = vpop.permute.xlu0 %3027 }
 0x531   : > { %3108 = vst.msk [vmem:[#allocation5 + $0x80] sm:$0xff] %vm3091_vm11, %v3028_v26  ;;  %v3030_v48 = vpop.permute.xlu1 %3029  ;;  %v4077_v26 = vld [vmem:[%s8027_s3 + $0x40] sm:$0xff] }
 0x532   : > { %3209 = vrot.lane.b32.xlu0 %v6936_v16, %s4980_s17  ;;  %3109 = vst.msk [vmem:[#allocation5 + $0x88] sm:$0xff] %vm3091_vm11, %v3030_v48 }
 0x533   : > { %3211 = vrot.lane.b32.xlu1 %v6938_v17, %s4980_s17 }
 0x534   : > { %v3032_v44 = vpop.permute.xlu0 %3031 }
 0x535   : > { %3110 = vst.msk [vmem:[#allocation5 + $0x90] sm:$0xff] %vm3091_vm11, %v3032_v44  ;;  %v3034_v53 = vpop.permute.xlu1 %3033 }
 0x536   : > { %3213 = vrot.lane.b32.xlu0 %v6948_v51, %s4980_s17  ;;  %3111 = vst.msk [vmem:[#allocation5 + $0x98] sm:$0xff] %vm3091_vm11, %v3034_v53 }
 0x537   : > { %3215 = vrot.lane.b32.xlu1 %v7178_v3, %s4980_s17 }
 0x538   : > { %v3036_v61 = vpop.permute.xlu0 %3035 }
 0x539   : > { %3112 = vst.msk [vmem:[#allocation5 + $0xa0] sm:$0xff] %vm3091_vm11, %v3036_v61  ;;  %v3038_v41 = vpop.permute.xlu1 %3037 }
 0x53a   : > { %3217 = vrot.lane.b32.xlu0 %v7183_v27, %s4980_s17  ;;  %3113 = vst.msk [vmem:[#allocation5 + $0xa8] sm:$0xff] %vm3091_vm11, %v3038_v41 }
 0x53b   : > { %3219 = vrot.lane.b32.xlu1 %v2519_v57, %s4980_s17  ;;  %s4984_s17 = smov 64  }
 0x53c   : > { %v3040_v1 = vpop.permute.xlu0 %3039 }
 0x53d   : > { %3114 = vst.msk [vmem:[#allocation5 + $0xb0] sm:$0xff] %vm3091_vm11, %v3040_v1  ;;  %v3042_v51 = vpop.permute.xlu1 %3041  ;;  %v4948_v1 = vld [vmem:[#allocation3 + $0x70] sm:$0x3] }
 0x53e   : > { %3320 = vrot.lane.b32.xlu0 %v6664_v20, %s4981_s23  ;;  %3115 = vst.msk [vmem:[#allocation5 + $0xb8] sm:$0xff] %vm3091_vm11, %v3042_v51  ;;  %v4069_v20 = vld [vmem:[%s8027_s3] sm:$0xff] }
 0x53f   : > { %3322 = vrot.lane.b32.xlu1 %v6662_v63, %s4981_s23  ;;  %v4070_v63 = vld [vmem:[%s8027_s3 + $0x8] sm:$0xff] }
 0x540   : > { %v3044_v3 = vpop.permute.xlu0 %3043  ;;  %v4880_v28 = vpack.c.bf16 %v4070_v63, %v4069_v20 }
 0x541   : > { %3116 = vst.msk [vmem:[#allocation5 + $0xc0] sm:$0xff] %vm3091_vm11, %v3044_v3  ;;  %v3046_v27 = vpop.permute.xlu1 %3045 }
 0x542   : > { %3324 = vrot.lane.b32.xlu0 %v4945_v45, %s4981_s23  ;;  %3117 = vst.msk [vmem:[#allocation5 + $0xc8] sm:$0xff] %vm3091_vm11, %v3046_v27  ;;  %4896 = vmatprep.subr.bf16.mxu1 %v4880_v28 }
 0x543   : > { %3326 = vrot.lane.b32.xlu1 %v6682_v13, %s4981_s23  ;;  %4881 = vmatprep.subr.bf16.mxu0 %v4880_v28 }
 0x544   : > { %v3048_v2 = vpop.permute.xlu0 %3047  ;;  %4901 = vmatpush3.bf16.msra.mxu1 %v4880_v28  ;;  %4883 = vmatpush3.bf16.msra.mxu0 %v4880_v28 }
 0x545   : > { %3118 = vst.msk [vmem:[#allocation5 + $0xd0] sm:$0xff] %vm3091_vm11, %v3048_v2  ;;  %v3050_v23 = vpop.permute.xlu1 %3049  ;;  %4897 = vmatprep.subr.bf16.mxu1 %v4884_v30  ;;  %4885 = vmatprep.subr.bf16.mxu0 %v4884_v30 }
 0x546   : > { %3328 = vrot.lane.b32.xlu0 %v6684_v24, %s4981_s23  ;;  %3119 = vst.msk [vmem:[#allocation5 + $0xd8] sm:$0xff] %vm3091_vm11, %v3050_v23 }
 0x547   : > { %3330 = vrot.lane.b32.xlu1 %v4946_v29, %s4981_s23 }
 0x548   : > { %v3052_v10 = vpop.permute.xlu0 %3051  ;;  %4902 = vmatpush3.bf16.msra.mxu1 %v4884_v30  ;;  %4887 = vmatpush3.bf16.msra.mxu0 %v4884_v30 }
 0x549   : > { %3120 = vst.msk [vmem:[#allocation5 + $0xe0] sm:$0xff] %vm3091_vm11, %v3052_v10  ;;  %v3054_v33 = vpop.permute.xlu1 %3053  ;;  %4898 = vmatprep.subr.bf16.mxu1 %v4888_v38  ;;  %4889 = vmatprep.subr.bf16.mxu0 %v4888_v38  ;;  %v4949_v10 = vld [vmem:[#allocation3 + $0x88] sm:$0x3] }
 0x54a   : > { %3521 = vrot.lane.b32.xlu0 %v6702_v5, %s4982_s7  ;;  %3121 = vst.msk [vmem:[#allocation5 + $0xe8] sm:$0xff] %vm3091_vm11, %v3054_v33 }
 0x54b   : > { %3523 = vrot.lane.b32.xlu1 %v6704_v50, %s4982_s7 }
 0x54c   : > { %v3056_v0 = vpop.permute.xlu0 %3055  ;;  %4903 = vmatpush3.bf16.msra.mxu1 %v4888_v38  ;;  %4891 = vmatpush3.bf16.msra.mxu0 %v4888_v38 }
 0x54d   : > { %3122 = vst.msk [vmem:[#allocation5 + $0xf0] sm:$0xff] %vm3091_vm11, %v3056_v0  ;;  %v3058_v11 = vpop.permute.xlu1 %3057  ;;  %4899 = vmatprep.subr.bf16.mxu1 %v4892_v18  ;;  %4893 = vmatprep.subr.bf16.mxu0 %v4892_v18 }
 0x54e   : > { %3653 = vrot.lane.b32.xlu0 %v6702_v5, %s4983_s12  ;;  %3123 = vst.msk [vmem:[#allocation5 + $0xf8] sm:$0xff] %vm3091_vm11, %v3058_v11  ;;  %v4950_v11 = vld [vmem:[#allocation3 + $0xa0] sm:$0x3] }
 0x54f   : > { %3655 = vrot.lane.b32.xlu1 %v6704_v50, %s4983_s12 }
 0x550   : > { %v3126_v4 = vpop.permute.xlu0 %3125  ;;  %4904 = vmatpush3.bf16.msra.mxu1 %v4892_v18  ;;  %4895 = vmatpush3.bf16.msra.mxu0 %v4892_v18 }
 0x551   : > { %3270 = vst.msk [vmem:[#allocation5 - $0x1] sm:$0xfe] %vm3269_vm12, %v3126_v4  ;;  %v3128_v56 = vpop.permute.xlu1 %3127  ;;  %4900 = vmatprep.subr.mxu1 %v4077_v26  ;;  %4822 = vmatprep.subr.mxu0 %v4077_v26 }
 0x552   : > { %3657 = vrot.lane.b32.xlu0 %v4947_v49, %s4983_s12  ;;  %3272 = vst.msk [vmem:[#allocation5 + $0x7] sm:$0xff] %vm3271_vm7, %v3128_v56 }
 0x553   : > { %3848 = vrot.lane.b32.xlu1 %v6702_v5, %s4984_s17 }
 0x554   : > { %v3130_v43 = vpop.permute.xlu0 %3129  ;;  %4905 = vmatpush3.msra.mxu1 %v4077_v26  ;;  %4823 = vmatpush3.msra.mxu0 %v4077_v26 }
 0x555   : > { %3274 = vst.msk [vmem:[#allocation5 + $0xf] sm:$0x1] %vm3273_vm9, %v3130_v43  ;;  %v3132_v42 = vpop.permute.xlu1 %3131 }
 0x556   : > { %3850 = vrot.lane.b32.xlu0 %v6704_v50, %s4984_s17  ;;  %3275 = vst.msk [vmem:[#allocation5 + $0xf] sm:$0xfe] %vm3269_vm12, %v3132_v42 }
 0x557   : > { %3332 = vrot.lane.b32.xlu1 %v6702_v5, %s4981_s23 }
 0x558   : > { %v3134_v48 = vpop.permute.xlu0 %3133 }
 0x559   : > { %3276 = vst.msk [vmem:[#allocation5 + $0x17] sm:$0xff] %vm3271_vm7, %v3134_v48  ;;  %v3136_v44 = vpop.permute.xlu1 %3135 }
 0x55a   : > { %3334 = vrot.lane.b32.xlu0 %v6704_v50, %s4981_s23  ;;  %3277 = vst.msk [vmem:[#allocation5 + $0x1f] sm:$0x1] %vm3273_vm9, %v3136_v44  ;;  %v4951_v44 = vld [vmem:[#allocation3 + $0xb8] sm:$0x3] }
 0x55b   : > { %3336 = vrot.lane.b32.xlu1 %v4947_v49, %s4981_s23 }
 0x55c   : > { %v3138_v53 = vpop.permute.xlu0 %3137 }
 0x55d   : > { %3278 = vst.msk [vmem:[#allocation5 + $0x1f] sm:$0xfe] %vm3269_vm12, %v3138_v53  ;;  %v3140_v61 = vpop.permute.xlu1 %3139 }
 0x55e   : > { %3852 = vrot.lane.b32.xlu0 %v4947_v49, %s4984_s17  ;;  %3279 = vst.msk [vmem:[#allocation5 + $0x27] sm:$0xff] %vm3271_vm7, %v3140_v61 }
 0x55f   : > { %3525 = vrot.lane.b32.xlu1 %v6722_v31, %s4982_s7 }
 0x560   : > { %v3142_v5 = vpop.permute.xlu0 %3141 }
 0x561   : > { %3280 = vst.msk [vmem:[#allocation5 + $0x2f] sm:$0x1] %vm3273_vm9, %v3142_v5  ;;  %v3144_v41 = vpop.permute.xlu1 %3143 }
 0x562   : > { %3527 = vrot.lane.b32.xlu0 %v6724_v32, %s4982_s7  ;;  %3281 = vst.msk [vmem:[#allocation5 + $0x2f] sm:$0xfe] %vm3269_vm12, %v3144_v41 }
 0x563   : > { %3659 = vrot.lane.b32.xlu1 %v6722_v31, %s4983_s12 }
 0x564   : > { %v3146_v50 = vpop.permute.xlu0 %3145 }
 0x565   : > { %3282 = vst.msk [vmem:[#allocation5 + $0x37] sm:$0xff] %vm3271_vm7, %v3146_v50  ;;  %v3148_v57 = vpop.permute.xlu1 %3147 }
 0x566   : > { %3661 = vrot.lane.b32.xlu0 %v6724_v32, %s4983_s12  ;;  %3283 = vst.msk [vmem:[#allocation5 + $0x3f] sm:$0x1] %vm3273_vm9, %v3148_v57 }
 0x567   : > { %3663 = vrot.lane.b32.xlu1 %v4948_v1, %s4983_s12 }
 0x568   : > { %v3150_v51 = vpop.permute.xlu0 %3149 }
 0x569   : > { %3284 = vst.msk [vmem:[#allocation5 + $0x3f] sm:$0xfe] %vm3269_vm12, %v3150_v51  ;;  %v3152_v3 = vpop.permute.xlu1 %3151 }
 0x56a   : > { %3854 = vrot.lane.b32.xlu0 %v6722_v31, %s4984_s17  ;;  %3285 = vst.msk [vmem:[#allocation5 + $0x47] sm:$0xff] %vm3271_vm7, %v3152_v3  ;;  %v4952_v3 = vld [vmem:[#allocation3 + $0xd0] sm:$0x3] }
 0x56b   : > { %3856 = vrot.lane.b32.xlu1 %v6724_v32, %s4984_s17 }
 0x56c   : > { %v3154_v27 = vpop.permute.xlu0 %3153 }
 0x56d   : > { %3286 = vst.msk [vmem:[#allocation5 + $0x4f] sm:$0x1] %vm3273_vm9, %v3154_v27  ;;  %v3156_v45 = vpop.permute.xlu1 %3155 }
 0x56e   : > { %3338 = vrot.lane.b32.xlu0 %v6722_v31, %s4981_s23  ;;  %3287 = vst.msk [vmem:[#allocation5 + $0x4f] sm:$0xfe] %vm3269_vm12, %v3156_v45 }
 0x56f   : > { %3340 = vrot.lane.b32.xlu1 %v6724_v32, %s4981_s23 }
 0x570   : > { %v3158_v2 = vpop.permute.xlu0 %3157 }
 0x571   : > { %3288 = vst.msk [vmem:[#allocation5 + $0x57] sm:$0xff] %vm3271_vm7, %v3158_v2  ;;  %v3160_v20 = vpop.permute.xlu1 %3159 }
 0x572   : > { %3342 = vrot.lane.b32.xlu0 %v4948_v1, %s4981_s23  ;;  %3289 = vst.msk [vmem:[#allocation5 + $0x5f] sm:$0x1] %vm3273_vm9, %v3160_v20 }
 0x573   : > { %3858 = vrot.lane.b32.xlu1 %v4948_v1, %s4984_s17 }
 0x574   : > { %v3162_v63 = vpop.permute.xlu0 %3161 }
 0x575   : > { %3290 = vst.msk [vmem:[#allocation5 + $0x5f] sm:$0xfe] %vm3269_vm12, %v3162_v63  ;;  %v3164_v28 = vpop.permute.xlu1 %3163 }
 0x576   : > { %3529 = vrot.lane.b32.xlu0 %v6742_v39, %s4982_s7  ;;  %3291 = vst.msk [vmem:[#allocation5 + $0x67] sm:$0xff] %vm3271_vm7, %v3164_v28 }
 0x577   : > { %3531 = vrot.lane.b32.xlu1 %v6744_v40, %s4982_s7 }
 0x578   : > { %v3166_v31 = vpop.permute.xlu0 %3165 }
 0x579   : > { %3292 = vst.msk [vmem:[#allocation5 + $0x6f] sm:$0x1] %vm3273_vm9, %v3166_v31  ;;  %v3168_v32 = vpop.permute.xlu1 %3167 }
 0x57a   : > { %3665 = vrot.lane.b32.xlu0 %v6742_v39, %s4983_s12  ;;  %3293 = vst.msk [vmem:[#allocation5 + $0x6f] sm:$0xfe] %vm3269_vm12, %v3168_v32 }
 0x57b   : > { %3667 = vrot.lane.b32.xlu1 %v6744_v40, %s4983_s12 }
 0x57c   : > { %v3170_v23 = vpop.permute.xlu0 %3169 }
 0x57d   : > { %3294 = vst.msk [vmem:[#allocation5 + $0x77] sm:$0xff] %vm3271_vm7, %v3170_v23  ;;  %v3172_v29 = vpop.permute.xlu1 %3171 }
 0x57e   : > { %3669 = vrot.lane.b32.xlu0 %v4949_v10, %s4983_s12  ;;  %3295 = vst.msk [vmem:[#allocation5 + $0x7f] sm:$0x1] %vm3273_vm9, %v3172_v29 }
 0x57f   : > { %3860 = vrot.lane.b32.xlu1 %v6742_v39, %s4984_s17 }
 0x580   : > { %v3174_v46 = vpop.permute.xlu0 %3173 }
 0x581   : > { %3296 = vst.msk [vmem:[#allocation5 + $0x7f] sm:$0xfe] %vm3269_vm12, %v3174_v46  ;;  %v3176_v55 = vpop.permute.xlu1 %3175  ;;  %v4953_v46 = vld [vmem:[#allocation3 + $0xe8] sm:$0x3] }
 0x582   : > { %3862 = vrot.lane.b32.xlu0 %v6744_v40, %s4984_s17  ;;  %3297 = vst.msk [vmem:[#allocation5 + $0x87] sm:$0xff] %vm3271_vm7, %v3176_v55 }
 0x583   : > { %3344 = vrot.lane.b32.xlu1 %v6742_v39, %s4981_s23 }
 0x584   : > { %v3178_v30 = vpop.permute.xlu0 %3177 }
 0x585   : > { %3298 = vst.msk [vmem:[#allocation5 + $0x8f] sm:$0x1] %vm3273_vm9, %v3178_v30  ;;  %v3180_v33 = vpop.permute.xlu1 %3179 }
 0x586   : > { %3346 = vrot.lane.b32.xlu0 %v6744_v40, %s4981_s23  ;;  %3299 = vst.msk [vmem:[#allocation5 + $0x8f] sm:$0xfe] %vm3269_vm12, %v3180_v33 }
 0x587   : > { %3348 = vrot.lane.b32.xlu1 %v4949_v10, %s4981_s23 }
 0x588   : > { %v3182_v0 = vpop.permute.xlu0 %3181 }
 0x589   : > { %3300 = vst.msk [vmem:[#allocation5 + $0x97] sm:$0xff] %vm3271_vm7, %v3182_v0  ;;  %v3184_v19 = vpop.permute.xlu1 %3183 }
 0x58a   : > { %3864 = vrot.lane.b32.xlu0 %v4949_v10, %s4984_s17  ;;  %3301 = vst.msk [vmem:[#allocation5 + $0x9f] sm:$0x1] %vm3273_vm9, %v3184_v19 }
 0x58b   : > { %3533 = vrot.lane.b32.xlu1 %v6762_v25, %s4982_s7 }
 0x58c   : > { %v3186_v39 = vpop.permute.xlu0 %3185 }
 0x58d   : > { %3302 = vst.msk [vmem:[#allocation5 + $0x9f] sm:$0xfe] %vm3269_vm12, %v3186_v39  ;;  %v3188_v52 = vpop.permute.xlu1 %3187 }
 0x58e   : > { %3535 = vrot.lane.b32.xlu0 %v6764_v59, %s4982_s7  ;;  %3303 = vst.msk [vmem:[#allocation5 + $0xa7] sm:$0xff] %vm3271_vm7, %v3188_v52 }
 0x58f   : > { %3671 = vrot.lane.b32.xlu1 %v6762_v25, %s4983_s12 }
 0x590   : > { %v3190_v40 = vpop.permute.xlu0 %3189 }
 0x591   : > { %3304 = vst.msk [vmem:[#allocation5 + $0xaf] sm:$0x1] %vm3273_vm9, %v3190_v40  ;;  %v3192_v38 = vpop.permute.xlu1 %3191 }
 0x592   : > { %3673 = vrot.lane.b32.xlu0 %v6764_v59, %s4983_s12  ;;  %3305 = vst.msk [vmem:[#allocation5 + $0xaf] sm:$0xfe] %vm3269_vm12, %v3192_v38 }
 0x593   : > { %3675 = vrot.lane.b32.xlu1 %v4950_v11, %s4983_s12 }
 0x594   : > { %v3194_v4 = vpop.permute.xlu0 %3193 }
 0x595   : > { %3306 = vst.msk [vmem:[#allocation5 + $0xb7] sm:$0xff] %vm3271_vm7, %v3194_v4  ;;  %v3196_v36 = vpop.permute.xlu1 %3195  ;;  %v4954_v4 = vld [vmem:[#allocation3 + $0x100] sm:$0x3] }
 0x596   : > { %3866 = vrot.lane.b32.xlu0 %v6762_v25, %s4984_s17  ;;  %3307 = vst.msk [vmem:[#allocation5 + $0xbf] sm:$0x1] %vm3273_vm9, %v3196_v36 }
 0x597   : > { %3868 = vrot.lane.b32.xlu1 %v6764_v59, %s4984_s17 }
 0x598   : > { %v3198_v47 = vpop.permute.xlu0 %3197 }
 0x599   : > { %3308 = vst.msk [vmem:[#allocation5 + $0xbf] sm:$0xfe] %vm3269_vm12, %v3198_v47  ;;  %v3200_v18 = vpop.permute.xlu1 %3199 }
 0x59a   : > { %3350 = vrot.lane.b32.xlu0 %v6762_v25, %s4981_s23  ;;  %3309 = vst.msk [vmem:[#allocation5 + $0xc7] sm:$0xff] %vm3271_vm7, %v3200_v18 }
 0x59b   : > { %3352 = vrot.lane.b32.xlu1 %v6764_v59, %s4981_s23 }
 0x59c   : > { %v3202_v56 = vpop.permute.xlu0 %3201 }
 0x59d   : > { %3310 = vst.msk [vmem:[#allocation5 + $0xcf] sm:$0x1] %vm3273_vm9, %v3202_v56  ;;  %v3204_v49 = vpop.permute.xlu1 %3203 }
 0x59e   : > { %3354 = vrot.lane.b32.xlu0 %v4950_v11, %s4981_s23  ;;  %3311 = vst.msk [vmem:[#allocation5 + $0xcf] sm:$0xfe] %vm3269_vm12, %v3204_v49 }
 0x59f   : > { %3870 = vrot.lane.b32.xlu1 %v4950_v11, %s4984_s17 }
 0x5a0   : > { %v3206_v43 = vpop.permute.xlu0 %3205 }
 0x5a1   : > { %3312 = vst.msk [vmem:[#allocation5 + $0xd7] sm:$0xff] %vm3271_vm7, %v3206_v43  ;;  %v3208_v42 = vpop.permute.xlu1 %3207 }
 0x5a2   : > { %3537 = vrot.lane.b32.xlu0 %v6782_v12, %s4982_s7  ;;  %3313 = vst.msk [vmem:[#allocation5 + $0xdf] sm:$0x1] %vm3273_vm9, %v3208_v42 }
 0x5a3   : > { %3539 = vrot.lane.b32.xlu1 %v6784_v8, %s4982_s7 }
 0x5a4   : > { %v3210_v25 = vpop.permute.xlu0 %3209 }
 0x5a5   : > { %3314 = vst.msk [vmem:[#allocation5 + $0xdf] sm:$0xfe] %vm3269_vm12, %v3210_v25  ;;  %v3212_v59 = vpop.permute.xlu1 %3211 }
 0x5a6   : > { %3677 = vrot.lane.b32.xlu0 %v6782_v12, %s4983_s12  ;;  %3315 = vst.msk [vmem:[#allocation5 + $0xe7] sm:$0xff] %vm3271_vm7, %v3212_v59 }
 0x5a7   : > { %3679 = vrot.lane.b32.xlu1 %v6784_v8, %s4983_s12 }
 0x5a8   : > { %v3214_v26 = vpop.permute.xlu0 %3213 }
 0x5a9   : > { %3316 = vst.msk [vmem:[#allocation5 + $0xef] sm:$0x1] %vm3273_vm9, %v3214_v26  ;;  %v3216_v48 = vpop.permute.xlu1 %3215 }
 0x5aa   : > { %3681 = vrot.lane.b32.xlu0 %v4951_v44, %s4983_s12  ;;  %3317 = vst.msk [vmem:[#allocation5 + $0xef] sm:$0xfe] %vm3269_vm12, %v3216_v48 }
 0x5ab   : > { %3872 = vrot.lane.b32.xlu1 %v6782_v12, %s4984_s17 }
 0x5ac   : > { %v3218_v53 = vpop.permute.xlu0 %3217 }
 0x5ad   : > { %3318 = vst.msk [vmem:[#allocation5 + $0xf7] sm:$0xff] %vm3271_vm7, %v3218_v53  ;;  %v3220_v61 = vpop.permute.xlu1 %3219  ;;  %v4955_v53 = vld [vmem:[#allocation3 + $0x118] sm:$0x3] }
 0x5ae   : > { %3874 = vrot.lane.b32.xlu0 %v6784_v8, %s4984_s17  ;;  %3319 = vst.msk [vmem:[#allocation5 + $0xff] sm:$0x1] %vm3273_vm9, %v3220_v61 }
 0x5af   : > { %3356 = vrot.lane.b32.xlu1 %v6782_v12, %s4981_s23 }
 0x5b0   : > { %v3321_v5 = vpop.permute.xlu0 %3320 }
 0x5b1   : > { %3465 = vst.msk [vmem:[#allocation5 - $0x2] sm:$0xfc] %vm3464_vm13, %v3321_v5  ;;  %v3323_v41 = vpop.permute.xlu1 %3322 }
 0x5b2   : > { %3358 = vrot.lane.b32.xlu0 %v6784_v8, %s4981_s23  ;;  %3467 = vst.msk [vmem:[#allocation5 + $0x6] sm:$0xff] %vm3466_vm14, %v3323_v41 }
 0x5b3   : > { %3360 = vrot.lane.b32.xlu1 %v4951_v44, %s4981_s23 }
 0x5b4   : > { %v3325_v50 = vpop.permute.xlu0 %3324 }
 0x5b5   : > { %3469 = vst.msk [vmem:[#allocation5 + $0xe] sm:$0x3] %vm3468_vm15, %v3325_v50  ;;  %v3327_v57 = vpop.permute.xlu1 %3326 }
 0x5b6   : > { %3876 = vrot.lane.b32.xlu0 %v4951_v44, %s4984_s17  ;;  %3470 = vst.msk [vmem:[#allocation5 + $0xe] sm:$0xfc] %vm3464_vm13, %v3327_v57 }
 0x5b7   : > { %3541 = vrot.lane.b32.xlu1 %v6802_v54, %s4982_s7 }
 0x5b8   : > { %v3329_v12 = vpop.permute.xlu0 %3328 }
 0x5b9   : > { %3471 = vst.msk [vmem:[#allocation5 + $0x16] sm:$0xff] %vm3466_vm14, %v3329_v12  ;;  %v3331_v8 = vpop.permute.xlu1 %3330 }
 0x5ba   : > { %3543 = vrot.lane.b32.xlu0 %v6804_v7, %s4982_s7  ;;  %3472 = vst.msk [vmem:[#allocation5 + $0x1e] sm:$0x3] %vm3468_vm15, %v3331_v8 }
 0x5bb   : > { %3683 = vrot.lane.b32.xlu1 %v6802_v54, %s4983_s12 }
 0x5bc   : > { %v3522_v1 = vpop.permute.xlu0 %3521 }
 0x5bd   : > { %3616 = vst.msk [vmem:[#allocation5 + $0x10] sm:$0xff] %vm3613_vm0, %v3522_v1  ;;  %v3524_v51 = vpop.permute.xlu1 %3523 }
 0x5be   : > { %3685 = vrot.lane.b32.xlu0 %v6804_v7, %s4983_s12  ;;  %3617 = vst.msk [vmem:[#allocation5 + $0x18] sm:$0xff] %vm3613_vm0, %v3524_v51 }
 0x5bf   : > { %3687 = vrot.lane.b32.xlu1 %v4952_v3, %s4983_s12 }
 0x5c0   : > { %v3654_v27 = vpop.permute.xlu0 %3653 }
 0x5c1   : > { %3797 = vst.msk [vmem:[#allocation5 + $0xf] sm:$0xfe] %vm3791_vm1, %v3654_v27  ;;  %v3656_v45 = vpop.permute.xlu1 %3655  ;;  %v4956_v27 = vld [vmem:[#allocation3 + $0x130] sm:$0x3] }
 0x5c2   : > { %3878 = vrot.lane.b32.xlu0 %v6802_v54, %s4984_s17  ;;  %3798 = vst.msk [vmem:[#allocation5 + $0x17] sm:$0xff] %vm3793_vm2, %v3656_v45 }
 0x5c3   : > { %3880 = vrot.lane.b32.xlu1 %v6804_v7, %s4984_s17 }
 0x5c4   : > { %v3658_v2 = vpop.permute.xlu0 %3657 }
 0x5c5   : > { %3799 = vst.msk [vmem:[#allocation5 + $0x1f] sm:$0x1] %vm3795_vm3, %v3658_v2  ;;  %v3849_v20 = vpop.permute.xlu1 %3848 }
 0x5c6   : > { %3362 = vrot.lane.b32.xlu0 %v6802_v54, %s4981_s23  ;;  %3992 = vst.msk [vmem:[#allocation5 + $0xe] sm:$0xfc] %vm3986_vm4, %v3849_v20 }
 0x5c7   : > { %3364 = vrot.lane.b32.xlu1 %v6804_v7, %s4981_s23 }
 0x5c8   : > { %v3851_v63 = vpop.permute.xlu0 %3850 }
 0x5c9   : > { %3993 = vst.msk [vmem:[#allocation5 + $0x16] sm:$0xff] %vm3988_vm5, %v3851_v63  ;;  %v3333_v28 = vpop.permute.xlu1 %3332 }
 0x5ca   : > { %3366 = vrot.lane.b32.xlu0 %v4952_v3, %s4981_s23  ;;  %3473 = vst.msk [vmem:[#allocation5 + $0x1e] sm:$0xfc] %vm3464_vm13, %v3333_v28 }
 0x5cb   : > { %3882 = vrot.lane.b32.xlu1 %v4952_v3, %s4984_s17 }
 0x5cc   : > { %v3335_v31 = vpop.permute.xlu0 %3334 }
 0x5cd   : > { %3474 = vst.msk [vmem:[#allocation5 + $0x26] sm:$0xff] %vm3466_vm14, %v3335_v31  ;;  %v3337_v54 = vpop.permute.xlu1 %3336 }
 0x5ce   : > { %3545 = vrot.lane.b32.xlu0 %v6822_v35, %s4982_s7  ;;  %3475 = vst.msk [vmem:[#allocation5 + $0x2e] sm:$0x3] %vm3468_vm15, %v3337_v54 }
 0x5cf   : > { %3547 = vrot.lane.b32.xlu1 %v6824_v37, %s4982_s7 }
 0x5d0   : > { %v3853_v7 = vpop.permute.xlu0 %3852  ;;  %v4039_v32 = vld [vmem:[#allocation5 + $0x10] sm:$0xff] }
 0x5d1   : > { %3994 = vst.msk [vmem:[#allocation5 + $0x1e] sm:$0x3] %vm3990_vm6, %v3853_v7  ;;  %4827 = vmatprep.mubr.msk.f32.mxu1 %vm4085_vm10, %v4039_v32  ;;  %v3526_v23 = vpop.permute.xlu1 %3525 }
 0x5d2   : > { %3689 = vrot.lane.b32.xlu0 %v6822_v35, %s4983_s12  ;;  %3618 = vst.msk [vmem:[#allocation5 + $0x20] sm:$0xff] %vm3613_vm0, %v3526_v23 }
 0x5d3   : > { %3691 = vrot.lane.b32.xlu1 %v6824_v37, %s4983_s12 }
 0x5d4   : > { %v3528_v29 = vpop.permute.xlu0 %3527 }
 0x5d5   : > { %3619 = vst.msk [vmem:[#allocation5 + $0x28] sm:$0xff] %vm3613_vm0, %v3528_v29  ;;  %v3660_v10 = vpop.permute.xlu1 %3659 }
 0x5d6   : > { %3693 = vrot.lane.b32.xlu0 %v4953_v46, %s4983_s12  ;;  %3800 = vst.msk [vmem:[#allocation5 + $0x1f] sm:$0xfe] %vm3791_vm1, %v3660_v10 }
 0x5d7   : > { %3884 = vrot.lane.b32.xlu1 %v6822_v35, %s4984_s17 }
 0x5d8   : > { %v3662_v55 = vpop.permute.xlu0 %3661  ;;  %v4040_v30 = vld [vmem:[#allocation5 + $0x18] sm:$0xff] }
 0x5d9   : > { %3801 = vst.msk [vmem:[#allocation5 + $0x27] sm:$0xff] %vm3793_vm2, %v3662_v55  ;;  %4828 = vmatmul.mubr.msk.f32.vlgmr.msra.gmra.mrb[0].mxu1 %vm4085_vm10, %v4040_v30  ;;  %v3664_v33 = vpop.permute.xlu1 %3663 }
 0x5da   : > { %3886 = vrot.lane.b32.xlu0 %v6824_v37, %s4984_s17  ;;  %3802 = vst.msk [vmem:[#allocation5 + $0x2f] sm:$0x1] %vm3795_vm3, %v3664_v33 }
 0x5db   : > { %3368 = vrot.lane.b32.xlu1 %v6822_v35, %s4981_s23 }
 0x5dc   : > { %v3855_v0 = vpop.permute.xlu0 %3854 }
 0x5dd   : > { %3995 = vst.msk [vmem:[#allocation5 + $0x1e] sm:$0xfc] %vm3986_vm4, %v3855_v0  ;;  %v3857_v19 = vpop.permute.xlu1 %3856 }
 0x5de   : > { %3370 = vrot.lane.b32.xlu0 %v6824_v37, %s4981_s23  ;;  %3996 = vst.msk [vmem:[#allocation5 + $0x26] sm:$0xff] %vm3988_vm5, %v3857_v19 }
 0x5df   : > { %3372 = vrot.lane.b32.xlu1 %v4953_v46, %s4981_s23 }
 0x5e0   : > { %v3339_v39 = vpop.permute.xlu0 %3338 }
 0x5e1   : > { %3476 = vst.msk [vmem:[#allocation5 + $0x2e] sm:$0xfc] %vm3464_vm13, %v3339_v39  ;;  %v3341_v52 = vpop.permute.xlu1 %3340 }
 0x5e2   : > { %3888 = vrot.lane.b32.xlu0 %v4953_v46, %s4984_s17  ;;  %3477 = vst.msk [vmem:[#allocation5 + $0x36] sm:$0xff] %vm3466_vm14, %v3341_v52  ;;  %v4957_v46 = vld [vmem:[#allocation3 + $0x148] sm:$0x3] }
 0x5e3   : > { %3549 = vrot.lane.b32.xlu1 %v6842_v58, %s4982_s7 }
 0x5e4   : > { %v3343_v35 = vpop.permute.xlu0 %3342 }
 0x5e5   : > { %3478 = vst.msk [vmem:[#allocation5 + $0x3e] sm:$0x3] %vm3468_vm15, %v3343_v35  ;;  %v3859_v40 = vpop.permute.xlu1 %3858  ;;  %v4041_v37 = vld [vmem:[#allocation5 + $0x20] sm:$0xff] }
 0x5e6   : > { %3551 = vrot.lane.b32.xlu0 %v6844_v60, %s4982_s7  ;;  %3997 = vst.msk [vmem:[#allocation5 + $0x2e] sm:$0x3] %vm3990_vm6, %v3859_v40  ;;  %4830 = vmatprep.mubr.msk.f32.mxu1 %vm4085_vm10, %v4041_v37 }
 0x5e7   : > { %3695 = vrot.lane.b32.xlu1 %v6842_v58, %s4983_s12 }
 0x5e8   : > { %v3530_v38 = vpop.permute.xlu0 %3529 }
 0x5e9   : > { %3620 = vst.msk [vmem:[#allocation5 + $0x30] sm:$0xff] %vm3613_vm0, %v3530_v38  ;;  %v3532_v11 = vpop.permute.xlu1 %3531  ;;  %v4958_v38 = vld [vmem:[#allocation3 + $0x160] sm:$0x3] }
 0x5ea   : > { %3697 = vrot.lane.b32.xlu0 %v6844_v60, %s4983_s12  ;;  %3621 = vst.msk [vmem:[#allocation5 + $0x38] sm:$0xff] %vm3613_vm0, %v3532_v11 }
 0x5eb   : > { %3699 = vrot.lane.b32.xlu1 %v4954_v4, %s4983_s12 }
 0x5ec   : > { %v3666_v36 = vpop.permute.xlu0 %3665 }
 0x5ed   : > { %3803 = vst.msk [vmem:[#allocation5 + $0x2f] sm:$0xfe] %vm3791_vm1, %v3666_v36  ;;  %v3668_v47 = vpop.permute.xlu1 %3667  ;;  %v4042_v18 = vld [vmem:[#allocation5 + $0x28] sm:$0xff] }
 0x5ee   : > { %3890 = vrot.lane.b32.xlu0 %v6842_v58, %s4984_s17  ;;  %3804 = vst.msk [vmem:[#allocation5 + $0x37] sm:$0xff] %vm3793_vm2, %v3668_v47  ;;  %4831 = vmatmul.mubr.msk.f32.gmra.mrb[2].mxu1 %vm4085_vm10, %v4042_v18 }
 0x5ef   : > { %3892 = vrot.lane.b32.xlu1 %v6844_v60, %s4984_s17 }
 0x5f0   : > { %v3670_v56 = vpop.permute.xlu0 %3669 }
 0x5f1   : > { %3805 = vst.msk [vmem:[#allocation5 + $0x3f] sm:$0x1] %vm3795_vm3, %v3670_v56  ;;  %v3861_v49 = vpop.permute.xlu1 %3860 }
 0x5f2   : > { %3374 = vrot.lane.b32.xlu0 %v6842_v58, %s4981_s23  ;;  %3998 = vst.msk [vmem:[#allocation5 + $0x2e] sm:$0xfc] %vm3986_vm4, %v3861_v49 }
 0x5f3   : > { %3376 = vrot.lane.b32.xlu1 %v6844_v60, %s4981_s23 }
 0x5f4   : > { %v3863_v43 = vpop.permute.xlu0 %3862 }
 0x5f5   : > { %3999 = vst.msk [vmem:[#allocation5 + $0x36] sm:$0xff] %vm3988_vm5, %v3863_v43  ;;  %v3345_v42 = vpop.permute.xlu1 %3344 }
 0x5f6   : > { %3378 = vrot.lane.b32.xlu0 %v4954_v4, %s4981_s23  ;;  %3479 = vst.msk [vmem:[#allocation5 + $0x3e] sm:$0xfc] %vm3464_vm13, %v3345_v42 }
 0x5f7   : > { %3894 = vrot.lane.b32.xlu1 %v4954_v4, %s4984_s17 }
 0x5f8   : > { %v3347_v25 = vpop.permute.xlu0 %3346 }
 0x5f9   : > { %3480 = vst.msk [vmem:[#allocation5 + $0x46] sm:$0xff] %vm3466_vm14, %v3347_v25  ;;  %v3349_v59 = vpop.permute.xlu1 %3348 }
 0x5fa   : > { %3553 = vrot.lane.b32.xlu0 %v6862_v6, %s4982_s7  ;;  %3481 = vst.msk [vmem:[#allocation5 + $0x4e] sm:$0x3] %vm3468_vm15, %v3349_v59 }
 0x5fb   : > { %3555 = vrot.lane.b32.xlu1 %v6864_v15, %s4982_s7 }
 0x5fc   : > { %v3865_v58 = vpop.permute.xlu0 %3864  ;;  %v4043_v60 = vld [vmem:[#allocation5 + $0x30] sm:$0xff] }
 0x5fd   : > { %4000 = vst.msk [vmem:[#allocation5 + $0x3e] sm:$0x3] %vm3990_vm6, %v3865_v58  ;;  %4833 = vmatprep.mubr.msk.f32.mxu1 %vm4085_vm10, %v4043_v60  ;;  %v3534_v26 = vpop.permute.xlu1 %3533  ;;  %v4959_v60 = vld [vmem:[#allocation3 + $0x178] sm:$0x3] }
 0x5fe   : > { %3701 = vrot.lane.b32.xlu0 %v6862_v6, %s4983_s12  ;;  %3622 = vst.msk [vmem:[#allocation5 + $0x40] sm:$0xff] %vm3613_vm0, %v3534_v26 }
 0x5ff   : > { %3703 = vrot.lane.b32.xlu1 %v6864_v15, %s4983_s12 }
 0x600   : > { %v3536_v48 = vpop.permute.xlu0 %3535 }
 0x601   : > { %3623 = vst.msk [vmem:[#allocation5 + $0x48] sm:$0xff] %vm3613_vm0, %v3536_v48  ;;  %v3672_v44 = vpop.permute.xlu1 %3671 }
 0x602   : > { %3705 = vrot.lane.b32.xlu0 %v4955_v53, %s4983_s12  ;;  %3806 = vst.msk [vmem:[#allocation5 + $0x3f] sm:$0xfe] %vm3791_vm1, %v3672_v44 }
 0x603   : > { %3896 = vrot.lane.b32.xlu1 %v6862_v6, %s4984_s17 }
 0x604   : > { %v3674_v61 = vpop.permute.xlu0 %3673  ;;  %v4044_v5 = vld [vmem:[#allocation5 + $0x38] sm:$0xff] }
 0x605   : > { %3807 = vst.msk [vmem:[#allocation5 + $0x47] sm:$0xff] %vm3793_vm2, %v3674_v61  ;;  %4834 = vmatmul.mubr.msk.f32.gmra.mrb[4].mxu1 %vm4085_vm10, %v4044_v5  ;;  %v3676_v41 = vpop.permute.xlu1 %3675 }
 0x606   : > { %3898 = vrot.lane.b32.xlu0 %v6864_v15, %s4984_s17  ;;  %3808 = vst.msk [vmem:[#allocation5 + $0x4f] sm:$0x1] %vm3795_vm3, %v3676_v41 }
 0x607   : > { %3380 = vrot.lane.b32.xlu1 %v6862_v6, %s4981_s23 }
 0x608   : > { %v3867_v50 = vpop.permute.xlu0 %3866 }
 0x609   : > { %4001 = vst.msk [vmem:[#allocation5 + $0x3e] sm:$0xfc] %vm3986_vm4, %v3867_v50  ;;  %v3869_v57 = vpop.permute.xlu1 %3868 }
 0x60a   : > { %3382 = vrot.lane.b32.xlu0 %v6864_v15, %s4981_s23  ;;  %4002 = vst.msk [vmem:[#allocation5 + $0x46] sm:$0xff] %vm3988_vm5, %v3869_v57 }
 0x60b   : > { %3384 = vrot.lane.b32.xlu1 %v4955_v53, %s4981_s23 }
 0x60c   : > { %v3351_v12 = vpop.permute.xlu0 %3350 }
 0x60d   : > { %3482 = vst.msk [vmem:[#allocation5 + $0x4e] sm:$0xfc] %vm3464_vm13, %v3351_v12  ;;  %v3353_v8 = vpop.permute.xlu1 %3352 }
 0x60e   : > { %3900 = vrot.lane.b32.xlu0 %v4955_v53, %s4984_s17  ;;  %3483 = vst.msk [vmem:[#allocation5 + $0x56] sm:$0xff] %vm3466_vm14, %v3353_v8 }
 0x60f   : > { %3557 = vrot.lane.b32.xlu1 %v6882_v9, %s4982_s7 }
 0x610   : > { %v3355_v6 = vpop.permute.xlu0 %3354 }
 0x611   : > { %3484 = vst.msk [vmem:[#allocation5 + $0x5e] sm:$0x3] %vm3468_vm15, %v3355_v6  ;;  %v3871_v1 = vpop.permute.xlu1 %3870  ;;  %v4045_v15 = vld [vmem:[#allocation5 + $0x40] sm:$0xff] }
 0x612   : > { %3559 = vrot.lane.b32.xlu0 %v6884_v34, %s4982_s7  ;;  %4003 = vst.msk [vmem:[#allocation5 + $0x4e] sm:$0x3] %vm3990_vm6, %v3871_v1  ;;  %4836 = vmatprep.mubr.msk.f32.mxu1 %vm4085_vm10, %v4045_v15  ;;  %v4962_v1 = vld [vmem:[#allocation3 + $0x190] sm:$0x3] }
 0x613   : > { %3707 = vrot.lane.b32.xlu1 %v6882_v9, %s4983_s12 }
 0x614   : > { %v3538_v51 = vpop.permute.xlu0 %3537 }
 0x615   : > { %3624 = vst.msk [vmem:[#allocation5 + $0x50] sm:$0xff] %vm3613_vm0, %v3538_v51  ;;  %v3540_v3 = vpop.permute.xlu1 %3539 }
 0x616   : > { %3709 = vrot.lane.b32.xlu0 %v6884_v34, %s4983_s12  ;;  %3625 = vst.msk [vmem:[#allocation5 + $0x58] sm:$0xff] %vm3613_vm0, %v3540_v3 }
 0x617   : > { %3711 = vrot.lane.b32.xlu1 %v4956_v27, %s4983_s12 }
 0x618   : > { %v3678_v45 = vpop.permute.xlu0 %3677 }
 0x619   : > { %3809 = vst.msk [vmem:[#allocation5 + $0x4f] sm:$0xfe] %vm3791_vm1, %v3678_v45  ;;  %v3680_v2 = vpop.permute.xlu1 %3679  ;;  %v4046_v20 = vld [vmem:[#allocation5 + $0x48] sm:$0xff] }
 0x61a   : > { %3902 = vrot.lane.b32.xlu0 %v6882_v9, %s4984_s17  ;;  %3810 = vst.msk [vmem:[#allocation5 + $0x57] sm:$0xff] %vm3793_vm2, %v3680_v2  ;;  %4837 = vmatmul.mubr.msk.f32.gmra.mrb[6].mxu1 %vm4085_vm10, %v4046_v20 }
 0x61b   : > { %3904 = vrot.lane.b32.xlu1 %v6884_v34, %s4984_s17 }
 0x61c   : > { %v3682_v63 = vpop.permute.xlu0 %3681 }
 0x61d   : > { %3811 = vst.msk [vmem:[#allocation5 + $0x5f] sm:$0x1] %vm3795_vm3, %v3682_v63  ;;  %v3873_v28 = vpop.permute.xlu1 %3872 }
 0x61e   : > { %3386 = vrot.lane.b32.xlu0 %v6882_v9, %s4981_s23  ;;  %4004 = vst.msk [vmem:[#allocation5 + $0x4e] sm:$0xfc] %vm3986_vm4, %v3873_v28 }
 0x61f   : > { %3388 = vrot.lane.b32.xlu1 %v6884_v34, %s4981_s23 }
 0x620   : > { %v3875_v31 = vpop.permute.xlu0 %3874 }
 0x621   : > { %4005 = vst.msk [vmem:[#allocation5 + $0x56] sm:$0xff] %vm3988_vm5, %v3875_v31  ;;  %v3357_v54 = vpop.permute.xlu1 %3356  ;;  %v2520_v31 = vld [vmem:[#allocation3 + $0x198] sm:$0xff] }
 0x622   : > { %3390 = vrot.lane.b32.xlu0 %v4956_v27, %s4981_s23  ;;  %3485 = vst.msk [vmem:[#allocation5 + $0x5e] sm:$0xfc] %vm3464_vm13, %v3357_v54 }
 0x623   : > { %3906 = vrot.lane.b32.xlu1 %v4956_v27, %s4984_s17 }
 0x624   : > { %v3359_v7 = vpop.permute.xlu0 %3358 }
 0x625   : > { %3486 = vst.msk [vmem:[#allocation5 + $0x66] sm:$0xff] %vm3466_vm14, %v3359_v7  ;;  %v3361_v32 = vpop.permute.xlu1 %3360 }
 0x626   : > { %3561 = vrot.lane.b32.xlu0 %v6902_v21, %s4982_s7  ;;  %3487 = vst.msk [vmem:[#allocation5 + $0x6e] sm:$0x3] %vm3468_vm15, %v3361_v32  ;;  %v2521_v32 = vld [vmem:[#allocation3 + $0x1a0] sm:$0xff] }
 0x627   : > { %3563 = vrot.lane.b32.xlu1 %v6904_v62, %s4982_s7 }
 0x628   : > { %v3877_v9 = vpop.permute.xlu0 %3876  ;;  %v4047_v34 = vld [vmem:[#allocation5 + $0x50] sm:$0xff] }
 0x629   : > { %4006 = vst.msk [vmem:[#allocation5 + $0x5e] sm:$0x3] %vm3990_vm6, %v3877_v9  ;;  %4839 = vmatprep.mubr.msk.f32.mxu1 %vm4085_vm10, %v4047_v34  ;;  %v3542_v23 = vpop.permute.xlu1 %3541 }
 0x62a   : > { %3713 = vrot.lane.b32.xlu0 %v6902_v21, %s4983_s12  ;;  %3626 = vst.msk [vmem:[#allocation5 + $0x60] sm:$0xff] %vm3613_vm0, %v3542_v23 }
 0x62b   : > { %3715 = vrot.lane.b32.xlu1 %v6904_v62, %s4983_s12 }
 0x62c   : > { %v3544_v29 = vpop.permute.xlu0 %3543 }
 0x62d   : > { %3627 = vst.msk [vmem:[#allocation5 + $0x68] sm:$0xff] %vm3613_vm0, %v3544_v29  ;;  %v3684_v10 = vpop.permute.xlu1 %3683 }
 0x62e   : > { %3717 = vrot.lane.b32.xlu0 %v4957_v46, %s4983_s12  ;;  %3812 = vst.msk [vmem:[#allocation5 + $0x5f] sm:$0xfe] %vm3791_vm1, %v3684_v10 }
 0x62f   : > { %3908 = vrot.lane.b32.xlu1 %v6902_v21, %s4984_s17 }
 0x630   : > { %v3686_v55 = vpop.permute.xlu0 %3685  ;;  %v4048_v30 = vld [vmem:[#allocation5 + $0x58] sm:$0xff] }
 0x631   : > { %3813 = vst.msk [vmem:[#allocation5 + $0x67] sm:$0xff] %vm3793_vm2, %v3686_v55  ;;  %4840 = vmatmul.mubr.msk.f32.gmra.mrb[8].mxu1 %vm4085_vm10, %v4048_v30  ;;  %v3688_v33 = vpop.permute.xlu1 %3687  ;;  %v2522_v30 = vld [vmem:[#allocation3 + $0x1a8] sm:$0x3] }
 0x632   : > { %3910 = vrot.lane.b32.xlu0 %v6904_v62, %s4984_s17  ;;  %3814 = vst.msk [vmem:[#allocation5 + $0x6f] sm:$0x1] %vm3795_vm3, %v3688_v33 }
 0x633   : > { %3392 = vrot.lane.b32.xlu1 %v6902_v21, %s4981_s23 }
 0x634   : > { %v3879_v0 = vpop.permute.xlu0 %3878 }
 0x635   : > { %4007 = vst.msk [vmem:[#allocation5 + $0x5e] sm:$0xfc] %vm3986_vm4, %v3879_v0  ;;  %v3881_v19 = vpop.permute.xlu1 %3880  ;;  %v4963_v0 = vld [vmem:[#allocation3 + $0x40] sm:$0x3] }
 0x636   : > { %3394 = vrot.lane.b32.xlu0 %v6904_v62, %s4981_s23  ;;  %4008 = vst.msk [vmem:[#allocation5 + $0x66] sm:$0xff] %vm3988_vm5, %v3881_v19 }
 0x637   : > { %3396 = vrot.lane.b32.xlu1 %v4957_v46, %s4981_s23 }
 0x638   : > { %v3363_v39 = vpop.permute.xlu0 %3362 }
 0x639   : > { %3488 = vst.msk [vmem:[#allocation5 + $0x6e] sm:$0xfc] %vm3464_vm13, %v3363_v39  ;;  %v3365_v52 = vpop.permute.xlu1 %3364 }
 0x63a   : > { %3912 = vrot.lane.b32.xlu0 %v4957_v46, %s4984_s17  ;;  %3489 = vst.msk [vmem:[#allocation5 + $0x76] sm:$0xff] %vm3466_vm14, %v3365_v52 }
 0x63b   : > { %3565 = vrot.lane.b32.xlu1 %v6920_v14, %s4982_s7 }
 0x63c   : > { %v3367_v21 = vpop.permute.xlu0 %3366 }
 0x63d   : > { %3490 = vst.msk [vmem:[#allocation5 + $0x7e] sm:$0x3] %vm3468_vm15, %v3367_v21  ;;  %v3883_v35 = vpop.permute.xlu1 %3882  ;;  %v4049_v62 = vld [vmem:[#allocation5 + $0x60] sm:$0xff] }
 0x63e   : > { %3567 = vrot.lane.b32.xlu0 %v6922_v22, %s4982_s7  ;;  %4009 = vst.msk [vmem:[#allocation5 + $0x6e] sm:$0x3] %vm3990_vm6, %v3883_v35  ;;  %4842 = vmatprep.mubr.msk.f32.mxu1 %vm4085_vm10, %v4049_v62 }
 0x63f   : > { %3719 = vrot.lane.b32.xlu1 %v6920_v14, %s4983_s12 }
 0x640   : > { %v3546_v40 = vpop.permute.xlu0 %3545 }
 0x641   : > { %3628 = vst.msk [vmem:[#allocation5 + $0x70] sm:$0xff] %vm3613_vm0, %v3546_v40  ;;  %v3548_v37 = vpop.permute.xlu1 %3547 }
 0x642   : > { %3721 = vrot.lane.b32.xlu0 %v6922_v22, %s4983_s12  ;;  %3629 = vst.msk [vmem:[#allocation5 + $0x78] sm:$0xff] %vm3613_vm0, %v3548_v37 }
 0x643   : > { %3723 = vrot.lane.b32.xlu1 %v4958_v38, %s4983_s12 }
 0x644   : > { %v3690_v11 = vpop.permute.xlu0 %3689 }
 0x645   : > { %3815 = vst.msk [vmem:[#allocation5 + $0x6f] sm:$0xfe] %vm3791_vm1, %v3690_v11  ;;  %v3692_v4 = vpop.permute.xlu1 %3691  ;;  %v4050_v36 = vld [vmem:[#allocation5 + $0x68] sm:$0xff] }
 0x646   : > { %3914 = vrot.lane.b32.xlu0 %v6920_v14, %s4984_s17  ;;  %3816 = vst.msk [vmem:[#allocation5 + $0x77] sm:$0xff] %vm3793_vm2, %v3692_v4  ;;  %4843 = vmatmul.mubr.msk.f32.gmra.mrb[10].mxu1 %vm4085_vm10, %v4050_v36 }
 0x647   : > { %3916 = vrot.lane.b32.xlu1 %v6922_v22, %s4984_s17 }
 0x648   : > { %v3694_v47 = vpop.permute.xlu0 %3693 }
 0x649   : > { %3817 = vst.msk [vmem:[#allocation5 + $0x7f] sm:$0x1] %vm3795_vm3, %v3694_v47  ;;  %v3885_v18 = vpop.permute.xlu1 %3884 }
 0x64a   : > { %3398 = vrot.lane.b32.xlu0 %v6920_v14, %s4981_s23  ;;  %4010 = vst.msk [vmem:[#allocation5 + $0x6e] sm:$0xfc] %vm3986_vm4, %v3885_v18 }
 0x64b   : > { %3400 = vrot.lane.b32.xlu1 %v6922_v22, %s4981_s23 }
 0x64c   : > { %v3887_v56 = vpop.permute.xlu0 %3886 }
 0x64d   : > { %4011 = vst.msk [vmem:[#allocation5 + $0x76] sm:$0xff] %vm3988_vm5, %v3887_v56  ;;  %v3369_v49 = vpop.permute.xlu1 %3368  ;;  %v7853_v56 = vld [vmem:[%s8028_s4] ss:$0 sm:$0xff] }
 0x64e   : > { %3402 = vrot.lane.b32.xlu0 %v4958_v38, %s4981_s23  ;;  %3491 = vst.msk [vmem:[#allocation5 + $0x7e] sm:$0xfc] %vm3464_vm13, %v3369_v49 }
 0x64f   : > { %3918 = vrot.lane.b32.xlu1 %v4958_v38, %s4984_s17 }
 0x650   : > { %v3371_v43 = vpop.permute.xlu0 %3370 }
 0x651   : > { %3492 = vst.msk [vmem:[#allocation5 + $0x86] sm:$0xff] %vm3466_vm14, %v3371_v43  ;;  %v3373_v42 = vpop.permute.xlu1 %3372 }
 0x652   : > { %3569 = vrot.lane.b32.xlu0 %v6936_v16, %s4982_s7  ;;  %3493 = vst.msk [vmem:[#allocation5 + $0x8e] sm:$0x3] %vm3468_vm15, %v3373_v42 }
 0x653   : > { %3571 = vrot.lane.b32.xlu1 %v6938_v17, %s4982_s7 }
 0x654   : > { %v3889_v14 = vpop.permute.xlu0 %3888  ;;  %v4051_v22 = vld [vmem:[#allocation5 + $0x70] sm:$0xff] }
 0x655   : > { %4012 = vst.msk [vmem:[#allocation5 + $0x7e] sm:$0x3] %vm3990_vm6, %v3889_v14  ;;  %4845 = vmatprep.mubr.msk.f32.mxu1 %vm4085_vm10, %v4051_v22  ;;  %v3550_v25 = vpop.permute.xlu1 %3549 }
 0x656   : > { %3725 = vrot.lane.b32.xlu0 %v6936_v16, %s4983_s12  ;;  %3630 = vst.msk [vmem:[#allocation5 + $0x80] sm:$0xff] %vm3613_vm0, %v3550_v25 }
 0x657   : > { %3727 = vrot.lane.b32.xlu1 %v6938_v17, %s4983_s12 }
 0x658   : > { %v3552_v59 = vpop.permute.xlu0 %3551 }
 0x659   : > { %3631 = vst.msk [vmem:[#allocation5 + $0x88] sm:$0xff] %vm3613_vm0, %v3552_v59  ;;  %v3696_v58 = vpop.permute.xlu1 %3695 }
 0x65a   : > { %3729 = vrot.lane.b32.xlu0 %v4959_v60, %s4983_s12  ;;  %3818 = vst.msk [vmem:[#allocation5 + $0x7f] sm:$0xfe] %vm3791_vm1, %v3696_v58 }
 0x65b   : > { %3920 = vrot.lane.b32.xlu1 %v6936_v16, %s4984_s17 }
 0x65c   : > { %v3698_v26 = vpop.permute.xlu0 %3697  ;;  %v4052_v48 = vld [vmem:[#allocation5 + $0x78] sm:$0xff] }
 0x65d   : > { %3819 = vst.msk [vmem:[#allocation5 + $0x87] sm:$0xff] %vm3793_vm2, %v3698_v26  ;;  %4846 = vmatmul.mubr.msk.f32.gmra.mrb[12].mxu1 %vm4085_vm10, %v4052_v48  ;;  %v3700_v44 = vpop.permute.xlu1 %3699 }
 0x65e   : > { %3922 = vrot.lane.b32.xlu0 %v6938_v17, %s4984_s17  ;;  %3820 = vst.msk [vmem:[#allocation5 + $0x8f] sm:$0x1] %vm3795_vm3, %v3700_v44 }
 0x65f   : > { %3404 = vrot.lane.b32.xlu1 %v6936_v16, %s4981_s23  ;;  %v4960_v16 = vld [vmem:[#allocation3 + $0x180] sm:$0xff] }
 0x660   : > { %v3891_v53 = vpop.permute.xlu0 %3890 }
 0x661   : > { %4013 = vst.msk [vmem:[#allocation5 + $0x7e] sm:$0xfc] %vm3986_vm4, %v3891_v53  ;;  %v3893_v61 = vpop.permute.xlu1 %3892 }
 0x662   : > { %3406 = vrot.lane.b32.xlu0 %v6938_v17, %s4981_s23  ;;  %4014 = vst.msk [vmem:[#allocation5 + $0x86] sm:$0xff] %vm3988_vm5, %v3893_v61  ;;  %v4961_v17 = vld [vmem:[#allocation3 + $0x188] sm:$0xff] }
 0x663   : > { %3408 = vrot.lane.b32.xlu1 %v4959_v60, %s4981_s23 }
 0x664   : > { %v3375_v5 = vpop.permute.xlu0 %3374 }
 0x665   : > { %3494 = vst.msk [vmem:[#allocation5 + $0x8e] sm:$0xfc] %vm3464_vm13, %v3375_v5  ;;  %v3377_v41 = vpop.permute.xlu1 %3376 }
 0x666   : > { %3924 = vrot.lane.b32.xlu0 %v4959_v60, %s4984_s17  ;;  %3495 = vst.msk [vmem:[#allocation5 + $0x96] sm:$0xff] %vm3466_vm14, %v3377_v41 }
 0x667   : > { %3573 = vrot.lane.b32.xlu1 %v4960_v16, %s4982_s7 }
 0x668   : > { %v3379_v50 = vpop.permute.xlu0 %3378 }
 0x669   : > { %3496 = vst.msk [vmem:[#allocation5 + $0x9e] sm:$0x3] %vm3468_vm15, %v3379_v50  ;;  %v3895_v57 = vpop.permute.xlu1 %3894  ;;  %v4053_v12 = vld [vmem:[#allocation5 + $0x80] sm:$0xff] }
 0x66a   : > { %3575 = vrot.lane.b32.xlu0 %v4961_v17, %s4982_s7  ;;  %4015 = vst.msk [vmem:[#allocation5 + $0x8e] sm:$0x3] %vm3990_vm6, %v3895_v57  ;;  %4848 = vmatprep.mubr.msk.f32.mxu1 %vm4085_vm10, %v4053_v12 }
 0x66b   : > { %3731 = vrot.lane.b32.xlu1 %v4960_v16, %s4983_s12 }
 0x66c   : > { %v3554_v8 = vpop.permute.xlu0 %3553 }
 0x66d   : > { %3632 = vst.msk [vmem:[#allocation5 + $0x90] sm:$0xff] %vm3613_vm0, %v3554_v8  ;;  %v3556_v6 = vpop.permute.xlu1 %3555 }
 0x66e   : > { %3733 = vrot.lane.b32.xlu0 %v4961_v17, %s4983_s12  ;;  %3633 = vst.msk [vmem:[#allocation5 + $0x98] sm:$0xff] %vm3613_vm0, %v3556_v6 }
 0x66f   : > { %3735 = vrot.lane.b32.xlu1 %v4962_v1, %s4983_s12 }
 0x670   : > { %v3702_v15 = vpop.permute.xlu0 %3701 }
 0x671   : > { %3821 = vst.msk [vmem:[#allocation5 + $0x8f] sm:$0xfe] %vm3791_vm1, %v3702_v15  ;;  %v3704_v51 = vpop.permute.xlu1 %3703  ;;  %v4054_v3 = vld [vmem:[#allocation5 + $0x88] sm:$0xff] }
 0x672   : > { %3926 = vrot.lane.b32.xlu0 %v4960_v16, %s4984_s17  ;;  %3822 = vst.msk [vmem:[#allocation5 + $0x97] sm:$0xff] %vm3793_vm2, %v3704_v51  ;;  %4849 = vmatmul.mubr.msk.f32.gmra.mrb[14].mxu1 %vm4085_vm10, %v4054_v3 }
 0x673   : > { %3928 = vrot.lane.b32.xlu1 %v4961_v17, %s4984_s17 }
 0x674   : > { %v3706_v27 = vpop.permute.xlu0 %3705 }
 0x675   : > { %3823 = vst.msk [vmem:[#allocation5 + $0x9f] sm:$0x1] %vm3795_vm3, %v3706_v27  ;;  %v3897_v45 = vpop.permute.xlu1 %3896 }
 0x676   : > { %3410 = vrot.lane.b32.xlu0 %v4960_v16, %s4981_s23  ;;  %4016 = vst.msk [vmem:[#allocation5 + $0x8e] sm:$0xfc] %vm3986_vm4, %v3897_v45 }
 0x677   : > { %3412 = vrot.lane.b32.xlu1 %v4961_v17, %s4981_s23 }
 0x678   : > { %v3899_v2 = vpop.permute.xlu0 %3898 }
 0x679   : > { %4017 = vst.msk [vmem:[#allocation5 + $0x96] sm:$0xff] %vm3988_vm5, %v3899_v2  ;;  %v3381_v20 = vpop.permute.xlu1 %3380 }
 0x67a   : > { %3414 = vrot.lane.b32.xlu0 %v4962_v1, %s4981_s23  ;;  %3497 = vst.msk [vmem:[#allocation5 + $0x9e] sm:$0xfc] %vm3464_vm13, %v3381_v20 }
 0x67b   : > { %3930 = vrot.lane.b32.xlu1 %v4962_v1, %s4984_s17 }
 0x67c   : > { %v3383_v63 = vpop.permute.xlu0 %3382 }
 0x67d   : > { %3498 = vst.msk [vmem:[#allocation5 + $0xa6] sm:$0xff] %vm3466_vm14, %v3383_v63  ;;  %v3385_v28 = vpop.permute.xlu1 %3384 }
 0x67e   : > { %3517 = vrot.lane.b32.xlu0 %v6682_v13, %s4982_s7  ;;  %3499 = vst.msk [vmem:[#allocation5 + $0xae] sm:$0x3] %vm3468_vm15, %v3385_v28 }
 0x67f   : > { %3519 = vrot.lane.b32.xlu1 %v6684_v24, %s4982_s7 }
 0x680   : > { %v3901_v54 = vpop.permute.xlu0 %3900  ;;  %v4055_v7 = vld [vmem:[#allocation5 + $0x90] sm:$0xff] }
 0x681   : > { %4018 = vst.msk [vmem:[#allocation5 + $0x9e] sm:$0x3] %vm3990_vm6, %v3901_v54  ;;  %4851 = vmatprep.mubr.msk.f32.mxu1 %vm4085_vm10, %v4055_v7  ;;  %v3558_v9 = vpop.permute.xlu1 %3557 }
 0x682   : > { %3577 = vrot.lane.b32.xlu0 %v2520_v31, %s4982_s7  ;;  %3634 = vst.msk [vmem:[#allocation5 + $0xa0] sm:$0xff] %vm3613_vm0, %v3558_v9 }
 0x683   : > { %3579 = vrot.lane.b32.xlu1 %v2521_v32, %s4982_s7 }
 0x684   : > { %v3560_v34 = vpop.permute.xlu0 %3559 }
 0x685   : > { %3635 = vst.msk [vmem:[#allocation5 + $0xa8] sm:$0xff] %vm3613_vm0, %v3560_v34  ;;  %v3708_v23 = vpop.permute.xlu1 %3707 }
 0x686   : > { %3647 = vrot.lane.b32.xlu0 %v6682_v13, %s4983_s12  ;;  %3824 = vst.msk [vmem:[#allocation5 + $0x9f] sm:$0xfe] %vm3791_vm1, %v3708_v23 }
 0x687   : > { %3649 = vrot.lane.b32.xlu1 %v6684_v24, %s4983_s12 }
 0x688   : > { %v3710_v29 = vpop.permute.xlu0 %3709  ;;  %v4056_v10 = vld [vmem:[#allocation5 + $0x98] sm:$0xff] }
 0x689   : > { %3825 = vst.msk [vmem:[#allocation5 + $0xa7] sm:$0xff] %vm3793_vm2, %v3710_v29  ;;  %4852 = vmatmul.mubr.msk.f32.gmra.mrb[16].mxu1 %vm4085_vm10, %v4056_v10  ;;  %v3712_v46 = vpop.permute.xlu1 %3711 }
 0x68a   : > { %3737 = vrot.lane.b32.xlu0 %v2520_v31, %s4983_s12  ;;  %3826 = vst.msk [vmem:[#allocation5 + $0xaf] sm:$0x1] %vm3795_vm3, %v3712_v46 }
 0x68b   : > { %3739 = vrot.lane.b32.xlu1 %v2521_v32, %s4983_s12 }
 0x68c   : > { %v3903_v55 = vpop.permute.xlu0 %3902 }
 0x68d   : > { %4019 = vst.msk [vmem:[#allocation5 + $0x9e] sm:$0xfc] %vm3986_vm4, %v3903_v55  ;;  %v3905_v33 = vpop.permute.xlu1 %3904 }
 0x68e   : > { %3651 = vrot.lane.b32.xlu0 %v4963_v0, %s4983_s12  ;;  %4020 = vst.msk [vmem:[#allocation5 + $0xa6] sm:$0xff] %vm3988_vm5, %v3905_v33 }
 0x68f   : > { %3741 = vrot.lane.b32.xlu1 %v2522_v30, %s4983_s12 }
 0x690   : > { %v3387_v19 = vpop.permute.xlu0 %3386 }
 0x691   : > { %3500 = vst.msk [vmem:[#allocation5 + $0xae] sm:$0xfc] %vm3464_vm13, %v3387_v19  ;;  %v3389_v39 = vpop.permute.xlu1 %3388 }
 0x692   : > { %3842 = vrot.lane.b32.xlu0 %v6682_v13, %s4984_s17  ;;  %3501 = vst.msk [vmem:[#allocation5 + $0xb6] sm:$0xff] %vm3466_vm14, %v3389_v39 }
 0x693   : > { %3844 = vrot.lane.b32.xlu1 %v6684_v24, %s4984_s17 }
 0x694   : > { %v3391_v52 = vpop.permute.xlu0 %3390 }
 0x695   : > { %3502 = vst.msk [vmem:[#allocation5 + $0xbe] sm:$0x3] %vm3468_vm15, %v3391_v52  ;;  %v3907_v21 = vpop.permute.xlu1 %3906  ;;  %v4057_v35 = vld [vmem:[#allocation5 + $0xa0] sm:$0xff] }
 0x696   : > { %3932 = vrot.lane.b32.xlu0 %v2520_v31, %s4984_s17  ;;  %4021 = vst.msk [vmem:[#allocation5 + $0xae] sm:$0x3] %vm3990_vm6, %v3907_v21  ;;  %4854 = vmatprep.mubr.msk.f32.mxu1 %vm4085_vm10, %v4057_v35 }
 0x697   : > { %3934 = vrot.lane.b32.xlu1 %v2521_v32, %s4984_s17 }
 0x698   : > { %v3562_v62 = vpop.permute.xlu0 %3561 }
 0x699   : > { %3636 = vst.msk [vmem:[#allocation5 + $0xb0] sm:$0xff] %vm3613_vm0, %v3562_v62  ;;  %v3564_v13 = vpop.permute.xlu1 %3563 }
 0x69a   : > { %3846 = vrot.lane.b32.xlu0 %v4963_v0, %s4984_s17  ;;  %3637 = vst.msk [vmem:[#allocation5 + $0xb8] sm:$0xff] %vm3613_vm0, %v3564_v13 }
 0x69b   : > { %3936 = vrot.lane.b32.xlu1 %v2522_v30, %s4984_s17 }
 0x69c   : > { %v3714_v24 = vpop.permute.xlu0 %3713 }
 0x69d   : > { %3827 = vst.msk [vmem:[#allocation5 + $0xaf] sm:$0xfe] %vm3791_vm1, %v3714_v24  ;;  %v3716_v40 = vpop.permute.xlu1 %3715  ;;  %v4058_v37 = vld [vmem:[#allocation5 + $0xa8] sm:$0xff] }
 0x69e   : > { %3828 = vst.msk [vmem:[#allocation5 + $0xb7] sm:$0xff] %vm3793_vm2, %v3716_v40  ;;  %4855 = vmatmul.mubr.msk.f32.gmra.mrb[18].mxu1 %vm4085_vm10, %v4058_v37 }
 0x6a0   : > { %v3718_v38 = vpop.permute.xlu0 %3717 }
 0x6a1   : > { %3829 = vst.msk [vmem:[#allocation5 + $0xbf] sm:$0x1] %vm3795_vm3, %v3718_v38  ;;  %v3909_v11 = vpop.permute.xlu1 %3908 }
 0x6a2   : > { %4022 = vst.msk [vmem:[#allocation5 + $0xae] sm:$0xfc] %vm3986_vm4, %v3909_v11 }
 0x6a4   : > { %v3911_v4 = vpop.permute.xlu0 %3910 }
 0x6a5   : > { %4023 = vst.msk [vmem:[#allocation5 + $0xb6] sm:$0xff] %vm3988_vm5, %v3911_v4  ;;  %v3393_v36 = vpop.permute.xlu1 %3392 }
 0x6a6   : > { %3503 = vst.msk [vmem:[#allocation5 + $0xbe] sm:$0xfc] %vm3464_vm13, %v3393_v36 }
 0x6a8   : > { %v3395_v47 = vpop.permute.xlu0 %3394 }
 0x6a9   : > { %3504 = vst.msk [vmem:[#allocation5 + $0xc6] sm:$0xff] %vm3466_vm14, %v3395_v47  ;;  %v3397_v18 = vpop.permute.xlu1 %3396 }
 0x6aa   : > { %3505 = vst.msk [vmem:[#allocation5 + $0xce] sm:$0x3] %vm3468_vm15, %v3397_v18 }
 0x6ac   : > { %v4829_v49 = vpop.f32.mrb[0].mxu1  ;;  %v3913_v43 = vpop.permute.xlu0 %3912  ;;  %v4059_v42 = vld [vmem:[#allocation5 + $0xb0] sm:$0xff] }
 0x6ad   : > { %v4264_v14 = vadd.f32 %v4829_v49, %v7853_v56  ;;  %4024 = vst.msk [vmem:[#allocation5 + $0xbe] sm:$0x3] %vm3990_vm6, %v3913_v43  ;;  %v4258_v22 = vpop.f32.mrb[1].mxu1  ;;  %4857 = vmatprep.mubr.msk.f32.mxu1 %vm4085_vm10, %v4059_v42  ;;  %v3566_v59 = vpop.permute.xlu1 %3565 }
 0x6ae   : > { %v4259_v25 = vadd.f32 %v7853_v56, %v4258_v22  ;;  %3638 = vst.msk [vmem:[#allocation5 + $0xc0] sm:$0xff] %vm3613_vm0, %v3566_v59 }
 0x6af   : > { %vm4410_vm11 = vcmp.ge.f32.partialorder %v4264_v14, 0.0  ;;  %v4442_v58 = vmul.f32 0.01, %v4264_v14 }
 0x6b0   : > { %vm4409_vm12 = vcmp.ge.f32.partialorder %v4259_v25, 0.0  ;;  %v4441_v60 = vmul.f32 0.01, %v4259_v25  ;;  %v3568_v26 = vpop.permute.xlu0 %3567 }
 0x6b1   : > { %v4474_v48 = vsel %vm4410_vm11, %v4264_v14, %v4442_v58  ;;  %3639 = vst.msk [vmem:[#allocation5 + $0xc8] sm:$0xff] %vm3613_vm0, %v3568_v26  ;;  %v3720_v53 = vpop.permute.xlu1 %3719 }
 0x6b2   : > { %4506 = vst.msk [vmem:[%s7865_s27 + $0x18] sm:$0xff] %vm2380_vm8, %v4474_v48  ;;  %v4473_v44 = vsel %vm4409_vm12, %v4259_v25, %v4441_v60 }
 0x6b3   : > { %4505 = vst.msk [vmem:[%s7865_s27 + $0x10] sm:$0xff] %vm2380_vm8, %v4473_v44 }
 0x6b4   : > { %3830 = vst.msk [vmem:[#allocation5 + $0xbf] sm:$0xfe] %vm3791_vm1, %v3720_v53  ;;  %v3722_v61 = vpop.permute.xlu0 %3721  ;;  %v4060_v5 = vld [vmem:[#allocation5 + $0xb8] sm:$0xff] }
 0x6b5   : > { %3831 = vst.msk [vmem:[#allocation5 + $0xc7] sm:$0xff] %vm3793_vm2, %v3722_v61  ;;  %4858 = vmatmul.mubr.msk.f32.gmra.mrb[20].mxu1 %vm4085_vm10, %v4060_v5  ;;  %v3724_v41 = vpop.permute.xlu1 %3723 }
 0x6b6   : > { %3832 = vst.msk [vmem:[#allocation5 + $0xcf] sm:$0x1] %vm3795_vm3, %v3724_v41 }
 0x6b8   : > { %v3915_v16 = vpop.permute.xlu0 %3914 }
 0x6b9   : > { %4025 = vst.msk [vmem:[#allocation5 + $0xbe] sm:$0xfc] %vm3986_vm4, %v3915_v16  ;;  %v3917_v50 = vpop.permute.xlu1 %3916 }
 0x6ba   : > { %4026 = vst.msk [vmem:[#allocation5 + $0xc6] sm:$0xff] %vm3988_vm5, %v3917_v50 }
 0x6bc   : > { %v3399_v57 = vpop.permute.xlu0 %3398 }
 0x6bd   : > { %3506 = vst.msk [vmem:[#allocation5 + $0xce] sm:$0xfc] %vm3464_vm13, %v3399_v57  ;;  %v3401_v17 = vpop.permute.xlu1 %3400 }
 0x6be   : > { %3507 = vst.msk [vmem:[#allocation5 + $0xd6] sm:$0xff] %vm3466_vm14, %v3401_v17 }
 0x6c0   : > { %v3403_v12 = vpop.permute.xlu0 %3402 }
 0x6c1   : > { %3508 = vst.msk [vmem:[#allocation5 + $0xde] sm:$0x3] %vm3468_vm15, %v3403_v12  ;;  %v3919_v8 = vpop.permute.xlu1 %3918  ;;  %v4832_v6 = vpop.f32.mrb[2].mxu1  ;;  %v4061_v1 = vld [vmem:[#allocation5 + $0xc0] sm:$0xff] }
 0x6c2   : > { %4027 = vst.msk [vmem:[#allocation5 + $0xce] sm:$0x3] %vm3990_vm6, %v3919_v8  ;;  %v4274_v15 = vadd.f32 %v4832_v6, %v7853_v56  ;;  %v4268_v51 = vpop.f32.mrb[3].mxu1  ;;  %4860 = vmatprep.mubr.msk.f32.mxu1 %vm4085_vm10, %v4061_v1 }
 0x6c3   : > { %v4269_v3 = vadd.f32 %v7853_v56, %v4268_v51 }
 0x6c4   : > { %v3570_v27 = vpop.permute.xlu0 %3569  ;;  %vm4412_vm7 = vcmp.ge.f32.partialorder %v4274_v15, 0.0  ;;  %v4444_v45 = vmul.f32 0.01, %v4274_v15 }
 0x6c5   : > { %3640 = vst.msk [vmem:[#allocation5 + $0xd0] sm:$0xff] %vm3613_vm0, %v3570_v27  ;;  %vm4411_vm9 = vcmp.ge.f32.partialorder %v4269_v3, 0.0  ;;  %v4443_v2 = vmul.f32 0.01, %v4269_v3  ;;  %v3572_v20 = vpop.permute.xlu1 %3571 }
 0x6c6   : > { %v4476_v63 = vsel %vm4412_vm7, %v4274_v15, %v4444_v45  ;;  %3641 = vst.msk [vmem:[#allocation5 + $0xd8] sm:$0xff] %vm3613_vm0, %v3572_v20 }
 0x6c7   : > { %4508 = vst.msk [vmem:[%s7865_s27 + $0x28] sm:$0xff] %vm2380_vm8, %v4476_v63  ;;  %v4475_v28 = vsel %vm4411_vm9, %v4269_v3, %v4443_v2 }
 0x6c8   : > { %v3726_v31 = vpop.permute.xlu0 %3725  ;;  %4507 = vst.msk [vmem:[%s7865_s27 + $0x20] sm:$0xff] %vm2380_vm8, %v4475_v28 }
 0x6c9   : > { %3833 = vst.msk [vmem:[#allocation5 + $0xcf] sm:$0xfe] %vm3791_vm1, %v3726_v31  ;;  %v3728_v54 = vpop.permute.xlu1 %3727  ;;  %v4062_v7 = vld [vmem:[#allocation5 + $0xc8] sm:$0xff] }
 0x6ca   : > { %3834 = vst.msk [vmem:[#allocation5 + $0xd7] sm:$0xff] %vm3793_vm2, %v3728_v54  ;;  %4861 = vmatmul.mubr.msk.f32.gmra.mrb[22].mxu1 %vm4085_vm10, %v4062_v7 }
 0x6cc   : > { %v3730_v32 = vpop.permute.xlu0 %3729 }
 0x6cd   : > { %3835 = vst.msk [vmem:[#allocation5 + $0xdf] sm:$0x1] %vm3795_vm3, %v3730_v32  ;;  %v3921_v9 = vpop.permute.xlu1 %3920 }
 0x6ce   : > { %4028 = vst.msk [vmem:[#allocation5 + $0xce] sm:$0xfc] %vm3986_vm4, %v3921_v9 }
 0x6d0   : > { %v3923_v34 = vpop.permute.xlu0 %3922 }
 0x6d1   : > { %4029 = vst.msk [vmem:[#allocation5 + $0xd6] sm:$0xff] %vm3988_vm5, %v3923_v34  ;;  %v3405_v23 = vpop.permute.xlu1 %3404 }
 0x6d2   : > { %3509 = vst.msk [vmem:[#allocation5 + $0xde] sm:$0xfc] %vm3464_vm13, %v3405_v23 }
 0x6d4   : > { %v3407_v29 = vpop.permute.xlu0 %3406 }
 0x6d5   : > { %3510 = vst.msk [vmem:[#allocation5 + $0xe6] sm:$0xff] %vm3466_vm14, %v3407_v29  ;;  %v3409_v10 = vpop.permute.xlu1 %3408 }
 0x6d6   : > { %3511 = vst.msk [vmem:[#allocation5 + $0xee] sm:$0x3] %vm3468_vm15, %v3409_v10 }
 0x6d8   : > { %v3925_v46 = vpop.permute.xlu0 %3924  ;;  %v4835_v55 = vpop.f32.mrb[4].mxu1  ;;  %v4063_v30 = vld [vmem:[#allocation5 + $0xd0] sm:$0xff] }
 0x6d9   : > { %4030 = vst.msk [vmem:[#allocation5 + $0xde] sm:$0x3] %vm3990_vm6, %v3925_v46  ;;  %v4284_v33 = vadd.f32 %v4835_v55, %v7853_v56  ;;  %v4278_v0 = vpop.f32.mrb[5].mxu1  ;;  %4863 = vmatprep.mubr.msk.f32.mxu1 %vm4085_vm10, %v4063_v30  ;;  %v3574_v39 = vpop.permute.xlu1 %3573 }
 0x6da   : > { %v4279_v19 = vadd.f32 %v7853_v56, %v4278_v0  ;;  %3642 = vst.msk [vmem:[#allocation5 + $0xe0] sm:$0xff] %vm3613_vm0, %v3574_v39 }
 0x6db   : > { %vm4414_vm11 = vcmp.ge.f32.partialorder %v4284_v33, 0.0  ;;  %v4446_v52 = vmul.f32 0.01, %v4284_v33 }
 0x6dc   : > { %vm4413_vm12 = vcmp.ge.f32.partialorder %v4279_v19, 0.0  ;;  %v4445_v21 = vmul.f32 0.01, %v4279_v19  ;;  %v3576_v35 = vpop.permute.xlu0 %3575 }
 0x6dd   : > { %v4478_v62 = vsel %vm4414_vm11, %v4284_v33, %v4446_v52  ;;  %3643 = vst.msk [vmem:[#allocation5 + $0xe8] sm:$0xff] %vm3613_vm0, %v3576_v35  ;;  %v3732_v24 = vpop.permute.xlu1 %3731 }
 0x6de   : > { %4510 = vst.msk [vmem:[%s7865_s27 + $0x38] sm:$0xff] %vm2380_vm8, %v4478_v62  ;;  %v4477_v13 = vsel %vm4413_vm12, %v4279_v19, %v4445_v21 }
 0x6df   : > { %4509 = vst.msk [vmem:[%s7865_s27 + $0x30] sm:$0xff] %vm2380_vm8, %v4477_v13 }
 0x6e0   : > { %3836 = vst.msk [vmem:[#allocation5 + $0xdf] sm:$0xfe] %vm3791_vm1, %v3732_v24  ;;  %v3734_v40 = vpop.permute.xlu0 %3733  ;;  %v4064_v37 = vld [vmem:[#allocation5 + $0xd8] sm:$0xff] }
 0x6e1   : > { %3837 = vst.msk [vmem:[#allocation5 + $0xe7] sm:$0xff] %vm3793_vm2, %v3734_v40  ;;  %4864 = vmatmul.mubr.msk.f32.gmra.mrb[24].mxu1 %vm4085_vm10, %v4064_v37  ;;  %v3736_v38 = vpop.permute.xlu1 %3735 }
 0x6e2   : > { %3838 = vst.msk [vmem:[#allocation5 + $0xef] sm:$0x1] %vm3795_vm3, %v3736_v38 }
 0x6e4   : > { %v3927_v11 = vpop.permute.xlu0 %3926 }
 0x6e5   : > { %4031 = vst.msk [vmem:[#allocation5 + $0xde] sm:$0xfc] %vm3986_vm4, %v3927_v11  ;;  %v3929_v4 = vpop.permute.xlu1 %3928 }
 0x6e6   : > { %4032 = vst.msk [vmem:[#allocation5 + $0xe6] sm:$0xff] %vm3988_vm5, %v3929_v4 }
 0x6e8   : > { %v3411_v36 = vpop.permute.xlu0 %3410 }
 0x6e9   : > { %3512 = vst.msk [vmem:[#allocation5 + $0xee] sm:$0xfc] %vm3464_vm13, %v3411_v36  ;;  %v3413_v47 = vpop.permute.xlu1 %3412 }
 0x6ea   : > { %3513 = vst.msk [vmem:[#allocation5 + $0xf6] sm:$0xff] %vm3466_vm14, %v3413_v47 }
 0x6ec   : > { %v3415_v18 = vpop.permute.xlu0 %3414 }
 0x6ed   : > { %3514 = vst.msk [vmem:[#allocation5 + $0xfe] sm:$0x3] %vm3468_vm15, %v3415_v18  ;;  %v3931_v49 = vpop.permute.xlu1 %3930  ;;  %v4838_v43 = vpop.f32.mrb[6].mxu1  ;;  %v4065_v42 = vld [vmem:[#allocation5 + $0xe0] sm:$0xff] }
 0x6ee   : > { %4033 = vst.msk [vmem:[#allocation5 + $0xee] sm:$0x3] %vm3990_vm6, %v3931_v49  ;;  %v4294_v14 = vadd.f32 %v4838_v43, %v7853_v56  ;;  %v4288_v22 = vpop.f32.mrb[7].mxu1  ;;  %4866 = vmatprep.mubr.msk.f32.mxu1 %vm4085_vm10, %v4065_v42 }
 0x6ef   : > { %v4289_v25 = vadd.f32 %v7853_v56, %v4288_v22 }
 0x6f0   : > { %v3518_v59 = vpop.permute.xlu0 %3517  ;;  %vm4416_vm13 = vcmp.ge.f32.partialorder %v4294_v14, 0.0  ;;  %v4448_v58 = vmul.f32 0.01, %v4294_v14 }
 0x6f1   : > { %3614 = vst.msk [vmem:[#allocation5] sm:$0xff] %vm3613_vm0, %v3518_v59  ;;  %vm4415_vm14 = vcmp.ge.f32.partialorder %v4289_v25, 0.0  ;;  %v4447_v60 = vmul.f32 0.01, %v4289_v25  ;;  %v3520_v26 = vpop.permute.xlu1 %3519 }
 0x6f2   : > { %v4480_v48 = vsel %vm4416_vm13, %v4294_v14, %v4448_v58  ;;  %3615 = vst.msk [vmem:[#allocation5 + $0x8] sm:$0xff] %vm3613_vm0, %v3520_v26 }
 0x6f3   : > { %4512 = vst.msk [vmem:[%s7865_s27 + $0x48] sm:$0xff] %vm2380_vm8, %v4480_v48  ;;  %v4479_v44 = vsel %vm4415_vm14, %v4289_v25, %v4447_v60 }
 0x6f4   : > { %v3578_v53 = vpop.permute.xlu0 %3577  ;;  %4511 = vst.msk [vmem:[%s7865_s27 + $0x40] sm:$0xff] %vm2380_vm8, %v4479_v44 }
 0x6f5   : > { %3644 = vst.msk [vmem:[#allocation5 + $0xf0] sm:$0xff] %vm3613_vm0, %v3578_v53  ;;  %v3580_v61 = vpop.permute.xlu1 %3579  ;;  %v4066_v5 = vld [vmem:[#allocation5 + $0xe8] sm:$0xff] }
 0x6f6   : > { %3645 = vst.msk [vmem:[#allocation5 + $0xf8] sm:$0xff] %vm3613_vm0, %v3580_v61  ;;  %4867 = vmatmul.mubr.msk.f32.gmra.mrb[26].mxu1 %vm4085_vm10, %v4066_v5 }
 0x6f8   : > { %v3648_v41 = vpop.permute.xlu0 %3647 }
 0x6f9   : > { %3792 = vst.msk [vmem:[#allocation5 - $0x1] sm:$0xfe] %vm3791_vm1, %v3648_v41  ;;  %v3650_v16 = vpop.permute.xlu1 %3649 }
 0x6fa   : > { %3794 = vst.msk [vmem:[#allocation5 + $0x7] sm:$0xff] %vm3793_vm2, %v3650_v16 }
 0x6fc   : > { %v3738_v50 = vpop.permute.xlu0 %3737 }
 0x6fd   : > { %3839 = vst.msk [vmem:[#allocation5 + $0xef] sm:$0xfe] %vm3791_vm1, %v3738_v50  ;;  %v3740_v57 = vpop.permute.xlu1 %3739 }
 0x6fe   : > { %3840 = vst.msk [vmem:[#allocation5 + $0xf7] sm:$0xff] %vm3793_vm2, %v3740_v57 }
 0x700   : > { %v3652_v17 = vpop.permute.xlu0 %3651 }
 0x701   : > { %3796 = vst.msk [vmem:[#allocation5 + $0xf] sm:$0x1] %vm3795_vm3, %v3652_v17  ;;  %v3742_v12 = vpop.permute.xlu1 %3741 }
 0x702   : > { %3841 = vst.msk [vmem:[#allocation5 + $0xff] sm:$0x1] %vm3795_vm3, %v3742_v12 }
 0x704   : > { %v3843_v8 = vpop.permute.xlu0 %3842  ;;  %v4841_v6 = vpop.f32.mrb[8].mxu1 }
 0x705   : > { %3987 = vst.msk [vmem:[#allocation5 - $0x2] sm:$0xfc] %vm3986_vm4, %v3843_v8  ;;  %v4304_v1 = vadd.f32 %v4841_v6, %v7853_v56  ;;  %v4298_v15 = vpop.f32.mrb[9].mxu1  ;;  %v3845_v3 = vpop.permute.xlu1 %3844 }
 0x706   : > { %v4299_v51 = vadd.f32 %v7853_v56, %v4298_v15  ;;  %3989 = vst.msk [vmem:[#allocation5 + $0x6] sm:$0xff] %vm3988_vm5, %v3845_v3 }
 0x707   : > { %vm4418_vm15 = vcmp.ge.f32.partialorder %v4304_v1, 0.0  ;;  %v4450_v27 = vmul.f32 0.01, %v4304_v1 }
 0x708   : > { %vm4417_vm0 = vcmp.ge.f32.partialorder %v4299_v51, 0.0  ;;  %v4449_v45 = vmul.f32 0.01, %v4299_v51  ;;  %v3933_v2 = vpop.permute.xlu0 %3932 }
 0x709   : > { %v4482_v20 = vsel %vm4418_vm15, %v4304_v1, %v4450_v27  ;;  %4034 = vst.msk [vmem:[#allocation5 + $0xee] sm:$0xfc] %vm3986_vm4, %v3933_v2  ;;  %v3935_v28 = vpop.permute.xlu1 %3934 }
 0x70a   : > { %4514 = vst.msk [vmem:[%s7865_s27 + $0x58] sm:$0xff] %vm2380_vm8, %v4482_v20  ;;  %v4481_v63 = vsel %vm4417_vm0, %v4299_v51, %v4449_v45 }
 0x70b   : > { %4513 = vst.msk [vmem:[%s7865_s27 + $0x50] sm:$0xff] %vm2380_vm8, %v4481_v63 }
 0x70c   : > { %4035 = vst.msk [vmem:[#allocation5 + $0xf6] sm:$0xff] %vm3988_vm5, %v3935_v28  ;;  %v3847_v31 = vpop.permute.xlu0 %3846 }
 0x70d   : > { %3991 = vst.msk [vmem:[#allocation5 + $0xe] sm:$0x3] %vm3990_vm6, %v3847_v31  ;;  %v3937_v54 = vpop.permute.xlu1 %3936  ;;  %v4037_v7 = vld [vmem:[#allocation5] sm:$0xff] }
 0x70e   : > { %4036 = vst.msk [vmem:[#allocation5 + $0xfe] sm:$0x3] %vm3990_vm6, %v3937_v54  ;;  %4824 = vmatprep.mubr.msk.f32.mxu0 %vm4085_vm10, %v4037_v7 }
 0x713   : > { %v4067_v32 = vld [vmem:[#allocation5 + $0xf0] sm:$0xff] }
 0x714   : > { %4869 = vmatprep.mubr.msk.f32.mxu1 %vm4085_vm10, %v4067_v32  ;;  %v4038_v9 = vld [vmem:[#allocation5 + $0x8] sm:$0xff] }
 0x715   : > { %4825 = vmatmul.mubr.msk.f32.vlgmr.msra.gmra.mrb[32].mxu0 %vm4085_vm10, %v4038_v9  ;;  %v4068_v34 = vld [vmem:[#allocation5 + $0xf8] sm:$0xff] }
 0x716   : > { %4870 = vmatmul.mubr.msk.f32.gmra.mrb[28].mxu1 %vm4085_vm10, %v4068_v34 }
 0x719   : > { %v4844_v23 = vpop.f32.mrb[10].mxu1 }
 0x71a   : > { %v4314_v29 = vadd.f32 %v4844_v23, %v7853_v56  ;;  %v4308_v10 = vpop.f32.mrb[11].mxu1 }
 0x71b   : > { %v4309_v46 = vadd.f32 %v7853_v56, %v4308_v10 }
 0x71c   : > { %vm4420_vm1 = vcmp.ge.f32.partialorder %v4314_v29, 0.0  ;;  %v4452_v55 = vmul.f32 0.01, %v4314_v29 }
 0x71d   : > { %vm4419_vm2 = vcmp.ge.f32.partialorder %v4309_v46, 0.0  ;;  %v4451_v30 = vmul.f32 0.01, %v4309_v46 }
 0x71e   : > { %v4484_v33 = vsel %vm4420_vm1, %v4314_v29, %v4452_v55 }
 0x71f   : > { %4516 = vst.msk [vmem:[%s7865_s27 + $0x68] sm:$0xff] %vm2380_vm8, %v4484_v33  ;;  %v4483_v0 = vsel %vm4419_vm2, %v4309_v46, %v4451_v30 }
 0x720   : > { %4515 = vst.msk [vmem:[%s7865_s27 + $0x60] sm:$0xff] %vm2380_vm8, %v4483_v0 }
 0x730   : > { %v4847_v19 = vpop.f32.mrb[12].mxu1 }
 0x731   : > { %v4324_v39 = vadd.f32 %v4847_v19, %v7853_v56  ;;  %v4318_v52 = vpop.f32.mrb[13].mxu1 }
 0x732   : > { %v4319_v21 = vadd.f32 %v7853_v56, %v4318_v52 }
 0x733   : > { %vm4422_vm3 = vcmp.ge.f32.partialorder %v4324_v39, 0.0  ;;  %v4454_v35 = vmul.f32 0.01, %v4324_v39 }
 0x734   : > { %vm4421_vm4 = vcmp.ge.f32.partialorder %v4319_v21, 0.0  ;;  %v4453_v62 = vmul.f32 0.01, %v4319_v21 }
 0x735   : > { %v4486_v13 = vsel %vm4422_vm3, %v4324_v39, %v4454_v35 }
 0x736   : > { %4518 = vst.msk [vmem:[%s7865_s27 + $0x78] sm:$0xff] %vm2380_vm8, %v4486_v13  ;;  %v4485_v24 = vsel %vm4421_vm4, %v4319_v21, %v4453_v62 }
 0x737   : > { %4517 = vst.msk [vmem:[%s7865_s27 + $0x70] sm:$0xff] %vm2380_vm8, %v4485_v24 }
 0x745   : > { %v4850_v40 = vpop.f32.mrb[14].mxu1 }
 0x746   : > { %v4334_v37 = vadd.f32 %v4850_v40, %v7853_v56  ;;  %v4328_v38 = vpop.f32.mrb[15].mxu1 }
 0x747   : > { %v4329_v11 = vadd.f32 %v7853_v56, %v4328_v38 }
 0x748   : > { %vm4424_vm5 = vcmp.ge.f32.partialorder %v4334_v37, 0.0  ;;  %v4456_v4 = vmul.f32 0.01, %v4334_v37 }
 0x749   : > { %vm4423_vm6 = vcmp.ge.f32.partialorder %v4329_v11, 0.0  ;;  %v4455_v36 = vmul.f32 0.01, %v4329_v11 }
 0x74a   : > { %v4488_v47 = vsel %vm4424_vm5, %v4334_v37, %v4456_v4 }
 0x74b   : > { %4520 = vst.msk [vmem:[%s7865_s27 + $0x88] sm:$0xff] %vm2380_vm8, %v4488_v47  ;;  %v4487_v18 = vsel %vm4423_vm6, %v4329_v11, %v4455_v36 }
 0x74c   : > { %4519 = vst.msk [vmem:[%s7865_s27 + $0x80] sm:$0xff] %vm2380_vm8, %v4487_v18 }
 0x75c   : > { %v4853_v49 = vpop.f32.mrb[16].mxu1 }
 0x75d   : > { %v4344_v43 = vadd.f32 %v4853_v49, %v7853_v56  ;;  %v4338_v42 = vpop.f32.mrb[17].mxu1 }
 0x75e   : > { %v4339_v14 = vadd.f32 %v7853_v56, %v4338_v42 }
 0x75f   : > { %vm4426_vm10 = vcmp.ge.f32.partialorder %v4344_v43, 0.0  ;;  %v4458_v22 = vmul.f32 0.01, %v4344_v43 }
 0x760   : > { %vm4425_vm7 = vcmp.ge.f32.partialorder %v4339_v14, 0.0  ;;  %v4457_v25 = vmul.f32 0.01, %v4339_v14 }
 0x761   : > { %v4490_v59 = vsel %vm4426_vm10, %v4344_v43, %v4458_v22 }
 0x762   : > { %4522 = vst.msk [vmem:[%s7865_s27 + $0x98] sm:$0xff] %vm2380_vm8, %v4490_v59  ;;  %v4489_v58 = vsel %vm4425_vm7, %v4339_v14, %v4457_v25 }
 0x763   : > { %4521 = vst.msk [vmem:[%s7865_s27 + $0x90] sm:$0xff] %vm2380_vm8, %v4489_v58 }
 0x771   : > { %v4856_v60 = vpop.f32.mrb[18].mxu1 }
 0x772   : > { %v4354_v26 = vadd.f32 %v4856_v60, %v7853_v56  ;;  %v4348_v48 = vpop.f32.mrb[19].mxu1 }
 0x773   : > { %v4349_v44 = vadd.f32 %v7853_v56, %v4348_v48 }
 0x774   : > { %vm4428_vm9 = vcmp.ge.f32.partialorder %v4354_v26, 0.0  ;;  %v4460_v53 = vmul.f32 0.01, %v4354_v26 }
 0x775   : > { %vm4427_vm11 = vcmp.ge.f32.partialorder %v4349_v44, 0.0  ;;  %v4459_v61 = vmul.f32 0.01, %v4349_v44 }
 0x776   : > { %v4492_v5 = vsel %vm4428_vm9, %v4354_v26, %v4460_v53 }
 0x777   : > { %4524 = vst.msk [vmem:[%s7865_s27 + $0xa8] sm:$0xff] %vm2380_vm8, %v4492_v5  ;;  %v4491_v41 = vsel %vm4427_vm11, %v4349_v44, %v4459_v61 }
 0x778   : > { %4523 = vst.msk [vmem:[%s7865_s27 + $0xa0] sm:$0xff] %vm2380_vm8, %v4491_v41 }
 0x788   : > { %v4859_v16 = vpop.f32.mrb[20].mxu1 }
 0x789   : > { %v4364_v50 = vadd.f32 %v4859_v16, %v7853_v56  ;;  %v4358_v57 = vpop.f32.mrb[21].mxu1 }
 0x78a   : > { %v4359_v17 = vadd.f32 %v7853_v56, %v4358_v57 }
 0x78b   : > { %vm4430_vm12 = vcmp.ge.f32.partialorder %v4364_v50, 0.0  ;;  %v4462_v12 = vmul.f32 0.01, %v4364_v50 }
 0x78c   : > { %vm4429_vm13 = vcmp.ge.f32.partialorder %v4359_v17, 0.0  ;;  %v4461_v8 = vmul.f32 0.01, %v4359_v17 }
 0x78d   : > { %v4494_v6 = vsel %vm4430_vm12, %v4364_v50, %v4462_v12 }
 0x78e   : > { %4526 = vst.msk [vmem:[%s7865_s27 + $0xb8] sm:$0xff] %vm2380_vm8, %v4494_v6  ;;  %v4493_v1 = vsel %vm4429_vm13, %v4359_v17, %v4461_v8 }
 0x78f   : > { %4525 = vst.msk [vmem:[%s7865_s27 + $0xb0] sm:$0xff] %vm2380_vm8, %v4493_v1 }
 0x79d   : > { %v4862_v15 = vpop.f32.mrb[22].mxu1 }
 0x79e   : > { %v4374_v51 = vadd.f32 %v4862_v15, %v7853_v56  ;;  %v4368_v3 = vpop.f32.mrb[23].mxu1 }
 0x79f   : > { %v4369_v27 = vadd.f32 %v7853_v56, %v4368_v3 }
 0x7a0   : > { %vm4432_vm14 = vcmp.ge.f32.partialorder %v4374_v51, 0.0  ;;  %v4464_v45 = vmul.f32 0.01, %v4374_v51 }
 0x7a1   : > { %vm4431_vm15 = vcmp.ge.f32.partialorder %v4369_v27, 0.0  ;;  %v4463_v2 = vmul.f32 0.01, %v4369_v27 }
 0x7a2   : > { %v4496_v20 = vsel %vm4432_vm14, %v4374_v51, %v4464_v45 }
 0x7a3   : > { %4528 = vst.msk [vmem:[%s7865_s27 + $0xc8] sm:$0xff] %vm2380_vm8, %v4496_v20  ;;  %v4495_v63 = vsel %vm4431_vm15, %v4369_v27, %v4463_v2 }
 0x7a4   : > { %4527 = vst.msk [vmem:[%s7865_s27 + $0xc0] sm:$0xff] %vm2380_vm8, %v4495_v63 }
 0x7b4   : > { %v4865_v28 = vpop.f32.mrb[24].mxu1 }
 0x7b5   : > { %v4384_v31 = vadd.f32 %v4865_v28, %v7853_v56  ;;  %v4378_v54 = vpop.f32.mrb[25].mxu1 }
 0x7b6   : > { %v4379_v7 = vadd.f32 %v7853_v56, %v4378_v54 }
 0x7b7   : > { %vm4434_vm0 = vcmp.ge.f32.partialorder %v4384_v31, 0.0  ;;  %v4466_v32 = vmul.f32 0.01, %v4384_v31 }
 0x7b8   : > { %vm4433_vm1 = vcmp.ge.f32.partialorder %v4379_v7, 0.0  ;;  %v4465_v9 = vmul.f32 0.01, %v4379_v7 }
 0x7b9   : > { %v4498_v34 = vsel %vm4434_vm0, %v4384_v31, %v4466_v32 }
 0x7ba   : > { %4530 = vst.msk [vmem:[%s7865_s27 + $0xd8] sm:$0xff] %vm2380_vm8, %v4498_v34  ;;  %v4497_v23 = vsel %vm4433_vm1, %v4379_v7, %v4465_v9 }
 0x7bb   : > { %4529 = vst.msk [vmem:[%s7865_s27 + $0xd0] sm:$0xff] %vm2380_vm8, %v4497_v23 }
 0x7c9   : > { %v4868_v29 = vpop.f32.mrb[26].mxu1 }
 0x7ca   : > { %v4394_v10 = vadd.f32 %v4868_v29, %v7853_v56  ;;  %v4388_v46 = vpop.f32.mrb[27].mxu1 }
 0x7cb   : > { %v4389_v55 = vadd.f32 %v7853_v56, %v4388_v46 }
 0x7cc   : > { %vm4436_vm2 = vcmp.ge.f32.partialorder %v4394_v10, 0.0  ;;  %v4468_v30 = vmul.f32 0.01, %v4394_v10 }
 0x7cd   : > { %vm4435_vm3 = vcmp.ge.f32.partialorder %v4389_v55, 0.0  ;;  %v4467_v33 = vmul.f32 0.01, %v4389_v55 }
 0x7ce   : > { %v4500_v0 = vsel %vm4436_vm2, %v4394_v10, %v4468_v30 }
 0x7cf   : > { %4532 = vst.msk [vmem:[%s7865_s27 + $0xe8] sm:$0xff] %vm2380_vm8, %v4500_v0  ;;  %v4499_v19 = vsel %vm4435_vm3, %v4389_v55, %v4467_v33 }
 0x7d0   : > { %4531 = vst.msk [vmem:[%s7865_s27 + $0xe0] sm:$0xff] %vm2380_vm8, %v4499_v19 }
 0x7e8   : > { %v4826_v39 = vpop.f32.mrb[32].mxu0 }
 0x7e9   : > { %v4254_v52 = vadd.f32 %v4826_v39, %v7853_v56  ;;  %v4248_v21 = vpop.f32.mrb[33].mxu0  ;;  %v4871_v62 = vpop.f32.mrb[28].mxu1 }
 0x7ea   : > { %v4249_v35 = vadd.f32 %v7853_v56, %v4248_v21  ;;  %v4404_v24 = vadd.f32 %v4871_v62, %v7853_v56  ;;  %v4398_v40 = vpop.f32.mrb[29].mxu1 }
 0x7eb   : > { %vm4408_vm4 = vcmp.ge.f32.partialorder %v4254_v52, 0.0  ;;  %v4440_v13 = vmul.f32 0.01, %v4254_v52  ;;  %v4399_v38 = vadd.f32 %v7853_v56, %v4398_v40 }
 0x7ec   : > { %vm4407_vm5 = vcmp.ge.f32.partialorder %v4249_v35, 0.0  ;;  %v4439_v37 = vmul.f32 0.01, %v4249_v35  ;;  %vm4438_vm6 = vcmp.ge.f32.partialorder %v4404_v24, 0.0  ;;  %v4470_v4 = vmul.f32 0.01, %v4404_v24 }
 0x7ed   : > { %v4472_v11 = vsel %vm4408_vm4, %v4254_v52, %v4440_v13  ;;  %vm4437_vm10 = vcmp.ge.f32.partialorder %v4399_v38, 0.0  ;;  %v4469_v47 = vmul.f32 0.01, %v4399_v38 }
 0x7ee   : > { %4504 = vst.msk [vmem:[%s7865_s27 + $0x8] sm:$0xff] %vm2380_vm8, %v4472_v11  ;;  %v4471_v36 = vsel %vm4407_vm5, %v4249_v35, %v4439_v37  ;;  %v4502_v18 = vsel %vm4438_vm6, %v4404_v24, %v4470_v4 }
 0x7ef   : > { %4503 = vst.msk [vmem:[%s7865_s27] sm:$0xff] %vm2380_vm8, %v4471_v36  ;;  %4534 = vst.msk [vmem:[%s7865_s27 + $0xf8] sm:$0xff] %vm2380_vm8, %v4502_v18  ;;  %v4501_v49 = vsel %vm4437_vm10, %v4399_v38, %v4469_v47 }
 0x7f0   : > { %4533 = vst.msk [vmem:[%s7865_s27 + $0xf0] sm:$0xff] %vm2380_vm8, %v4501_v49 }
 0x7f1 PF: > { %s15_s18 = sadd.s32 1, %s4970_s18  }
 0x7f2   : > { %p12_p4 = scmp.ge.s32.totalorder %s15_s18, 4  }
 0x7f4   :  { %14 = sbr.rel (!%p12_p4) target bundleno = 1 (0x1), region = 72 }

</bundles_post_ra>
